<compile_context>
chip_gen: v5e
topology: v5e:2x2
jax: 0.10.0
libtpu: 0.0.40
codegen_flags: <defaults>
</compile_context>

<pallas_src>
import functools

import jax
import jax.numpy as jnp
from jax.experimental import pallas as pl
from jax.experimental.pallas import tpu as pltpu

_LANES = 128               # lane tile; every kernel-side last dim is 128 or 256
_OUT_LANES = 2 * _LANES    # conv outputs carry (even-x half | odd-x half)


# ------------------------------- fused Pallas kernel ---------------------------

def _net_kernel(x_ref, w1_ref, b1_ref, w2_ref, b2_ref,
                wf1_ref, bf1_ref, wf2_ref, bf2_ref,
                xf_ref, logp_ref, *, tb):
    """Entire Net.forward for one tile of `tb` images, fully in VMEM.

    Layouts (rows are always (spatial_y, n); lanes are always dense):
      x_ref : (28, tb, 128)   lane = w*3 + c                   (84 real lanes)
      conv1 : (24*tb, 256)    lane = (ox%2)*128 + c1*12 + ox//2
      p1    : (12*tb, 128)    lane = c1*12 + x2
      conv2 : (8*tb, 256)     lane = (ox2%2)*128 + c2*4 + ox2//2
      p2    : (4*tb, 128)     lane = c2*4 + x3
      xf    : (tb, 128)       lane = fc1 feature (50 real)
      logp  : (tb, 128)       lane = class (10 real)
    """
    f32 = jnp.float32
    mdt = w1_ref.dtype                       # MXU dtype (bf16 by default)

    # ---- conv1 (3 -> 10): 5 banded matmuls, one per kernel row ki ----
    xv = x_ref[...]                          # (28, tb, 128) f32
    acc1 = None
    for ki in range(5):
        lhs = xv[ki:ki + 24].reshape(24 * tb, _LANES).astype(mdt)
        t = jnp.dot(lhs, w1_ref[ki], preferred_element_type=f32)
        acc1 = t if acc1 is None else acc1 + t            # (24*tb, 256) f32
    acc1 = acc1 + b1_ref[...].astype(f32)

    # maxpool 2x2 + ReLU: row pairs are whole sublane tiles, column pairs are the
    # two aligned 128-lane halves (parity-interleaved lane order).
    a = acc1.reshape(12, 2, tb, _OUT_LANES)
    m1 = jnp.maximum(a[:, 0], a[:, 1]).reshape(12 * tb, _OUT_LANES)
    p1 = jnp.maximum(jnp.maximum(m1[:, :_LANES], m1[:, _LANES:]), 0.0)   # (12*tb, 128)

    # ---- conv2 (10 -> 20), same structure ----
    # TODO(synk): Dropout2d / F.dropout are identity here (inference-mode only).
    acc2 = None
    for ki in range(5):
        lhs = p1[ki * tb:(ki + 8) * tb].astype(mdt)
        t = jnp.dot(lhs, w2_ref[ki], preferred_element_type=f32)
        acc2 = t if acc2 is None else acc2 + t            # (8*tb, 256) f32
    acc2 = acc2 + b2_ref[...].astype(f32)

    a2 = acc2.reshape(4, 2, tb, _OUT_LANES)
    m2 = jnp.maximum(a2[:, 0], a2[:, 1]).reshape(4 * tb, _OUT_LANES)
    p2 = jnp.maximum(jnp.maximum(m2[:, :_LANES], m2[:, _LANES:]), 0.0)   # (4*tb, 128)

    # ---- fc1 (320 -> 50) + ReLU: NCHW flatten + pool compaction folded into wf1 ----
    accf = None
    for y3 in range(4):
        t = jnp.dot(p2[y3 * tb:(y3 + 1) * tb].astype(mdt), wf1_ref[y3],
                    preferred_element_type=f32)
        accf = t if accf is None else accf + t            # (tb, 128) f32
    xf = jnp.maximum(accf + bf1_ref[...].astype(f32), 0.0)               # lanes >= 50 are 0
    xf_ref[...] = xf

    # ---- fc2 (50 -> 10) + masked log_softmax over the 10 real classes ----
    logits = jnp.dot(xf.astype(mdt), wf2_ref[...], preferred_element_type=f32)
    logits = logits + bf2_ref[...].astype(f32)
    lane = jax.lax.broadcasted_iota(jnp.int32, logits.shape, 1)
    logits = jnp.where(lane < 10, logits, -1e30)
    m = jnp.max(logits, axis=-1, keepdims=True)
    z = logits - m
    se = jnp.sum(jnp.exp(z), axis=-1, keepdims=True)
    logp_ref[...] = z - jnp.log(se)


# ------------------------------- parameters ------------------------------------

def init_params(key):
    keys = jax.random.split(key, 8)

    def u(k, shape, fan_in):
        bound = 1.0 / jnp.sqrt(jnp.float32(fan_in))
        return jax.random.uniform(k, shape, jnp.float32, -bound, bound)

    return dict(
        conv1_w=u(keys[0], (10, 3, 5, 5), 3 * 5 * 5),
        conv1_b=u(keys[1], (10,), 3 * 5 * 5),
        conv2_w=u(keys[2], (20, 10, 5, 5), 10 * 5 * 5),
        conv2_b=u(keys[3], (20,), 10 * 5 * 5),
        fc1_w=u(keys[4], (50, 320), 320),   # PyTorch Linear layout (out, in)
        fc1_b=u(keys[5], (50,), 320),
        fc2_w=u(keys[6], (10, 50), 50),
        fc2_b=u(keys[7], (10,), 50),
    )


def pack_params(raw, mxu_dtype=jnp.bfloat16):
    """One-time repack of PyTorch-layout params into resident, lane-dense kernel
    layouts.  Conv weights become banded (Toeplitz-over-x) matrices so each conv
    is 5 dense MXU dots; the output lane order interleaves even/odd x so 2x2
    pooling is a 128-lane-half max.  Biases stay f32 (added after accumulation).
    """
    f32 = jnp.float32

    def lane_scatter(mat, cols, rows_pad):
        out = jnp.zeros((mat.shape[0], _OUT_LANES), f32).at[:, cols].set(mat)
        return jnp.pad(out, ((0, rows_pad - mat.shape[0]), (0, 0)))

    def pool_lanes(n_ch, out_w):
        # output lane = (ox % 2)*128 + c*(out_w//2) + ox//2, flattened (c major, ox minor)
        c = jnp.arange(n_ch)[:, None]
        ox = jnp.arange(out_w)[None, :]
        return ((ox % 2) * _LANES + c * (out_w // 2) + ox // 2).reshape(-1)

    cols1 = pool_lanes(10, 24)    # conv1 output lanes (c1 in [0,10), ox in [0,24))
    cols2 = pool_lanes(20, 8)     # conv2 output lanes (c2 in [0,20), ox2 in [0,8))

    # conv1: W1[ki][(w*3 + c), lane(c1, ox)] = conv1_w[c1, c, ki, w - ox] (banded)
    w_in = jnp.arange(28)[:, None]
    ox = jnp.arange(24)[None, :]
    kj1 = w_in - ox
    valid1 = (kj1 >= 0) & (kj1 < 5)
    kj1c = jnp.clip(kj1, 0, 4)
    w1_list = []
    for ki in range(5):
        wk = raw["conv1_w"][:, :, ki, :].astype(f32)          # (10, 3, 5)  [c1, c, kj]
        t = jnp.where(valid1[None, None], wk[:, :, kj1c], 0.0)  # (10, 3, 28, 24)
        t = jnp.transpose(t, (2, 1, 0, 3)).reshape(84, 240)   # rows (w, c), cols (c1, ox)
        w1_list.append(lane_scatter(t, cols1, _LANES))
    w1 = jnp.stack(w1_list)                                    # (5, 128, 256)

    # conv2: W2[ki][(c1*12 + x2), lane(c2, ox2)] = conv2_w[c2, c1, ki, x2 - ox2]
    x2 = jnp.arange(12)[:, None]
    ox2 = jnp.arange(8)[None, :]
    kj2 = x2 - ox2
    valid2 = (kj2 >= 0) & (kj2 < 5)
    kj2c = jnp.clip(kj2, 0, 4)
    w2_list = []
    for ki in range(5):
        wk = raw["conv2_w"][:, :, ki, :].astype(f32)          # (20, 10, 5)  [c2, c1, kj]
        t = jnp.where(valid2[None, None], wk[:, :, kj2c], 0.0)  # (20, 10, 12, 8)
        t = jnp.transpose(t, (1, 2, 0, 3)).reshape(120, 160)  # rows (c1, x2), cols (c2, ox2)
        w2_list.append(lane_scatter(t, cols2, _LANES))
    w2 = jnp.stack(w2_list)                                    # (5, 128, 256)

    # biases in the matching interleaved lane order
    b1 = jnp.zeros((_OUT_LANES,), f32).at[cols1].set(jnp.repeat(raw["conv1_b"].astype(f32), 24))
    b2 = jnp.zeros((_OUT_LANES,), f32).at[cols2].set(jnp.repeat(raw["conv2_b"].astype(f32), 8))

    # fc1: Wf1[y3][(c2*4 + x3), j] = fc1_w[j, c2*16 + y3*4 + x3]  (NCHW flatten folded in)
    f = raw["fc1_w"].astype(f32).reshape(50, 20, 4, 4)          # [j, c2, y3, x3]
    wf1 = jnp.transpose(f, (2, 1, 3, 0)).reshape(4, 80, 50)
    wf1 = jnp.pad(wf1, ((0, 0), (0, _LANES - 80), (0, _LANES - 50)))

    wf2 = jnp.pad(raw["fc2_w"].astype(f32).T, ((0, _LANES - 50), (0, _LANES - 10)))

    return dict(
        w1=w1.astype(mxu_dtype),
        b1=b1.reshape(1, _OUT_LANES),
        w2=w2.astype(mxu_dtype),
        b2=b2.reshape(1, _OUT_LANES),
        wf1=wf1.astype(mxu_dtype),
        bf1=jnp.pad(raw["fc1_b"].astype(f32)[None, :], ((0, 0), (0, _LANES - 50))),
        wf2=wf2.astype(mxu_dtype),
        bf2=jnp.pad(raw["fc2_b"].astype(f32)[None, :], ((0, 0), (0, _LANES - 10))),
    )


# ------------------------------- hardware helpers --------------------------------

def _device_vmem_bytes():
    try:
        return int(pltpu.get_tpu_info().vmem_capacity_bytes)
    except Exception:
        return 128 * 1024 * 1024


def _pick_tb(n, vmem_bytes):
    # 32 images/step on v5e/v6e (128 MiB VMEM), 16 on v7x (64 MiB); keep >= 2 grid
    # steps when the batch allows it so megacore parallel sharding has work.
    tb = 16 if vmem_bytes <= (96 << 20) else 32
    while tb > 8 and n < 2 * tb:
        tb //= 2
    return tb


def _vmem_limit_bytes(params, tb, vmem_cap):
    weight_bytes = sum(int(v.size) * v.dtype.itemsize for v in params.values())
    io_bytes = 2 * (28 * tb * _LANES * 4 + 2 * tb * _LANES * 4)   # double-buffered blocks
    est = 2 * weight_bytes + io_bytes + (16 << 20)                # headroom for f32 temporaries
    return int(min(max(est, 20 << 20), (vmem_cap * 45) // 100))


# ------------------------------- forward wrapper --------------------------------

def pack_input(x_nchw, n_pad):
    """(N, 3, 28, 28) -> (28, n_pad, 128) f32 with lane = w*3 + c (lanes >= 84 zero).
    This relayout reads ~9.4 KB and writes ~14 KB per image; produce the input in
    this layout upstream and call net_forward_packed() to remove it entirely."""
    n = x_nchw.shape[0]
    x = x_nchw.astype(jnp.float32)
    if n_pad != n:
        x = jnp.pad(x, ((0, n_pad - n), (0, 0), (0, 0), (0, 0)))
    xt = jnp.transpose(x, (2, 0, 3, 1)).reshape(28, n_pad, 84)
    return jnp.pad(xt, ((0, 0), (0, 0), (0, _LANES - 84)))


def net_forward_packed(params, x_packed, tb, vmem_cap):
    n_pad = x_packed.shape[1]
    grid = (n_pad // tb,)

    def resident(shape):
        zeros = (0,) * len(shape)
        return pl.BlockSpec(shape, lambda b, z=zeros: z)

    in_specs = [
        pl.BlockSpec((28, tb, _LANES), lambda b: (0, b, 0)),
        resident(params["w1"].shape),
        resident(params["b1"].shape),
        resident(params["w2"].shape),
        resident(params["b2"].shape),
        resident(params["wf1"].shape),
        resident(params["bf1"].shape),
        resident(params["wf2"].shape),
        resident(params["bf2"].shape),
    ]
    out_specs = (
        pl.BlockSpec((tb, _LANES), lambda b: (b, 0)),
        pl.BlockSpec((tb, _LANES), lambda b: (b, 0)),
    )
    out_shape = (
        jax.ShapeDtypeStruct((n_pad, _LANES), jnp.float32),
        jax.ShapeDtypeStruct((n_pad, _LANES), jnp.float32),
    )

    macs = n_pad * (5 * 24 * 128 * 256 + 5 * 8 * 128 * 256 + 4 * 128 * 128 + 128 * 128)
    bytes_accessed = (int(x_packed.size) * 4
                      + sum(int(v.size) * v.dtype.itemsize for v in params.values())
                      + 2 * n_pad * _LANES * 4)
    cost = pl.CostEstimate(flops=2 * macs, transcendentals=140 * n_pad,
                           bytes_accessed=int(bytes_accessed))

    return pl.pallas_call(
        functools.partial(_net_kernel, tb=tb),
        out_shape=out_shape,
        grid=grid,
        in_specs=in_specs,
        out_specs=out_specs,
        compiler_params=pltpu.CompilerParams(
            dimension_semantics=("parallel",),
            vmem_limit_bytes=_vmem_limit_bytes(params, tb, vmem_cap),
        ),
        cost_estimate=cost,
    )(x_packed, params["w1"], params["b1"], params["w2"], params["b2"],
      params["wf1"], params["bf1"], params["wf2"], params["bf2"])


def net_forward(params, x_nchw):
    n, c, h, w = x_nchw.shape
    assert (c, h, w) == (3, 28, 28), "Net expects (N, 3, 28, 28) input"
    vmem_cap = _device_vmem_bytes()
    tb = _pick_tb(n, vmem_cap)
    n_pad = pl.cdiv(n, tb) * tb
    xf_pad, logp_pad = net_forward_packed(params, pack_input(x_nchw, n_pad), tb, vmem_cap)
    # Lane-dense kernel outputs, sliced back to the module's logical widths.
    return xf_pad[:n, :50], logp_pad[:n, :10]


# ------------------------------- plain-JAX reference ----------------------------

def net_forward_reference(raw, x):
    dn = ("NCHW", "OIHW", "NCHW")
    y = jax.lax.conv_general_dilated(x, raw["conv1_w"], (1, 1), "VALID",
                                     dimension_numbers=dn)
    y = y + raw["conv1_b"][None, :, None, None]
    y = jax.lax.reduce_window(y, -jnp.inf, jax.lax.max, (1, 1, 2, 2), (1, 1, 2, 2), "VALID")
    y = jnp.maximum(y, 0.0)
    y = jax.lax.conv_general_dilated(y, raw["conv2_w"], (1, 1), "VALID",
                                     dimension_numbers=dn)
    y = y + raw["conv2_b"][None, :, None, None]
    y = jax.lax.reduce_window(y, -jnp.inf, jax.lax.max, (1, 1, 2, 2), (1, 1, 2, 2), "VALID")
    y = jnp.maximum(y, 0.0)
    flat = y.reshape(y.shape[0], -1)                 # NCHW flatten == x.view(-1, 320)
    xf = jnp.maximum(flat @ raw["fc1_w"].T + raw["fc1_b"], 0.0)
    logits = xf @ raw["fc2_w"].T + raw["fc2_b"]
    return xf, jax.nn.log_softmax(logits, axis=-1)


if __name__ == "__main__":
    key = jax.random.PRNGKey(0)
    pkey, xkey = jax.random.split(key)
    raw = init_params(pkey)
    params = pack_params(raw)                        # one-time repack, bf16 MXU weights
    x = jax.random.normal(xkey, (2, 3, 28, 28), jnp.float32)

    fwd = jax.jit(net_forward)
    x_f, logp = fwd(params, x)
    jax.block_until_ready((x_f, logp))

    assert x_f.shape == (2, 50) and logp.shape == (2, 10)
    assert bool(jnp.all(jnp.isfinite(x_f))) and bool(jnp.all(jnp.isfinite(logp)))
    assert bool(jnp.allclose(jnp.sum(jnp.exp(logp), axis=1), 1.0, atol=1e-5))

    # Cross-check the fused Pallas kernel against a plain-JAX/XLA f32 reference.
    x_f_ref, logp_ref = net_forward_reference(raw, x)
    assert bool(jnp.allclose(x_f, x_f_ref, atol=5e-2, rtol=5e-2))
    assert bool(jnp.allclose(logp, logp_ref, atol=5e-2, rtol=5e-2))

    print("KERNEL_OK")
</pallas_src>

<mosaic_0001>
module attributes {stable_mosaic.version = 11 : i64} {
  func.func @_net_kernel(%arg0: i32, %arg1: memref<28x8x128xf32, #tpu.memory_space<vmem>>, %arg2: memref<5x128x256xbf16, #tpu.memory_space<vmem>>, %arg3: memref<1x256xf32, #tpu.memory_space<vmem>>, %arg4: memref<5x128x256xbf16, #tpu.memory_space<vmem>>, %arg5: memref<1x256xf32, #tpu.memory_space<vmem>>, %arg6: memref<4x128x128xbf16, #tpu.memory_space<vmem>>, %arg7: memref<1x128xf32, #tpu.memory_space<vmem>>, %arg8: memref<128x128xbf16, #tpu.memory_space<vmem>>, %arg9: memref<1x128xf32, #tpu.memory_space<vmem>>, %arg10: memref<8x128xf32, #tpu.memory_space<vmem>>, %arg11: memref<8x128xf32, #tpu.memory_space<vmem>>) attributes {dimension_semantics = [#tpu.dimension_semantics<parallel>], iteration_bounds = array<i64: 1>, scalar_prefetch = 0 : i64, scratch_operands = 0 : i64, tpu.core_type = #tpu.core_type<tc>, window_params = [{transform_indices = @transform_0, window_bounds = array<i64: 28, 8, 128>}, {pipeline_mode = #tpu.pipeline_mode<synchronous>, transform_indices = @transform_1, window_bounds = array<i64: 5, 128, 256>}, {pipeline_mode = #tpu.pipeline_mode<synchronous>, transform_indices = @transform_2, window_bounds = array<i64: 1, 256>}, {pipeline_mode = #tpu.pipeline_mode<synchronous>, transform_indices = @transform_3, window_bounds = array<i64: 5, 128, 256>}, {pipeline_mode = #tpu.pipeline_mode<synchronous>, transform_indices = @transform_4, window_bounds = array<i64: 1, 256>}, {pipeline_mode = #tpu.pipeline_mode<synchronous>, transform_indices = @transform_5, window_bounds = array<i64: 4, 128, 128>}, {pipeline_mode = #tpu.pipeline_mode<synchronous>, transform_indices = @transform_6, window_bounds = array<i64: 1, 128>}, {pipeline_mode = #tpu.pipeline_mode<synchronous>, transform_indices = @transform_7, window_bounds = array<i64: 128, 128>}, {pipeline_mode = #tpu.pipeline_mode<synchronous>, transform_indices = @transform_8, window_bounds = array<i64: 1, 128>}, {transform_indices = @transform_9, window_bounds = array<i64: 8, 128>}, {transform_indices = @transform_10, window_bounds = array<i64: 8, 128>}]} {
    %c0 = arith.constant 0 : index
    %c0_0 = arith.constant 0 : index
    %c0_1 = arith.constant 0 : index
    %0 = vector.load %arg1[%c0, %c0_0, %c0_1] : memref<28x8x128xf32, #tpu.memory_space<vmem>>, vector<28x8x128xf32>
    %1 = vector.extract_strided_slice %0 {offsets = [0, 0, 0], sizes = [24, 8, 128], strides = [1, 1, 1]} : vector<28x8x128xf32> to vector<24x8x128xf32>
    %2 = vector.shape_cast %1 : vector<24x8x128xf32> to vector<192x128xf32>
    %3 = arith.truncf %2 : vector<192x128xf32> to vector<192x128xbf16>
    %c0_2 = arith.constant 0 : index
    %c0_3 = arith.constant 0 : index
    %c0_4 = arith.constant 0 : index
    %4 = vector.load %arg2[%c0_2, %c0_3, %c0_4] : memref<5x128x256xbf16, #tpu.memory_space<vmem>>, vector<1x128x256xbf16>
    %5 = vector.shape_cast %4 : vector<1x128x256xbf16> to vector<128x256xbf16>
    %cst = arith.constant dense<0.000000e+00> : vector<192x256xf32>
    %6 = tpu.matmul %3, %5, %cst {dimension_numbers = #tpu.dot_dimension_numbers<[1], [0], [0], [1], [0, 0, 1, 1], [], []>} : vector<192x128xbf16>, vector<128x256xbf16>, vector<192x256xf32> -> vector<192x256xf32>
    %7 = vector.extract_strided_slice %0 {offsets = [1, 0, 0], sizes = [24, 8, 128], strides = [1, 1, 1]} : vector<28x8x128xf32> to vector<24x8x128xf32>
    %8 = vector.shape_cast %7 : vector<24x8x128xf32> to vector<192x128xf32>
    %9 = arith.truncf %8 : vector<192x128xf32> to vector<192x128xbf16>
    %c1 = arith.constant 1 : index
    %c0_5 = arith.constant 0 : index
    %c0_6 = arith.constant 0 : index
    %10 = vector.load %arg2[%c1, %c0_5, %c0_6] : memref<5x128x256xbf16, #tpu.memory_space<vmem>>, vector<1x128x256xbf16>
    %11 = vector.shape_cast %10 : vector<1x128x256xbf16> to vector<128x256xbf16>
    %cst_7 = arith.constant dense<0.000000e+00> : vector<192x256xf32>
    %12 = tpu.matmul %9, %11, %cst_7 {dimension_numbers = #tpu.dot_dimension_numbers<[1], [0], [0], [1], [0, 0, 1, 1], [], []>} : vector<192x128xbf16>, vector<128x256xbf16>, vector<192x256xf32> -> vector<192x256xf32>
    %13 = arith.addf %6, %12 : vector<192x256xf32>
    %14 = vector.extract_strided_slice %0 {offsets = [2, 0, 0], sizes = [24, 8, 128], strides = [1, 1, 1]} : vector<28x8x128xf32> to vector<24x8x128xf32>
    %15 = vector.shape_cast %14 : vector<24x8x128xf32> to vector<192x128xf32>
    %16 = arith.truncf %15 : vector<192x128xf32> to vector<192x128xbf16>
    %c2 = arith.constant 2 : index
    %c0_8 = arith.constant 0 : index
    %c0_9 = arith.constant 0 : index
    %17 = vector.load %arg2[%c2, %c0_8, %c0_9] : memref<5x128x256xbf16, #tpu.memory_space<vmem>>, vector<1x128x256xbf16>
    %18 = vector.shape_cast %17 : vector<1x128x256xbf16> to vector<128x256xbf16>
    %cst_10 = arith.constant dense<0.000000e+00> : vector<192x256xf32>
    %19 = tpu.matmul %16, %18, %cst_10 {dimension_numbers = #tpu.dot_dimension_numbers<[1], [0], [0], [1], [0, 0, 1, 1], [], []>} : vector<192x128xbf16>, vector<128x256xbf16>, vector<192x256xf32> -> vector<192x256xf32>
    %20 = arith.addf %13, %19 : vector<192x256xf32>
    %21 = vector.extract_strided_slice %0 {offsets = [3, 0, 0], sizes = [24, 8, 128], strides = [1, 1, 1]} : vector<28x8x128xf32> to vector<24x8x128xf32>
    %22 = vector.shape_cast %21 : vector<24x8x128xf32> to vector<192x128xf32>
    %23 = arith.truncf %22 : vector<192x128xf32> to vector<192x128xbf16>
    %c3 = arith.constant 3 : index
    %c0_11 = arith.constant 0 : index
    %c0_12 = arith.constant 0 : index
    %24 = vector.load %arg2[%c3, %c0_11, %c0_12] : memref<5x128x256xbf16, #tpu.memory_space<vmem>>, vector<1x128x256xbf16>
    %25 = vector.shape_cast %24 : vector<1x128x256xbf16> to vector<128x256xbf16>
    %cst_13 = arith.constant dense<0.000000e+00> : vector<192x256xf32>
    %26 = tpu.matmul %23, %25, %cst_13 {dimension_numbers = #tpu.dot_dimension_numbers<[1], [0], [0], [1], [0, 0, 1, 1], [], []>} : vector<192x128xbf16>, vector<128x256xbf16>, vector<192x256xf32> -> vector<192x256xf32>
    %27 = arith.addf %20, %26 : vector<192x256xf32>
    %28 = vector.extract_strided_slice %0 {offsets = [4, 0, 0], sizes = [24, 8, 128], strides = [1, 1, 1]} : vector<28x8x128xf32> to vector<24x8x128xf32>
    %29 = vector.shape_cast %28 : vector<24x8x128xf32> to vector<192x128xf32>
    %30 = arith.truncf %29 : vector<192x128xf32> to vector<192x128xbf16>
    %c4 = arith.constant 4 : index
    %c0_14 = arith.constant 0 : index
    %c0_15 = arith.constant 0 : index
    %31 = vector.load %arg2[%c4, %c0_14, %c0_15] : memref<5x128x256xbf16, #tpu.memory_space<vmem>>, vector<1x128x256xbf16>
    %32 = vector.shape_cast %31 : vector<1x128x256xbf16> to vector<128x256xbf16>
    %cst_16 = arith.constant dense<0.000000e+00> : vector<192x256xf32>
    %33 = tpu.matmul %30, %32, %cst_16 {dimension_numbers = #tpu.dot_dimension_numbers<[1], [0], [0], [1], [0, 0, 1, 1], [], []>} : vector<192x128xbf16>, vector<128x256xbf16>, vector<192x256xf32> -> vector<192x256xf32>
    %34 = arith.addf %27, %33 : vector<192x256xf32>
    %c0_17 = arith.constant 0 : index
    %c0_18 = arith.constant 0 : index
    %35 = vector.load %arg3[%c0_17, %c0_18] : memref<1x256xf32, #tpu.memory_space<vmem>>, vector<1x256xf32>
    %36 = vector.broadcast %35 : vector<1x256xf32> to vector<192x256xf32>
    %37 = arith.addf %34, %36 : vector<192x256xf32>
    %38 = vector.shape_cast %37 : vector<192x256xf32> to vector<12x2x8x256xf32>
    %39 = vector.extract_strided_slice %38 {offsets = [0, 0, 0, 0], sizes = [12, 1, 8, 256], strides = [1, 1, 1, 1]} : vector<12x2x8x256xf32> to vector<12x1x8x256xf32>
    %40 = vector.shape_cast %39 : vector<12x1x8x256xf32> to vector<12x8x256xf32>
    %41 = vector.extract_strided_slice %38 {offsets = [0, 1, 0, 0], sizes = [12, 1, 8, 256], strides = [1, 1, 1, 1]} : vector<12x2x8x256xf32> to vector<12x1x8x256xf32>
    %42 = vector.shape_cast %41 : vector<12x1x8x256xf32> to vector<12x8x256xf32>
    %43 = arith.maximumf %40, %42 : vector<12x8x256xf32>
    %44 = vector.shape_cast %43 : vector<12x8x256xf32> to vector<96x256xf32>
    %45 = vector.extract_strided_slice %44 {offsets = [0, 0], sizes = [96, 128], strides = [1, 1]} : vector<96x256xf32> to vector<96x128xf32>
    %46 = vector.extract_strided_slice %44 {offsets = [0, 128], sizes = [96, 128], strides = [1, 1]} : vector<96x256xf32> to vector<96x128xf32>
    %47 = arith.maximumf %45, %46 : vector<96x128xf32>
    %cst_19 = arith.constant 0.000000e+00 : f32
    %48 = vector.broadcast %cst_19 : f32 to vector<96x128xf32>
    %49 = arith.maximumf %47, %48 : vector<96x128xf32>
    %50 = vector.extract_strided_slice %49 {offsets = [0, 0], sizes = [64, 128], strides = [1, 1]} : vector<96x128xf32> to vector<64x128xf32>
    %51 = arith.truncf %50 : vector<64x128xf32> to vector<64x128xbf16>
    %c0_20 = arith.constant 0 : index
    %c0_21 = arith.constant 0 : index
    %c0_22 = arith.constant 0 : index
    %52 = vector.load %arg4[%c0_20, %c0_21, %c0_22] : memref<5x128x256xbf16, #tpu.memory_space<vmem>>, vector<1x128x256xbf16>
    %53 = vector.shape_cast %52 : vector<1x128x256xbf16> to vector<128x256xbf16>
    %cst_23 = arith.constant dense<0.000000e+00> : vector<64x256xf32>
    %54 = tpu.matmul %51, %53, %cst_23 {dimension_numbers = #tpu.dot_dimension_numbers<[1], [0], [0], [1], [0, 0, 1, 1], [], []>} : vector<64x128xbf16>, vector<128x256xbf16>, vector<64x256xf32> -> vector<64x256xf32>
    %55 = vector.extract_strided_slice %49 {offsets = [8, 0], sizes = [64, 128], strides = [1, 1]} : vector<96x128xf32> to vector<64x128xf32>
    %56 = arith.truncf %55 : vector<64x128xf32> to vector<64x128xbf16>
    %c1_24 = arith.constant 1 : index
    %c0_25 = arith.constant 0 : index
    %c0_26 = arith.constant 0 : index
    %57 = vector.load %arg4[%c1_24, %c0_25, %c0_26] : memref<5x128x256xbf16, #tpu.memory_space<vmem>>, vector<1x128x256xbf16>
    %58 = vector.shape_cast %57 : vector<1x128x256xbf16> to vector<128x256xbf16>
    %cst_27 = arith.constant dense<0.000000e+00> : vector<64x256xf32>
    %59 = tpu.matmul %56, %58, %cst_27 {dimension_numbers = #tpu.dot_dimension_numbers<[1], [0], [0], [1], [0, 0, 1, 1], [], []>} : vector<64x128xbf16>, vector<128x256xbf16>, vector<64x256xf32> -> vector<64x256xf32>
    %60 = arith.addf %54, %59 : vector<64x256xf32>
    %61 = vector.extract_strided_slice %49 {offsets = [16, 0], sizes = [64, 128], strides = [1, 1]} : vector<96x128xf32> to vector<64x128xf32>
    %62 = arith.truncf %61 : vector<64x128xf32> to vector<64x128xbf16>
    %c2_28 = arith.constant 2 : index
    %c0_29 = arith.constant 0 : index
    %c0_30 = arith.constant 0 : index
    %63 = vector.load %arg4[%c2_28, %c0_29, %c0_30] : memref<5x128x256xbf16, #tpu.memory_space<vmem>>, vector<1x128x256xbf16>
    %64 = vector.shape_cast %63 : vector<1x128x256xbf16> to vector<128x256xbf16>
    %cst_31 = arith.constant dense<0.000000e+00> : vector<64x256xf32>
    %65 = tpu.matmul %62, %64, %cst_31 {dimension_numbers = #tpu.dot_dimension_numbers<[1], [0], [0], [1], [0, 0, 1, 1], [], []>} : vector<64x128xbf16>, vector<128x256xbf16>, vector<64x256xf32> -> vector<64x256xf32>
    %66 = arith.addf %60, %65 : vector<64x256xf32>
    %67 = vector.extract_strided_slice %49 {offsets = [24, 0], sizes = [64, 128], strides = [1, 1]} : vector<96x128xf32> to vector<64x128xf32>
    %68 = arith.truncf %67 : vector<64x128xf32> to vector<64x128xbf16>
    %c3_32 = arith.constant 3 : index
    %c0_33 = arith.constant 0 : index
    %c0_34 = arith.constant 0 : index
    %69 = vector.load %arg4[%c3_32, %c0_33, %c0_34] : memref<5x128x256xbf16, #tpu.memory_space<vmem>>, vector<1x128x256xbf16>
    %70 = vector.shape_cast %69 : vector<1x128x256xbf16> to vector<128x256xbf16>
    %cst_35 = arith.constant dense<0.000000e+00> : vector<64x256xf32>
    %71 = tpu.matmul %68, %70, %cst_35 {dimension_numbers = #tpu.dot_dimension_numbers<[1], [0], [0], [1], [0, 0, 1, 1], [], []>} : vector<64x128xbf16>, vector<128x256xbf16>, vector<64x256xf32> -> vector<64x256xf32>
    %72 = arith.addf %66, %71 : vector<64x256xf32>
    %73 = vector.extract_strided_slice %49 {offsets = [32, 0], sizes = [64, 128], strides = [1, 1]} : vector<96x128xf32> to vector<64x128xf32>
    %74 = arith.truncf %73 : vector<64x128xf32> to vector<64x128xbf16>
    %c4_36 = arith.constant 4 : index
    %c0_37 = arith.constant 0 : index
    %c0_38 = arith.constant 0 : index
    %75 = vector.load %arg4[%c4_36, %c0_37, %c0_38] : memref<5x128x256xbf16, #tpu.memory_space<vmem>>, vector<1x128x256xbf16>
    %76 = vector.shape_cast %75 : vector<1x128x256xbf16> to vector<128x256xbf16>
    %cst_39 = arith.constant dense<0.000000e+00> : vector<64x256xf32>
    %77 = tpu.matmul %74, %76, %cst_39 {dimension_numbers = #tpu.dot_dimension_numbers<[1], [0], [0], [1], [0, 0, 1, 1], [], []>} : vector<64x128xbf16>, vector<128x256xbf16>, vector<64x256xf32> -> vector<64x256xf32>
    %78 = arith.addf %72, %77 : vector<64x256xf32>
    %c0_40 = arith.constant 0 : index
    %c0_41 = arith.constant 0 : index
    %79 = vector.load %arg5[%c0_40, %c0_41] : memref<1x256xf32, #tpu.memory_space<vmem>>, vector<1x256xf32>
    %80 = vector.broadcast %79 : vector<1x256xf32> to vector<64x256xf32>
    %81 = arith.addf %78, %80 : vector<64x256xf32>
    %82 = vector.shape_cast %81 : vector<64x256xf32> to vector<4x2x8x256xf32>
    %83 = vector.extract_strided_slice %82 {offsets = [0, 0, 0, 0], sizes = [4, 1, 8, 256], strides = [1, 1, 1, 1]} : vector<4x2x8x256xf32> to vector<4x1x8x256xf32>
    %84 = vector.shape_cast %83 : vector<4x1x8x256xf32> to vector<4x8x256xf32>
    %85 = vector.extract_strided_slice %82 {offsets = [0, 1, 0, 0], sizes = [4, 1, 8, 256], strides = [1, 1, 1, 1]} : vector<4x2x8x256xf32> to vector<4x1x8x256xf32>
    %86 = vector.shape_cast %85 : vector<4x1x8x256xf32> to vector<4x8x256xf32>
    %87 = arith.maximumf %84, %86 : vector<4x8x256xf32>
    %88 = vector.shape_cast %87 : vector<4x8x256xf32> to vector<32x256xf32>
    %89 = vector.extract_strided_slice %88 {offsets = [0, 0], sizes = [32, 128], strides = [1, 1]} : vector<32x256xf32> to vector<32x128xf32>
    %90 = vector.extract_strided_slice %88 {offsets = [0, 128], sizes = [32, 128], strides = [1, 1]} : vector<32x256xf32> to vector<32x128xf32>
    %91 = arith.maximumf %89, %90 : vector<32x128xf32>
    %cst_42 = arith.constant 0.000000e+00 : f32
    %92 = vector.broadcast %cst_42 : f32 to vector<32x128xf32>
    %93 = arith.maximumf %91, %92 : vector<32x128xf32>
    %94 = vector.extract_strided_slice %93 {offsets = [0, 0], sizes = [8, 128], strides = [1, 1]} : vector<32x128xf32> to vector<8x128xf32>
    %95 = arith.truncf %94 : vector<8x128xf32> to vector<8x128xbf16>
    %c0_43 = arith.constant 0 : index
    %c0_44 = arith.constant 0 : index
    %c0_45 = arith.constant 0 : index
    %96 = vector.load %arg6[%c0_43, %c0_44, %c0_45] : memref<4x128x128xbf16, #tpu.memory_space<vmem>>, vector<1x128x128xbf16>
    %97 = vector.shape_cast %96 : vector<1x128x128xbf16> to vector<128x128xbf16>
    %cst_46 = arith.constant dense<0.000000e+00> : vector<8x128xf32>
    %98 = tpu.matmul %95, %97, %cst_46 {dimension_numbers = #tpu.dot_dimension_numbers<[1], [0], [0], [1], [0, 0, 1, 1], [], []>} : vector<8x128xbf16>, vector<128x128xbf16>, vector<8x128xf32> -> vector<8x128xf32>
    %99 = vector.extract_strided_slice %93 {offsets = [8, 0], sizes = [8, 128], strides = [1, 1]} : vector<32x128xf32> to vector<8x128xf32>
    %100 = arith.truncf %99 : vector<8x128xf32> to vector<8x128xbf16>
    %c1_47 = arith.constant 1 : index
    %c0_48 = arith.constant 0 : index
    %c0_49 = arith.constant 0 : index
    %101 = vector.load %arg6[%c1_47, %c0_48, %c0_49] : memref<4x128x128xbf16, #tpu.memory_space<vmem>>, vector<1x128x128xbf16>
    %102 = vector.shape_cast %101 : vector<1x128x128xbf16> to vector<128x128xbf16>
    %cst_50 = arith.constant dense<0.000000e+00> : vector<8x128xf32>
    %103 = tpu.matmul %100, %102, %cst_50 {dimension_numbers = #tpu.dot_dimension_numbers<[1], [0], [0], [1], [0, 0, 1, 1], [], []>} : vector<8x128xbf16>, vector<128x128xbf16>, vector<8x128xf32> -> vector<8x128xf32>
    %104 = arith.addf %98, %103 : vector<8x128xf32>
    %105 = vector.extract_strided_slice %93 {offsets = [16, 0], sizes = [8, 128], strides = [1, 1]} : vector<32x128xf32> to vector<8x128xf32>
    %106 = arith.truncf %105 : vector<8x128xf32> to vector<8x128xbf16>
    %c2_51 = arith.constant 2 : index
    %c0_52 = arith.constant 0 : index
    %c0_53 = arith.constant 0 : index
    %107 = vector.load %arg6[%c2_51, %c0_52, %c0_53] : memref<4x128x128xbf16, #tpu.memory_space<vmem>>, vector<1x128x128xbf16>
    %108 = vector.shape_cast %107 : vector<1x128x128xbf16> to vector<128x128xbf16>
    %cst_54 = arith.constant dense<0.000000e+00> : vector<8x128xf32>
    %109 = tpu.matmul %106, %108, %cst_54 {dimension_numbers = #tpu.dot_dimension_numbers<[1], [0], [0], [1], [0, 0, 1, 1], [], []>} : vector<8x128xbf16>, vector<128x128xbf16>, vector<8x128xf32> -> vector<8x128xf32>
    %110 = arith.addf %104, %109 : vector<8x128xf32>
    %111 = vector.extract_strided_slice %93 {offsets = [24, 0], sizes = [8, 128], strides = [1, 1]} : vector<32x128xf32> to vector<8x128xf32>
    %112 = arith.truncf %111 : vector<8x128xf32> to vector<8x128xbf16>
    %c3_55 = arith.constant 3 : index
    %c0_56 = arith.constant 0 : index
    %c0_57 = arith.constant 0 : index
    %113 = vector.load %arg6[%c3_55, %c0_56, %c0_57] : memref<4x128x128xbf16, #tpu.memory_space<vmem>>, vector<1x128x128xbf16>
    %114 = vector.shape_cast %113 : vector<1x128x128xbf16> to vector<128x128xbf16>
    %cst_58 = arith.constant dense<0.000000e+00> : vector<8x128xf32>
    %115 = tpu.matmul %112, %114, %cst_58 {dimension_numbers = #tpu.dot_dimension_numbers<[1], [0], [0], [1], [0, 0, 1, 1], [], []>} : vector<8x128xbf16>, vector<128x128xbf16>, vector<8x128xf32> -> vector<8x128xf32>
    %116 = arith.addf %110, %115 : vector<8x128xf32>
    %c0_59 = arith.constant 0 : index
    %c0_60 = arith.constant 0 : index
    %117 = vector.load %arg7[%c0_59, %c0_60] : memref<1x128xf32, #tpu.memory_space<vmem>>, vector<1x128xf32>
    %118 = vector.broadcast %117 : vector<1x128xf32> to vector<8x128xf32>
    %119 = arith.addf %116, %118 : vector<8x128xf32>
    %cst_61 = arith.constant 0.000000e+00 : f32
    %120 = vector.broadcast %cst_61 : f32 to vector<8x128xf32>
    %121 = arith.maximumf %119, %120 : vector<8x128xf32>
    %c0_62 = arith.constant 0 : index
    %c0_63 = arith.constant 0 : index
    %122 = vector.load %arg10[%c0_62, %c0_63] : memref<8x128xf32, #tpu.memory_space<vmem>>, vector<8x128xf32>
    tpu.vector_store %arg10[%c0_62, %c0_63], %121 {strides = array<i32>} : memref<8x128xf32, #tpu.memory_space<vmem>>, vector<8x128xf32>,
    %123 = arith.truncf %121 : vector<8x128xf32> to vector<8x128xbf16>
    %c0_64 = arith.constant 0 : index
    %c0_65 = arith.constant 0 : index
    %124 = vector.load %arg8[%c0_64, %c0_65] : memref<128x128xbf16, #tpu.memory_space<vmem>>, vector<128x128xbf16>
    %cst_66 = arith.constant dense<0.000000e+00> : vector<8x128xf32>
    %125 = tpu.matmul %123, %124, %cst_66 {dimension_numbers = #tpu.dot_dimension_numbers<[1], [0], [0], [1], [0, 0, 1, 1], [], []>} : vector<8x128xbf16>, vector<128x128xbf16>, vector<8x128xf32> -> vector<8x128xf32>
    %c0_67 = arith.constant 0 : index
    %c0_68 = arith.constant 0 : index
    %126 = vector.load %arg9[%c0_67, %c0_68] : memref<1x128xf32, #tpu.memory_space<vmem>>, vector<1x128xf32>
    %127 = vector.broadcast %126 : vector<1x128xf32> to vector<8x128xf32>
    %128 = arith.addf %125, %127 : vector<8x128xf32>
    %129 = tpu.iota {dimensions = array<i32: 1>} : vector<8x128xi32>
    %c10_i32 = arith.constant 10 : i32
    %130 = vector.broadcast %c10_i32 : i32 to vector<8x128xi32>
    %131 = arith.cmpi slt, %129, %130 : vector<8x128xi32>
    %cst_69 = arith.constant -1.000000e+30 : f32
    %132 = vector.broadcast %cst_69 : f32 to vector<8x128xf32>
    %133 = arith.select %131, %128, %132 : vector<8x128xi1>, vector<8x128xf32>
    %cst_70 = arith.constant dense<0xFF800000> : vector<8xf32>
    %134 = vector.multi_reduction <maximumf>, %133, %cst_70 [1] : vector<8x128xf32> to vector<8xf32>
    %135 = vector.shape_cast %134 : vector<8xf32> to vector<8x1xf32>
    %136 = vector.broadcast %135 : vector<8x1xf32> to vector<8x128xf32>
    %137 = arith.subf %133, %136 : vector<8x128xf32>
    %138 = math.exp %137 : vector<8x128xf32>
    %cst_71 = arith.constant dense<0.000000e+00> : vector<8xf32>
    %139 = vector.multi_reduction <add>, %138, %cst_71 [1] : vector<8x128xf32> to vector<8xf32>
    %140 = vector.shape_cast %139 : vector<8xf32> to vector<8x1xf32>
    %141 = math.log %140 : vector<8x1xf32>
    %142 = vector.broadcast %141 : vector<8x1xf32> to vector<8x128xf32>
    %143 = arith.subf %137, %142 : vector<8x128xf32>
    %c0_72 = arith.constant 0 : index
    %c0_73 = arith.constant 0 : index
    %144 = vector.load %arg11[%c0_72, %c0_73] : memref<8x128xf32, #tpu.memory_space<vmem>>, vector<8x128xf32>
    tpu.vector_store %arg11[%c0_72, %c0_73], %143 {strides = array<i32>} : memref<8x128xf32, #tpu.memory_space<vmem>>, vector<8x128xf32>,
    return
  }
  func.func @transform_0(%arg0: i32) -> (i32, i32, i32) {
    %c0_i32 = arith.constant 0 : i32
    %c0_i32_0 = arith.constant 0 : i32
    %c0_i32_1 = arith.constant 0 : i32
    return %c0_i32, %arg0, %c0_i32_0 : i32, i32, i32
  }
  func.func @transform_1(%arg0: i32) -> (i32, i32, i32) {
    %c0_i32 = arith.constant 0 : i32
    %c0_i32_0 = arith.constant 0 : i32
    %c0_i32_1 = arith.constant 0 : i32
    %c0_i32_2 = arith.constant 0 : i32
    return %c0_i32, %c0_i32_0, %c0_i32_1 : i32, i32, i32
  }
  func.func @transform_2(%arg0: i32) -> (i32, i32) {
    %c0_i32 = arith.constant 0 : i32
    %c0_i32_0 = arith.constant 0 : i32
    %c0_i32_1 = arith.constant 0 : i32
    return %c0_i32, %c0_i32_0 : i32, i32
  }
  func.func @transform_3(%arg0: i32) -> (i32, i32, i32) {
    %c0_i32 = arith.constant 0 : i32
    %c0_i32_0 = arith.constant 0 : i32
    %c0_i32_1 = arith.constant 0 : i32
    %c0_i32_2 = arith.constant 0 : i32
    return %c0_i32, %c0_i32_0, %c0_i32_1 : i32, i32, i32
  }
  func.func @transform_4(%arg0: i32) -> (i32, i32) {
    %c0_i32 = arith.constant 0 : i32
    %c0_i32_0 = arith.constant 0 : i32
    %c0_i32_1 = arith.constant 0 : i32
    return %c0_i32, %c0_i32_0 : i32, i32
  }
  func.func @transform_5(%arg0: i32) -> (i32, i32, i32) {
    %c0_i32 = arith.constant 0 : i32
    %c0_i32_0 = arith.constant 0 : i32
    %c0_i32_1 = arith.constant 0 : i32
    %c0_i32_2 = arith.constant 0 : i32
    return %c0_i32, %c0_i32_0, %c0_i32_1 : i32, i32, i32
  }
  func.func @transform_6(%arg0: i32) -> (i32, i32) {
    %c0_i32 = arith.constant 0 : i32
    %c0_i32_0 = arith.constant 0 : i32
    %c0_i32_1 = arith.constant 0 : i32
    return %c0_i32, %c0_i32_0 : i32, i32
  }
  func.func @transform_7(%arg0: i32) -> (i32, i32) {
    %c0_i32 = arith.constant 0 : i32
    %c0_i32_0 = arith.constant 0 : i32
    %c0_i32_1 = arith.constant 0 : i32
    return %c0_i32, %c0_i32_0 : i32, i32
  }
  func.func @transform_8(%arg0: i32) -> (i32, i32) {
    %c0_i32 = arith.constant 0 : i32
    %c0_i32_0 = arith.constant 0 : i32
    %c0_i32_1 = arith.constant 0 : i32
    return %c0_i32, %c0_i32_0 : i32, i32
  }
  func.func @transform_9(%arg0: i32) -> (i32, i32) {
    %c0_i32 = arith.constant 0 : i32
    %c0_i32_0 = arith.constant 0 : i32
    return %arg0, %c0_i32 : i32, i32
  }
  func.func @transform_10(%arg0: i32) -> (i32, i32) {
    %c0_i32 = arith.constant 0 : i32
    %c0_i32_0 = arith.constant 0 : i32
    return %arg0, %c0_i32 : i32, i32
  }
}

</mosaic_0001>

<bundles_post_ra>
// kernel: net_forward.1
= control target key start
LH: loop header
LB: loop body
LE: loop exit
PB: predicated region body
PF: predicated region fallthrough
CT: control target
= control target key end

     0   :  { %s6022_s1 = inlined_call_operand.vmem [shape: bf16[5,128,256], index: 1, kind: input, shape index: {}]   ;;  %s6023_s0 = inlined_call_operand.vmem [shape: f32[28,8,128], index: 0, kind: input, shape index: {}]   ;;  %s6024_s3 = inlined_call_operand.vmem [shape: bf16[5,128,256], index: 3, kind: input, shape index: {}]   ;;  %s6025_s2 = inlined_call_operand.vmem [shape: f32[1,256], index: 2, kind: input, shape index: {}]   ;;  %s6026_s5 = inlined_call_operand.vmem [shape: bf16[4,128,128], index: 5, kind: input, shape index: {}]   ;;  %s6027_s4 = inlined_call_operand.vmem [shape: f32[1,256], index: 4, kind: input, shape index: {}]   ;;  %s6028_s6 = inlined_call_operand.vmem [shape: f32[1,128], index: 6, kind: input, shape index: {}]   ;;  %s6029_s8 = inlined_call_operand.vmem [shape: f32[1,128], index: 8, kind: input, shape index: {}]   ;;  %s6030_s7 = inlined_call_operand.vmem [shape: bf16[128,128], index: 7, kind: input, shape index: {}]   ;;  %s6031_s9 = inlined_call_operand.vmem [shape: f32[8,128], index: 9, kind: output, shape index: {0}]   ;;  %s6032_s10 = inlined_call_operand.vmem [shape: f32[8,128], index: 10, kind: output, shape index: {1}]  }
   0x1   :  { %v2883_v0 = vld [vmem:[%s6022_s1 + $0xf0] sm:$0xf]  ;;  %v3816_v1 = vld [vmem:[%s6022_s1 + $0xf4] sm:$0xf0]  ;;  %v3815_v2 = vld [vmem:[%s6022_s1 + $0xf4] sm:$0xf] }
   0x2   :  { %v2884_v3 = vor.u32 %v3816_v1, %v2883_v0  ;;  %v2885_v4 = vld [vmem:[%s6022_s1 + $0xf8] sm:$0xf0]  ;;  %v2947_v5 = vld [vmem:[%s6022_s1 + $0x70] sm:$0xf]  ;;  %v3800_v6 = vld [vmem:[%s6022_s1 + $0x74] sm:$0xf0] }
   0x3   :  { %v2888_v7 = vor.u32 %v3815_v2, %v2885_v4  ;;  %v2948_v8 = vor.u32 %v3800_v6, %v2947_v5  ;;  %v3799_v9 = vld [vmem:[%s6022_s1 + $0x74] sm:$0xf]  ;;  %v2949_v10 = vld [vmem:[%s6022_s1 + $0x78] sm:$0xf0]  ;;  %v2875_v11 = vld [vmem:[%s6022_s1 + $0xe0] sm:$0xf] }
   0x4   :  { %199 = vmatpush.bf16.msra.mxu0 %v2884_v3  ;;  %v2952_v12 = vor.u32 %v3799_v9, %v2949_v10  ;;  %v3814_v13 = vld [vmem:[%s6022_s1 + $0xe4] sm:$0xf0]  ;;  %v3813_v14 = vld [vmem:[%s6022_s1 + $0xe4] sm:$0xf]  ;;  %v2877_v15 = vld [vmem:[%s6022_s1 + $0xe8] sm:$0xf0] }
   0x5   :  { %268 = vmatpush.bf16.msra.mxu1 %v2888_v7  ;;  %417 = vmatpush.bf16.msra.mxu2 %v2948_v8  ;;  %v2876_v16 = vor.u32 %v3814_v13, %v2875_v11  ;;  %v2880_v17 = vor.u32 %v3813_v14, %v2877_v15  ;;  %v2939_v18 = vld [vmem:[%s6022_s1 + $0x60] sm:$0xf]  ;;  %v3798_v19 = vld [vmem:[%s6022_s1 + $0x64] sm:$0xf0]  ;;  %v3797_v20 = vld [vmem:[%s6022_s1 + $0x64] sm:$0xf] }
   0x6   :  { %486 = vmatpush.bf16.msra.mxu3 %v2952_v12  ;;  %v2940_v21 = vor.u32 %v3798_v19, %v2939_v18  ;;  %v2941_v22 = vld [vmem:[%s6022_s1 + $0x68] sm:$0xf0]  ;;  %v2867_v23 = vld [vmem:[%s6022_s1 + $0xd0] sm:$0xf]  ;;  %v3812_v24 = vld [vmem:[%s6022_s1 + $0xd4] sm:$0xf0] }
   0x7   :  { %v2944_v25 = vor.u32 %v3797_v20, %v2941_v22  ;;  %v3811_v26 = vld [vmem:[%s6022_s1 + $0xd4] sm:$0xf]  ;;  %v2869_v27 = vld [vmem:[%s6022_s1 + $0xd8] sm:$0xf0]  ;;  %v2931_v28 = vld [vmem:[%s6022_s1 + $0x50] sm:$0xf]  ;;  %v2868_v29 = vor.u32 %v3812_v24, %v2867_v23 }
   0x8   :  { %200 = vmatpush.bf16.msra.mxu0 %v2876_v16  ;;  %v3796_v30 = vld [vmem:[%s6022_s1 + $0x54] sm:$0xf0]  ;;  %v3795_v31 = vld [vmem:[%s6022_s1 + $0x54] sm:$0xf]  ;;  %v2933_v32 = vld [vmem:[%s6022_s1 + $0x58] sm:$0xf0]  ;;  %v2872_v33 = vor.u32 %v3811_v26, %v2869_v27 }
   0x9   :  { %269 = vmatpush.bf16.msra.mxu1 %v2880_v17  ;;  %418 = vmatpush.bf16.msra.mxu2 %v2940_v21  ;;  %v2932_v34 = vor.u32 %v3796_v30, %v2931_v28  ;;  %v2859_v35 = vld [vmem:[%s6022_s1 + $0xc0] sm:$0xf]  ;;  %v3810_v36 = vld [vmem:[%s6022_s1 + $0xc4] sm:$0xf0]  ;;  %v3809_v37 = vld [vmem:[%s6022_s1 + $0xc4] sm:$0xf]  ;;  %v2936_v38 = vor.u32 %v3795_v31, %v2933_v32 }
   0xa   :  { %487 = vmatpush.bf16.msra.mxu3 %v2944_v25  ;;  %v2861_v39 = vld [vmem:[%s6022_s1 + $0xc8] sm:$0xf0]  ;;  %v2923_v40 = vld [vmem:[%s6022_s1 + $0x40] sm:$0xf]  ;;  %v3794_v41 = vld [vmem:[%s6022_s1 + $0x44] sm:$0xf0]  ;;  %v2860_v44 = vor.u32 %v3810_v36, %v2859_v35 }
   0xb   :  { %v3793_v42 = vld [vmem:[%s6022_s1 + $0x44] sm:$0xf]  ;;  %v2925_v43 = vld [vmem:[%s6022_s1 + $0x48] sm:$0xf0]  ;;  %v2864_v45 = vor.u32 %v3809_v37, %v2861_v39  ;;  %v2924_v46 = vor.u32 %v3794_v41, %v2923_v40  ;;  %v2851_v47 = vld [vmem:[%s6022_s1 + $0xb0] sm:$0xf] }
   0xc   :  { %201 = vmatpush.bf16.msra.mxu0 %v2868_v29  ;;  %v3808_v48 = vld [vmem:[%s6022_s1 + $0xb4] sm:$0xf0]  ;;  %v3807_v49 = vld [vmem:[%s6022_s1 + $0xb4] sm:$0xf]  ;;  %v2928_v50 = vor.u32 %v3793_v42, %v2925_v43  ;;  %v2853_v51 = vld [vmem:[%s6022_s1 + $0xb8] sm:$0xf0] }
   0xd   :  { %270 = vmatpush.bf16.msra.mxu1 %v2872_v33  ;;  %419 = vmatpush.bf16.msra.mxu2 %v2932_v34  ;;  %v2915_v52 = vld [vmem:[%s6022_s1 + $0x30] sm:$0xf]  ;;  %v3792_v53 = vld [vmem:[%s6022_s1 + $0x34] sm:$0xf0]  ;;  %v3791_v54 = vld [vmem:[%s6022_s1 + $0x34] sm:$0xf]  ;;  %v2852_v56 = vor.u32 %v3808_v48, %v2851_v47  ;;  %v2856_v57 = vor.u32 %v3807_v49, %v2853_v51 }
   0xe   :  { %488 = vmatpush.bf16.msra.mxu3 %v2936_v38  ;;  %v2917_v55 = vld [vmem:[%s6022_s1 + $0x38] sm:$0xf0]  ;;  %v2916_v58 = vor.u32 %v3792_v53, %v2915_v52  ;;  %v2843_v59 = vld [vmem:[%s6022_s1 + $0xa0] sm:$0xf]  ;;  %v3806_v60 = vld [vmem:[%s6022_s1 + $0xa4] sm:$0xf0] }
   0xf   :  { %v3805_v61 = vld [vmem:[%s6022_s1 + $0xa4] sm:$0xf]  ;;  %v2920_v62 = vor.u32 %v3791_v54, %v2917_v55  ;;  %v2845_v63 = vld [vmem:[%s6022_s1 + $0xa8] sm:$0xf0]  ;;  %v2907_v0 = vld [vmem:[%s6022_s1 + $0x20] sm:$0xf]  ;;  %v2844_v4 = vor.u32 %v3806_v60, %v2843_v59 }
  0x10   :  { %202 = vmatpush.bf16.msra.mxu0 %v2860_v44  ;;  %v3790_v1 = vld [vmem:[%s6022_s1 + $0x24] sm:$0xf0]  ;;  %v3789_v2 = vld [vmem:[%s6022_s1 + $0x24] sm:$0xf]  ;;  %v2909_v3 = vld [vmem:[%s6022_s1 + $0x28] sm:$0xf0]  ;;  %v2848_v5 = vor.u32 %v3805_v61, %v2845_v63 }
  0x11   :  { %271 = vmatpush.bf16.msra.mxu1 %v2864_v45  ;;  %420 = vmatpush.bf16.msra.mxu2 %v2924_v46  ;;  %v2908_v6 = vor.u32 %v3790_v1, %v2907_v0  ;;  %v2835_v7 = vld [vmem:[%s6022_s1 + $0x90] sm:$0xf]  ;;  %v3804_v8 = vld [vmem:[%s6022_s1 + $0x94] sm:$0xf0]  ;;  %v3803_v9 = vld [vmem:[%s6022_s1 + $0x94] sm:$0xf]  ;;  %v2912_v10 = vor.u32 %v3789_v2, %v2909_v3 }
  0x12   :  { %489 = vmatpush.bf16.msra.mxu3 %v2928_v50  ;;  %v2837_v11 = vld [vmem:[%s6022_s1 + $0x98] sm:$0xf0]  ;;  %v2899_v12 = vld [vmem:[%s6022_s1 + $0x10] sm:$0xf]  ;;  %v3788_v13 = vld [vmem:[%s6022_s1 + $0x14] sm:$0xf0]  ;;  %v2836_v16 = vor.u32 %v3804_v8, %v2835_v7 }
  0x13   :  { %v3787_v14 = vld [vmem:[%s6022_s1 + $0x14] sm:$0xf]  ;;  %v2901_v15 = vld [vmem:[%s6022_s1 + $0x18] sm:$0xf0]  ;;  %v2827_v17 = vld [vmem:[%s6022_s1 + $0x80] sm:$0xf]  ;;  %v2840_v19 = vor.u32 %v3803_v9, %v2837_v11  ;;  %v2900_v20 = vor.u32 %v3788_v13, %v2899_v12 }
  0x14   :  { %203 = vmatpush.bf16.msra.mxu0 %v2852_v56  ;;  %v3802_v18 = vld [vmem:[%s6022_s1 + $0x84] sm:$0xf0]  ;;  %v3801_v21 = vld [vmem:[%s6022_s1 + $0x84] sm:$0xf]  ;;  %v2829_v22 = vld [vmem:[%s6022_s1 + $0x88] sm:$0xf0]  ;;  %v2904_v24 = vor.u32 %v3787_v14, %v2901_v15 }
  0x15   :  { %272 = vmatpush.bf16.msra.mxu1 %v2856_v57  ;;  %421 = vmatpush.bf16.msra.mxu2 %v2916_v58  ;;  %v2891_v23 = vld [vmem:[%s6022_s1] sm:$0xf]  ;;  %v3786_v25 = vld [vmem:[%s6022_s1 + $0x4] sm:$0xf0]  ;;  %v3785_v26 = vld [vmem:[%s6022_s1 + $0x4] sm:$0xf]  ;;  %v2828_v31 = vor.u32 %v3802_v18, %v2827_v17  ;;  %v2832_v35 = vor.u32 %v3801_v21, %v2829_v22 }
  0x16   :  { %490 = vmatpush.bf16.msra.mxu3 %v2920_v62  ;;  %v2893_v27 = vld [vmem:[%s6022_s1 + $0x8] sm:$0xf0]  ;;  %v3027_v29 = vld [vmem:[%s6022_s1 + $0x170] sm:$0xf]  ;;  %v3832_v30 = vld [vmem:[%s6022_s1 + $0x174] sm:$0xf0]  ;;  %v2892_v36 = vor.u32 %v3786_v25, %v2891_v23 }
  0x17   :  { %v35_v28 = vld [vmem:[%s6023_s0 + $0x8] sm:$0xff]  ;;  %v36_v32 = vld [vmem:[%s6023_s0 + $0x10] sm:$0xff]  ;;  %v3029_v34 = vld [vmem:[%s6022_s1 + $0x178] sm:$0xf0]  ;;  %v2896_v38 = vor.u32 %v3785_v26, %v2893_v27  ;;  %v3028_v39 = vor.u32 %v3832_v30, %v3027_v29 }
  0x18   :  { %204 = vmatpush.bf16.msra.mxu0 %v2844_v4  ;;  %v3831_v33 = vld [vmem:[%s6022_s1 + $0x174] sm:$0xf]  ;;  %v34_v37 = vld [vmem:[%s6023_s0] sm:$0xff]  ;;  %v90_v40 = vpack.c.bf16 %v36_v32, %v35_v28  ;;  %v3830_v43 = vld [vmem:[%s6022_s1 + $0x164] sm:$0xf0] }
  0x19   :  { %273 = vmatpush.bf16.msra.mxu1 %v2848_v5  ;;  %422 = vmatpush.bf16.msra.mxu2 %v2908_v6  ;;  %v3032_v41 = vor.u32 %v3831_v33, %v3029_v34  ;;  %v3019_v42 = vld [vmem:[%s6022_s1 + $0x160] sm:$0xf]  ;;  %v62_v44 = vpack.c.bf16 %v35_v28, %v34_v37  ;;  %v3829_v45 = vld [vmem:[%s6022_s1 + $0x164] sm:$0xf]  ;;  %v3021_v46 = vld [vmem:[%s6022_s1 + $0x168] sm:$0xf0] }
  0x1a   :  { %491 = vmatpush.bf16.msra.mxu3 %v2912_v10  ;;  %v3020_v47 = vor.u32 %v3830_v43, %v3019_v42  ;;  %v3024_v48 = vor.u32 %v3829_v45, %v3021_v46  ;;  %v37_v49 = vld [vmem:[%s6023_s0 + $0x18] sm:$0xff]  ;;  %v38_v50 = vld [vmem:[%s6023_s0 + $0x20] sm:$0xff]  ;;  %v3011_v53 = vld [vmem:[%s6022_s1 + $0x150] sm:$0xf] }
  0x1b   :  { %v4277_v51 = vpack.c.bf16 %v38_v50, %v37_v49  ;;  %v4279_v52 = vpack.c.bf16 %v37_v49, %v36_v32  ;;  %v3828_v54 = vld [vmem:[%s6022_s1 + $0x154] sm:$0xf0]  ;;  %v3827_v55 = vld [vmem:[%s6022_s1 + $0x154] sm:$0xf]  ;;  %v3013_v57 = vld [vmem:[%s6022_s1 + $0x158] sm:$0xf0] }
  0x1c   :  { %205 = vmatpush.bf16.msra.mxu0 %v2836_v16  ;;  %v3012_v56 = vor.u32 %v3828_v54, %v3011_v53  ;;  %v3016_v58 = vor.u32 %v3827_v55, %v3013_v57  ;;  %v39_v59 = vld [vmem:[%s6023_s0 + $0x28] sm:$0xff]  ;;  %v40_v60 = vld [vmem:[%s6023_s0 + $0x30] sm:$0xff]  ;;  %v3003_v63 = vld [vmem:[%s6022_s1 + $0x140] sm:$0xf] }
  0x1d   :  { %274 = vmatpush.bf16.msra.mxu1 %v2840_v19  ;;  %423 = vmatpush.bf16.msra.mxu2 %v2900_v20  ;;  %v4303_v61 = vpack.c.bf16 %v40_v60, %v39_v59  ;;  %v4305_v62 = vpack.c.bf16 %v39_v59, %v38_v50  ;;  %v3826_v0 = vld [vmem:[%s6022_s1 + $0x144] sm:$0xf0]  ;;  %v3825_v1 = vld [vmem:[%s6022_s1 + $0x144] sm:$0xf]  ;;  %v3005_v3 = vld [vmem:[%s6022_s1 + $0x148] sm:$0xf0] }
  0x1e   :  { %492 = vmatpush.bf16.msra.mxu3 %v2904_v24  ;;  %v3004_v2 = vor.u32 %v3826_v0, %v3003_v63  ;;  %v3008_v4 = vor.u32 %v3825_v1, %v3005_v3  ;;  %v41_v5 = vld [vmem:[%s6023_s0 + $0x38] sm:$0xff]  ;;  %v42_v6 = vld [vmem:[%s6023_s0 + $0x40] sm:$0xff]  ;;  %v43_v9 = vld [vmem:[%s6023_s0 + $0x48] sm:$0xff] }
  0x1f   :  { %v4329_v7 = vpack.c.bf16 %v42_v6, %v41_v5  ;;  %v4331_v8 = vpack.c.bf16 %v41_v5, %v40_v60  ;;  %v44_v10 = vld [vmem:[%s6023_s0 + $0x50] sm:$0xff]  ;;  %v4345_v12 = vpack.c.bf16 %v43_v9, %v42_v6  ;;  %v3824_v14 = vld [vmem:[%s6022_s1 + $0x134] sm:$0xf0]  ;;  %v2997_v17 = vld [vmem:[%s6022_s1 + $0x138] sm:$0xf0] }
  0x20   :  { %206 = vmatpush.bf16.msra.mxu0 %v2828_v31  ;;  %v4343_v11 = vpack.c.bf16 %v44_v10, %v43_v9  ;;  %v2995_v13 = vld [vmem:[%s6022_s1 + $0x130] sm:$0xf]  ;;  %v3823_v15 = vld [vmem:[%s6022_s1 + $0x134] sm:$0xf]  ;;  %v45_v19 = vld [vmem:[%s6023_s0 + $0x58] sm:$0xff] }
  0x21   :  { %275 = vmatpush.bf16.msra.mxu1 %v2832_v35  ;;  %424 = vmatpush.bf16.msra.mxu2 %v2892_v36  ;;  %v2996_v16 = vor.u32 %v3824_v14, %v2995_v13  ;;  %v3000_v18 = vor.u32 %v3823_v15, %v2997_v17  ;;  %v46_v20 = vld [vmem:[%s6023_s0 + $0x60] sm:$0xff]  ;;  %v4371_v22 = vpack.c.bf16 %v45_v19, %v44_v10  ;;  %v3822_v24 = vld [vmem:[%s6022_s1 + $0x124] sm:$0xf0]  ;;  %v2989_v27 = vld [vmem:[%s6022_s1 + $0x128] sm:$0xf0] }
  0x22   :  { %493 = vmatpush.bf16.msra.mxu3 %v2896_v38  ;;  %v4369_v21 = vpack.c.bf16 %v46_v20, %v45_v19  ;;  %v2987_v23 = vld [vmem:[%s6022_s1 + $0x120] sm:$0xf]  ;;  %v3821_v25 = vld [vmem:[%s6022_s1 + $0x124] sm:$0xf]  ;;  %v47_v29 = vld [vmem:[%s6023_s0 + $0x68] sm:$0xff] }
  0x23   :  { %207 = vmatmul.bf16.vlgmr.msra.gmra.mxu0 %v90_v40  ;;  %6039 = vst [vmem:[#allocation2_spill] sm:$0xff] %v4371_v22  ;;  %v2988_v26 = vor.u32 %v3822_v24, %v2987_v23  ;;  %v2992_v28 = vor.u32 %v3821_v25, %v2989_v27  ;;  %v48_v30 = vld [vmem:[%s6023_s0 + $0x70] sm:$0xff]  ;;  %v4397_v32 = vpack.c.bf16 %v47_v29, %v46_v20  ;;  %v49_v33 = vld [vmem:[%s6023_s0 + $0x78] sm:$0xff]  ;;  %v50_v34 = vld [vmem:[%s6023_s0 + $0x80] sm:$0xff] }
  0x24   :  { %653 = vmatpush.bf16.msrb.mxu0 %v3028_v39  ;;  %276 = vmatmul.bf16.vlgmr.msra.gmra.mxu1 %v90_v40  ;;  %v4395_v31 = vpack.c.bf16 %v48_v30, %v47_v29  ;;  %v4409_v35 = vpack.c.bf16 %v50_v34, %v49_v33  ;;  %v4411_v36 = vpack.c.bf16 %v49_v33, %v48_v30  ;;  %v2979_v37 = vld [vmem:[%s6022_s1 + $0x110] sm:$0xf]  ;;  %v3820_v38 = vld [vmem:[%s6022_s1 + $0x114] sm:$0xf0]  ;;  %v3819_v39 = vld [vmem:[%s6022_s1 + $0x114] sm:$0xf] }
  0x25   :  { %722 = vmatpush.bf16.msrb.mxu1 %v3032_v41  ;;  %425 = vmatmul.bf16.vlgmr.msra.gmra.mxu2 %v62_v44  ;;  %v2980_v40 = vor.u32 %v3820_v38, %v2979_v37  ;;  %v2981_v41 = vld [vmem:[%s6022_s1 + $0x118] sm:$0xf0]  ;;  %v51_v43 = vld [vmem:[%s6023_s0 + $0x88] sm:$0xff]  ;;  %v3107_v49 = vld [vmem:[%s6022_s1 + $0x1f0] sm:$0xf] }
  0x26   :  { %494 = vmatmul.bf16.vlgmr.msra.gmra.mxu3 %v62_v44  ;;  %6040 = vst [vmem:[#allocation3_spill] sm:$0xff] %v4411_v36  ;;  %v2984_v42 = vor.u32 %v3819_v39, %v2981_v41  ;;  %v52_v44 = vld [vmem:[%s6023_s0 + $0x90] sm:$0xff]  ;;  %v3848_v50 = vld [vmem:[%s6022_s1 + $0x1f4] sm:$0xf0]  ;;  %v3109_v55 = vld [vmem:[%s6022_s1 + $0x1f8] sm:$0xf0] }
  0x27   :  { %v4435_v45 = vpack.c.bf16 %v52_v44, %v51_v43  ;;  %v3847_v53 = vld [vmem:[%s6022_s1 + $0x1f4] sm:$0xf]  ;;  %v3108_v54 = vor.u32 %v3848_v50, %v3107_v49  ;;  %v3846_v59 = vld [vmem:[%s6022_s1 + $0x1e4] sm:$0xf0]  ;;  %v3845_v60 = vld [vmem:[%s6022_s1 + $0x1e4] sm:$0xf] }
  0x28   :  { %654 = vmatpush.bf16.msrb.mxu0 %v3020_v47  ;;  %v4437_v47 = vpack.c.bf16 %v51_v43, %v50_v34  ;;  %v3101_v3 = vld [vmem:[%s6022_s1 + $0x1e8] sm:$0xf0]  ;;  %v2971_v9 = vld [vmem:[%s6022_s1 + $0x100] sm:$0xf]  ;;  %v3818_v10 = vld [vmem:[%s6022_s1 + $0x104] sm:$0xf0] }
  0x29   :  { %723 = vmatpush.bf16.msrb.mxu1 %v3024_v48  ;;  %937 = vmatpush.bf16.msrb.mxu2 %v3108_v54  ;;  %v3104_v6 = vor.u32 %v3845_v60, %v3101_v3  ;;  %v3817_v13 = vld [vmem:[%s6022_s1 + $0x104] sm:$0xf]  ;;  %v2972_v14 = vor.u32 %v3818_v10, %v2971_v9  ;;  %v2973_v15 = vld [vmem:[%s6022_s1 + $0x108] sm:$0xf0]  ;;  %v3844_v17 = vld [vmem:[%s6022_s1 + $0x1d4] sm:$0xf0] }
  0x2a   :  { %6041 = vst [vmem:[#allocation4_spill] sm:$0xff] %v4437_v47  ;;  %v3843_v20 = vld [vmem:[%s6022_s1 + $0x1d4] sm:$0xf]  ;;  %v3093_v23 = vld [vmem:[%s6022_s1 + $0x1d8] sm:$0xf0]  ;;  %v4501_v25 = vld [vmem:[%s6023_s0 + $0xa0] sm:$0xff] }
  0x2b   :  { %v53_v24 = vld [vmem:[%s6023_s0 + $0x98] sm:$0xff]  ;;  %v3083_v29 = vld [vmem:[%s6022_s1 + $0x1c0] sm:$0xf]  ;;  %v3842_v30 = vld [vmem:[%s6022_s1 + $0x1c4] sm:$0xf0] }
  0x2c   :  { %655 = vmatpush.bf16.msrb.mxu0 %v3012_v56  ;;  %v3112_v56 = vor.u32 %v3847_v53, %v3109_v55  ;;  %v3841_v33 = vld [vmem:[%s6022_s1 + $0x1c4] sm:$0xf]  ;;  %v4517_v39 = vpack.c.bf16 %v53_v24, %v52_v44  ;;  %v3085_v41 = vld [vmem:[%s6022_s1 + $0x1c8] sm:$0xf0]  ;;  %v3840_v44 = vld [vmem:[%s6022_s1 + $0x1b4] sm:$0xf0] }
  0x2d   :  { %724 = vmatpush.bf16.msrb.mxu1 %v3016_v58  ;;  %v3099_v58 = vld [vmem:[%s6022_s1 + $0x1e0] sm:$0xf]  ;;  %v3839_v49 = vld [vmem:[%s6022_s1 + $0x1b4] sm:$0xf]  ;;  %v3077_v53 = vld [vmem:[%s6022_s1 + $0x1b8] sm:$0xf0] }
  0x2e   :  { %1006 = vmatpush.bf16.msrb.mxu3 %v3112_v56  ;;  %v3080_v54 = vor.u32 %v3839_v49, %v3077_v53  ;;  %v3067_v56 = vld [vmem:[%s6022_s1 + $0x1a0] sm:$0xf]  ;;  %v3059_v9 = vld [vmem:[%s6022_s1 + $0x190] sm:$0xf]  ;;  %v3836_v10 = vld [vmem:[%s6022_s1 + $0x194] sm:$0xf0] }
  0x2f   :  { %v3189_v49 = vld [vmem:[%s6022_s1 + $0x278] sm:$0xf0] }
  0x30   :  { %656 = vmatpush.bf16.msrb.mxu0 %v3004_v2  ;;  %v3100_v2 = vor.u32 %v3846_v59, %v3099_v58  ;;  %v3837_v58 = vld [vmem:[%s6022_s1 + $0x1a4] sm:$0xf] }
  0x31   :  { %725 = vmatpush.bf16.msrb.mxu1 %v3008_v4 }
  0x32   :  { %938 = vmatpush.bf16.msrb.mxu2 %v3100_v2  ;;  %1007 = vmatpush.bf16.msrb.mxu3 %v3104_v6  ;;  %v3069_v2 = vld [vmem:[%s6022_s1 + $0x1a8] sm:$0xf0] }
  0x33   :  { %212 = vmatmul.bf16.gmra.mxu0 %v4277_v51  ;;  %v3072_v6 = vor.u32 %v3837_v58, %v3069_v2 }
  0x34   :  { %281 = vmatmul.bf16.gmra.mxu1 %v4277_v51  ;;  %657 = vmatpush.bf16.msrb.mxu0 %v2996_v16  ;;  %v3091_v16 = vld [vmem:[%s6022_s1 + $0x1d0] sm:$0xf] }
  0x35   :  { %430 = vmatmul.bf16.gmra.mxu2 %v4279_v52  ;;  %726 = vmatpush.bf16.msrb.mxu1 %v3000_v18  ;;  %v2976_v18 = vor.u32 %v3817_v13, %v2973_v15  ;;  %v3092_v19 = vor.u32 %v3844_v17, %v3091_v16  ;;  %v3835_v13 = vld [vmem:[%s6022_s1 + $0x194] sm:$0xf]  ;;  %v3061_v15 = vld [vmem:[%s6022_s1 + $0x198] sm:$0xf0]  ;;  %v55_v17 = vld [vmem:[%s6023_s0 + $0xa8] sm:$0xff] }
  0x36   :  { %499 = vmatmul.bf16.gmra.mxu3 %v4279_v52  ;;  %v3064_v16 = vor.u32 %v3835_v13, %v3061_v15 }
  0x37   :  { %939 = vmatpush.bf16.msrb.mxu2 %v3092_v19 }
  0x38   :  { %658 = vmatpush.bf16.msrb.mxu0 %v2988_v26  ;;  %v3096_v26 = vor.u32 %v3843_v20, %v3093_v23  ;;  %v3051_v23 = vld [vmem:[%s6022_s1 + $0x180] sm:$0xf] }
  0x39   :  { %727 = vmatpush.bf16.msrb.mxu1 %v2992_v28  ;;  %v4504_v28 = vpack.c.bf16 %v4501_v25, %v53_v24  ;;  %v3834_v24 = vld [vmem:[%s6022_s1 + $0x184] sm:$0xf0] }
  0x3a   :  { %1008 = vmatpush.bf16.msrb.mxu3 %v3096_v26  ;;  %v3833_v26 = vld [vmem:[%s6022_s1 + $0x184] sm:$0xf] }
  0x3c   :  { %659 = vmatpush.bf16.msrb.mxu0 %v2980_v40  ;;  %v3084_v40 = vor.u32 %v3842_v30, %v3083_v29 }
  0x3d   :  { %728 = vmatpush.bf16.msrb.mxu1 %v2984_v42 }
  0x3e   :  { %940 = vmatpush.bf16.msrb.mxu2 %v3084_v40 }
  0x40   :  { %660 = vmatpush.bf16.msrb.mxu0 %v2972_v14  ;;  %v3060_v14 = vor.u32 %v3836_v10, %v3059_v9 }
  0x41   :  { %729 = vmatpush.bf16.msrb.mxu1 %v2976_v18  ;;  %v56_v18 = vld [vmem:[%s6023_s0 + $0xb0] sm:$0xff] }
  0x42   :  { %v4574_v20 = vpack.c.bf16 %v56_v18, %v55_v17 }
  0x43   :  { %217 = vmatmul.bf16.gmra.mxu0 %v4303_v61 }
  0x44   :  { %286 = vmatmul.bf16.gmra.mxu1 %v4303_v61 }
  0x45   :  { %435 = vmatmul.bf16.gmra.mxu2 %v4305_v62 }
  0x46   :  { %504 = vmatmul.bf16.gmra.mxu3 %v4305_v62 }
  0x53   :  { %222 = vmatmul.bf16.gmra.mxu0 %v4329_v7 }
  0x54   :  { %291 = vmatmul.bf16.gmra.mxu1 %v4329_v7 }
  0x55   :  { %440 = vmatmul.bf16.gmra.mxu2 %v4331_v8 }
  0x56   :  { %509 = vmatmul.bf16.gmra.mxu3 %v4331_v8 }
  0x63   :  { %227 = vmatmul.bf16.gmra.mxu0 %v4343_v11 }
  0x64   :  { %296 = vmatmul.bf16.gmra.mxu1 %v4343_v11 }
  0x65   :  { %445 = vmatmul.bf16.gmra.mxu2 %v4345_v12 }
  0x66   :  { %514 = vmatmul.bf16.gmra.mxu3 %v4345_v12 }
  0x73   :  { %232 = vmatmul.bf16.gmra.mxu0 %v4369_v21 }
  0x74   :  { %301 = vmatmul.bf16.gmra.mxu1 %v4369_v21 }
  0x75   :  { %450 = vmatmul.bf16.gmra.mxu2 %v4371_v22 }
  0x76   :  { %519 = vmatmul.bf16.gmra.mxu3 %v4371_v22 }
  0x83   :  { %237 = vmatmul.bf16.gmra.mxu0 %v4395_v31 }
  0x84   :  { %306 = vmatmul.bf16.gmra.mxu1 %v4395_v31 }
  0x85   :  { %455 = vmatmul.bf16.gmra.mxu2 %v4397_v32 }
  0x86   :  { %524 = vmatmul.bf16.gmra.mxu3 %v4397_v32 }
  0x93   :  { %242 = vmatmul.bf16.gmra.mxu0 %v4409_v35 }
  0x94   :  { %311 = vmatmul.bf16.gmra.mxu1 %v4409_v35 }
  0x95   :  { %460 = vmatmul.bf16.gmra.mxu2 %v4411_v36 }
  0x96   :  { %529 = vmatmul.bf16.gmra.mxu3 %v4411_v36 }
  0xa0   :  { %v208_v46 = vpop.f32.mrf.mxu0 }
  0xa1   :  { %v277_v48 = vpop.f32.mrf.mxu1 }
  0xa3   :  { %247 = vmatmul.bf16.gmra.mxu0 %v4435_v45 }
  0xa4   :  { %316 = vmatmul.bf16.gmra.mxu1 %v4435_v45 }
  0xa5   :  { %465 = vmatmul.bf16.gmra.mxu2 %v4437_v47 }
  0xa6   :  { %534 = vmatmul.bf16.gmra.mxu3 %v4437_v47 }
  0xa8   :  { %v426_v57 = vpop.f32.mrf.mxu2  ;;  %v210_v1 = vpop.f32.mrf.mxu0 }
  0xa9   :  { %v4464_v63 = vadd.f32 %v426_v57, %v208_v46  ;;  %v495_v0 = vpop.f32.mrf.mxu3  ;;  %v279_v5 = vpop.f32.mrf.mxu1  ;;  %v3088_v46 = vor.u32 %v3841_v33, %v3085_v41  ;;  %v3838_v57 = vld [vmem:[%s6022_s1 + $0x1a4] sm:$0xf0]  ;;  %v4588_v33 = vpack.c.bf16 %v55_v17, %v4501_v25  ;;  %v3187_v25 = vld [vmem:[%s6022_s1 + $0x270] sm:$0xf] }
  0xaa   :  { %v4469_v4 = vadd.f32 %v495_v0, %v277_v48  ;;  %v3075_v48 = vld [vmem:[%s6022_s1 + $0x1b0] sm:$0xf] }
  0xab   :  { %1009 = vmatpush.bf16.msrb.mxu3 %v3088_v46  ;;  %v3076_v50 = vor.u32 %v3840_v44, %v3075_v48  ;;  %v3864_v46 = vld [vmem:[%s6022_s1 + $0x274] sm:$0xf0]  ;;  %v3863_v48 = vld [vmem:[%s6022_s1 + $0x274] sm:$0xf] }
  0xac   :  { %v3188_v44 = vor.u32 %v3864_v46, %v3187_v25  ;;  %v3192_v53 = vor.u32 %v3863_v48, %v3189_v49 }
  0xad   :  { %941 = vmatpush.bf16.msrb.mxu2 %v3076_v50 }
  0xae   :  { %1221 = vmatpush.bf16.msra.mxu0 %v3188_v44  ;;  %1290 = vmatpush.bf16.msra.mxu1 %v3192_v53 }
  0xaf   :  { %1010 = vmatpush.bf16.msrb.mxu3 %v3080_v54 }
  0xb0   :  { %v428_v27 = vpop.f32.mrf.mxu2  ;;  %v213_v38 = vpop.f32.mrf.mxu0 }
  0xb1   :  { %v4515_v34 = vadd.f32 %v428_v27, %v210_v1  ;;  %v497_v37 = vpop.f32.mrf.mxu3  ;;  %v282_v43 = vpop.f32.mrf.mxu1  ;;  %v3068_v1 = vor.u32 %v3838_v57, %v3067_v56 }
  0xb2   :  { %v4522_v42 = vadd.f32 %v497_v37, %v279_v5  ;;  %v3052_v37 = vor.u32 %v3834_v24, %v3051_v23  ;;  %v3179_v24 = vld [vmem:[%s6022_s1 + $0x260] sm:$0xf] }
  0xb3   :  { %252 = vmatmul.bf16.gmra.mxu0 %v4504_v28  ;;  %942 = vmatpush.bf16.msrb.mxu2 %v3068_v1 }
  0xb4   :  { %321 = vmatmul.bf16.gmra.mxu1 %v4504_v28  ;;  %1011 = vmatpush.bf16.msrb.mxu3 %v3072_v6 }
  0xb5   :  { %470 = vmatmul.bf16.gmra.mxu2 %v4517_v39 }
  0xb6   :  { %539 = vmatmul.bf16.gmra.mxu3 %v4517_v39 }
  0xb7   :  { %943 = vmatpush.bf16.msrb.mxu2 %v3060_v14 }
  0xb8   :  { %v431_v55 = vpop.f32.mrf.mxu2  ;;  %v215_v0 = vpop.f32.mrf.mxu0  ;;  %1012 = vmatpush.bf16.msrb.mxu3 %v3064_v16 }
  0xb9   :  { %v4549_v59 = vadd.f32 %v431_v55, %v213_v38  ;;  %v500_v60 = vpop.f32.mrf.mxu3  ;;  %v284_v5 = vpop.f32.mrf.mxu1  ;;  %v3053_v38 = vld [vmem:[%s6022_s1 + $0x188] sm:$0xf0] }
  0xba   :  { %v4554_v3 = vadd.f32 %v500_v60, %v282_v43  ;;  %v3056_v43 = vor.u32 %v3833_v26, %v3053_v38  ;;  %v57_v60 = vld [vmem:[%s6023_s0 + $0xb8] sm:$0xff]  ;;  %v3862_v26 = vld [vmem:[%s6022_s1 + $0x264] sm:$0xf0] }
  0xbb   :  { %944 = vmatpush.bf16.msrb.mxu2 %v3052_v37  ;;  %v4628_v10 = vpack.c.bf16 %v57_v60, %v56_v18  ;;  %v3181_v37 = vld [vmem:[%s6022_s1 + $0x268] sm:$0xf0] }
  0xbc   :  { %1013 = vmatpush.bf16.msrb.mxu3 %v3056_v43 }
  0xc0   :  { %v433_v19 = vpop.f32.mrf.mxu2  ;;  %v218_v30 = vpop.f32.mrf.mxu0 }
  0xc1   :  { %v4585_v27 = vadd.f32 %v433_v19, %v215_v0  ;;  %v502_v29 = vpop.f32.mrf.mxu3  ;;  %v287_v41 = vpop.f32.mrf.mxu1  ;;  %v4621_v0 = vld [vmem:[%s6023_s0 + $0xc0] sm:$0xff] }
  0xc2   :  { %v4593_v40 = vadd.f32 %v502_v29, %v284_v5  ;;  %v4624_v2 = vpack.c.bf16 %v4621_v0, %v57_v60  ;;  %v3861_v29 = vld [vmem:[%s6022_s1 + $0x264] sm:$0xf] }
  0xc3   :  { %257 = vmatmul.bf16.gmra.mxu0 %v4574_v20  ;;  %v3184_v38 = vor.u32 %v3861_v29, %v3181_v37 }
  0xc4   :  { %326 = vmatmul.bf16.gmra.mxu1 %v4574_v20 }
  0xc5   :  { %475 = vmatmul.bf16.gmra.mxu2 %v4588_v33  ;;  %1291 = vmatpush.bf16.msra.mxu1 %v3184_v38 }
  0xc6   :  { %544 = vmatmul.bf16.gmra.mxu3 %v4588_v33 }
  0xc8   :  { %v436_v50 = vpop.f32.mrf.mxu2  ;;  %v220_v56 = vpop.f32.mrf.mxu0 }
  0xc9   :  { %v4611_v54 = vadd.f32 %v436_v50, %v218_v30  ;;  %v505_v55 = vpop.f32.mrf.mxu3  ;;  %v289_v58 = vpop.f32.mrf.mxu1  ;;  %v3180_v30 = vor.u32 %v3862_v26, %v3179_v24 }
  0xca   :  { %v4613_v57 = vadd.f32 %v505_v55, %v287_v41 }
  0xcb   :  { %1222 = vmatpush.bf16.msra.mxu0 %v3180_v30 }
  0xd0   :  { %v438_v1 = vpop.f32.mrf.mxu2  ;;  %v223_v9 = vpop.f32.mrf.mxu0 }
  0xd1   :  { %v4626_v5 = vadd.f32 %v438_v1, %v220_v56  ;;  %v507_v6 = vpop.f32.mrf.mxu3  ;;  %v292_v14 = vpop.f32.mrf.mxu1 }
  0xd2   :  { %v4630_v13 = vadd.f32 %v507_v6, %v289_v58 }
  0xd3   :  { %262 = vmatmul.bf16.gmra.mxu0 %v4624_v2 }
  0xd4   :  { %331 = vmatmul.bf16.gmra.mxu1 %v4624_v2 }
  0xd5   :  { %480 = vmatmul.bf16.gmra.mxu2 %v4628_v10 }
  0xd6   :  { %549 = vmatmul.bf16.gmra.mxu3 %v4628_v10 }
  0xd8   :  { %v441_v15 = vpop.f32.mrf.mxu2  ;;  %v225_v19 = vpop.f32.mrf.mxu0 }
  0xd9   :  { %v4636_v16 = vadd.f32 %v441_v15, %v223_v9  ;;  %v510_v17 = vpop.f32.mrf.mxu3  ;;  %v294_v18 = vpop.f32.mrf.mxu1  ;;  %v3860_v15 = vld [vmem:[%s6022_s1 + $0x254] sm:$0xf0] }
  0xda   :  { %v4638_v23 = vadd.f32 %v510_v17, %v292_v14  ;;  %v3859_v17 = vld [vmem:[%s6022_s1 + $0x254] sm:$0xf] }
  0xe0   :  { %v443_v41 = vpop.f32.mrf.mxu2  ;;  %v228_v46 = vpop.f32.mrf.mxu0 }
  0xe1   :  { %v4652_v43 = vadd.f32 %v443_v41, %v225_v19  ;;  %v512_v25 = vpop.f32.mrf.mxu3  ;;  %v297_v44 = vpop.f32.mrf.mxu1 }
  0xe2   :  { %v4654_v48 = vadd.f32 %v512_v25, %v294_v18  ;;  %v3173_v18 = vld [vmem:[%s6022_s1 + $0x258] sm:$0xf0] }
  0xe3   :  { %661 = vmatmul.bf16.vlgmr.msrb.gmra.mxu0 %v4279_v52  ;;  %v3176_v26 = vor.u32 %v3859_v17, %v3173_v18 }
  0xe4   :  { %730 = vmatmul.bf16.vlgmr.msrb.gmra.mxu1 %v4279_v52 }
  0xe5   :  { %945 = vmatmul.bf16.vlgmr.msrb.gmra.mxu2 %v4277_v51  ;;  %1292 = vmatpush.bf16.msra.mxu1 %v3176_v26 }
  0xe6   :  { %1014 = vmatmul.bf16.vlgmr.msrb.gmra.mxu3 %v4277_v51  ;;  %v3171_v51 = vld [vmem:[%s6022_s1 + $0x250] sm:$0xf] }
  0xe7   :  { %v3172_v19 = vor.u32 %v3860_v15, %v3171_v51  ;;  %v3163_v51 = vld [vmem:[%s6022_s1 + $0x240] sm:$0xf]  ;;  %v3858_v15 = vld [vmem:[%s6022_s1 + $0x244] sm:$0xf0] }
  0xe8   :  { %v446_v49 = vpop.f32.mrf.mxu2  ;;  %v230_v55 = vpop.f32.mrf.mxu0  ;;  %v3164_v17 = vor.u32 %v3858_v15, %v3163_v51 }
  0xe9   :  { %v4660_v50 = vadd.f32 %v446_v49, %v228_v46  ;;  %v515_v53 = vpop.f32.mrf.mxu3  ;;  %v299_v58 = vpop.f32.mrf.mxu1  ;;  %1223 = vmatpush.bf16.msra.mxu0 %v3172_v19  ;;  %v3165_v19 = vld [vmem:[%s6022_s1 + $0x248] sm:$0xf0] }
  0xea   :  { %v4662_v56 = vadd.f32 %v515_v53, %v297_v44 }
  0xed   :  { %1224 = vmatpush.bf16.msra.mxu0 %v3164_v17 }
  0xf0   :  { %v448_v60 = vpop.f32.mrf.mxu2  ;;  %v233_v9 = vpop.f32.mrf.mxu0 }
  0xf1   :  { %v4664_v1 = vadd.f32 %v448_v60, %v230_v55  ;;  %v517_v6 = vpop.f32.mrf.mxu3  ;;  %v302_v52 = vpop.f32.mrf.mxu1 }
  0xf2   :  { %v4666_v14 = vadd.f32 %v517_v6, %v299_v58 }
  0xf3   :  { %666 = vmatmul.bf16.gmra.mxu0 %v4305_v62 }
  0xf4   :  { %735 = vmatmul.bf16.gmra.mxu1 %v4305_v62 }
  0xf5   :  { %950 = vmatmul.bf16.gmra.mxu2 %v4303_v61 }
  0xf6   :  { %1019 = vmatmul.bf16.gmra.mxu3 %v4303_v61 }
  0xf8   :  { %v451_v24 = vpop.f32.mrf.mxu2  ;;  %v235_v30 = vpop.f32.mrf.mxu0 }
  0xf9   :  { %v4684_v61 = vadd.f32 %v451_v24, %v233_v9  ;;  %v520_v29 = vpop.f32.mrf.mxu3  ;;  %v304_v38 = vpop.f32.mrf.mxu1 }
  0xfa   :  { %v4686_v37 = vadd.f32 %v520_v29, %v302_v52 }
 0x100   :  { %v453_v41 = vpop.f32.mrf.mxu2  ;;  %v238_v44 = vpop.f32.mrf.mxu0 }
 0x101   :  { %v4688_v25 = vadd.f32 %v453_v41, %v235_v30  ;;  %v522_v46 = vpop.f32.mrf.mxu3  ;;  %v307_v53 = vpop.f32.mrf.mxu1 }
 0x102   :  { %v4690_v49 = vadd.f32 %v522_v46, %v304_v38 }
 0x103   :  { %671 = vmatmul.bf16.gmra.mxu0 %v4331_v8 }
 0x104   :  { %740 = vmatmul.bf16.gmra.mxu1 %v4331_v8 }
 0x105   :  { %955 = vmatmul.bf16.gmra.mxu2 %v4329_v7 }
 0x106   :  { %1024 = vmatmul.bf16.gmra.mxu3 %v4329_v7  ;;  %v3857_v7 = vld [vmem:[%s6022_s1 + $0x244] sm:$0xf] }
 0x107   :  { %v3168_v18 = vor.u32 %v3857_v7, %v3165_v19 }
 0x108   :  { %v456_v55 = vpop.f32.mrf.mxu2  ;;  %v240_v6 = vpop.f32.mrf.mxu0 }
 0x109   :  { %v4696_v58 = vadd.f32 %v456_v55, %v238_v44  ;;  %v525_v60 = vpop.f32.mrf.mxu3  ;;  %v309_v52 = vpop.f32.mrf.mxu1  ;;  %1293 = vmatpush.bf16.msra.mxu1 %v3168_v18  ;;  %v3856_v18 = vld [vmem:[%s6022_s1 + $0x234] sm:$0xf0] }
 0x10a   :  { %v4698_v9 = vadd.f32 %v525_v60, %v307_v53 }
 0x110   :  { %v458_v24 = vpop.f32.mrf.mxu2  ;;  %v243_v30 = vpop.f32.mrf.mxu0 }
 0x111   :  { %v4712_v26 = vadd.f32 %v458_v24, %v240_v6  ;;  %v527_v29 = vpop.f32.mrf.mxu3  ;;  %v312_v41 = vpop.f32.mrf.mxu1  ;;  %v3855_v24 = vld [vmem:[%s6022_s1 + $0x234] sm:$0xf] }
 0x112   :  { %v4714_v38 = vadd.f32 %v527_v29, %v309_v52 }
 0x113   :  { %676 = vmatmul.bf16.gmra.mxu0 %v4345_v12 }
 0x114   :  { %745 = vmatmul.bf16.gmra.mxu1 %v4345_v12 }
 0x115   :  { %960 = vmatmul.bf16.gmra.mxu2 %v4343_v11 }
 0x116   :  { %1029 = vmatmul.bf16.gmra.mxu3 %v4343_v11  ;;  %v3155_v11 = vld [vmem:[%s6022_s1 + $0x230] sm:$0xf] }
 0x117   :  { %v3156_v29 = vor.u32 %v3856_v18, %v3155_v11 }
 0x118   :  { %v461_v46 = vpop.f32.mrf.mxu2  ;;  %v245_v55 = vpop.f32.mrf.mxu0 }
 0x119   :  { %v4720_v44 = vadd.f32 %v461_v46, %v243_v30  ;;  %v530_v53 = vpop.f32.mrf.mxu3  ;;  %v314_v6 = vpop.f32.mrf.mxu1  ;;  %v3157_v30 = vld [vmem:[%s6022_s1 + $0x238] sm:$0xf0]  ;;  %1225 = vmatpush.bf16.msra.mxu0 %v3156_v29 }
 0x11a   :  { %v4722_v60 = vadd.f32 %v530_v53, %v312_v41  ;;  %v3160_v46 = vor.u32 %v3855_v24, %v3157_v30 }
 0x11c   :  { %1294 = vmatpush.bf16.msra.mxu1 %v3160_v46  ;;  %v3854_v46 = vld [vmem:[%s6022_s1 + $0x224] sm:$0xf0] }
 0x120   :  { %v463_v51 = vpop.f32.mrf.mxu2  ;;  %v248_v7 = vpop.f32.mrf.mxu0 }
 0x121   :  { %v4724_v52 = vadd.f32 %v463_v51, %v245_v55  ;;  %v532_v15 = vpop.f32.mrf.mxu3  ;;  %v317_v19 = vpop.f32.mrf.mxu1 }
 0x122   :  { %v4726_v17 = vadd.f32 %v532_v15, %v314_v6 }
 0x123   :  { %6042 = vst [vmem:[#allocation5_spill] sm:$0xff] %v4724_v52  ;;  %681 = vmatmul.bf16.gmra.mxu0 %v4371_v22 }
 0x124   :  { %6043 = vst [vmem:[#allocation6_spill] sm:$0xff] %v4726_v17  ;;  %750 = vmatmul.bf16.gmra.mxu1 %v4371_v22 }
 0x125   :  { %965 = vmatmul.bf16.gmra.mxu2 %v4369_v21 }
 0x126   :  { %1034 = vmatmul.bf16.gmra.mxu3 %v4369_v21 }
 0x128   :  { %v466_v41 = vpop.f32.mrf.mxu2  ;;  %v250_v55 = vpop.f32.mrf.mxu0 }
 0x129   :  { %v4744_v21 = vadd.f32 %v466_v41, %v248_v7  ;;  %v535_v53 = vpop.f32.mrf.mxu3  ;;  %v319_v51 = vpop.f32.mrf.mxu1 }
 0x12a   :  { %v4746_v6 = vadd.f32 %v535_v53, %v317_v19 }
 0x130   :  { %v468_v15 = vpop.f32.mrf.mxu2  ;;  %v253_v11 = vpop.f32.mrf.mxu0 }
 0x131   :  { %v4748_v17 = vadd.f32 %v468_v15, %v250_v55  ;;  %v537_v52 = vpop.f32.mrf.mxu3  ;;  %v322_v22 = vpop.f32.mrf.mxu1  ;;  %v3149_v55 = vld [vmem:[%s6022_s1 + $0x228] sm:$0xf0] }
 0x132   :  { %v4750_v18 = vadd.f32 %v537_v52, %v319_v51  ;;  %v3147_v52 = vld [vmem:[%s6022_s1 + $0x220] sm:$0xf] }
 0x133   :  { %686 = vmatmul.bf16.gmra.mxu0 %v4397_v32  ;;  %v3148_v53 = vor.u32 %v3854_v46, %v3147_v52 }
 0x134   :  { %755 = vmatmul.bf16.gmra.mxu1 %v4397_v32 }
 0x135   :  { %970 = vmatmul.bf16.gmra.mxu2 %v4395_v31  ;;  %1226 = vmatpush.bf16.msra.mxu0 %v3148_v53 }
 0x136   :  { %1039 = vmatmul.bf16.gmra.mxu3 %v4395_v31  ;;  %v3853_v31 = vld [vmem:[%s6022_s1 + $0x224] sm:$0xf] }
 0x138   :  { %v471_v7 = vpop.f32.mrf.mxu2  ;;  %v255_v29 = vpop.f32.mrf.mxu0 }
 0x139   :  { %v4756_v19 = vadd.f32 %v471_v7, %v253_v11  ;;  %v540_v24 = vpop.f32.mrf.mxu3  ;;  %v324_v41 = vpop.f32.mrf.mxu1 }
 0x13a   :  { %v4758_v30 = vadd.f32 %v540_v24, %v322_v22  ;;  %v3152_v22 = vor.u32 %v3853_v31, %v3149_v55 }
 0x13b   :  { %6044 = vst [vmem:[#allocation7_spill] sm:$0xff] %v4756_v19 }
 0x13c   :  { %6045 = vst [vmem:[#allocation8_spill] sm:$0xff] %v4758_v30  ;;  %1295 = vmatpush.bf16.msra.mxu1 %v3152_v22 }
 0x140   :  { %v473_v51 = vpop.f32.mrf.mxu2  ;;  %v258_v7 = vpop.f32.mrf.mxu0 }
 0x141   :  { %v4772_v15 = vadd.f32 %v473_v51, %v255_v29  ;;  %v542_v11 = vpop.f32.mrf.mxu3  ;;  %v327_v30 = vpop.f32.mrf.mxu1 }
 0x142   :  { %v4774_v24 = vadd.f32 %v542_v11, %v324_v41 }
 0x143   :  { %6046 = vst [vmem:[#allocation9_spill] sm:$0xff] %v4772_v15  ;;  %691 = vmatmul.bf16.gmra.mxu0 %v4411_v36 }
 0x144   :  { %6047 = vst [vmem:[#allocation10_spill] sm:$0xff] %v4774_v24  ;;  %760 = vmatmul.bf16.gmra.mxu1 %v4411_v36 }
 0x145   :  { %975 = vmatmul.bf16.gmra.mxu2 %v4409_v35 }
 0x146   :  { %1044 = vmatmul.bf16.gmra.mxu3 %v4409_v35  ;;  %v3139_v35 = vld [vmem:[%s6022_s1 + $0x210] sm:$0xf] }
 0x148   :  { %v476_v52 = vpop.f32.mrf.mxu2  ;;  %v260_v53 = vpop.f32.mrf.mxu0 }
 0x149   :  { %v4780_v46 = vadd.f32 %v476_v52, %v258_v7  ;;  %v545_v31 = vpop.f32.mrf.mxu3  ;;  %v329_v55 = vpop.f32.mrf.mxu1  ;;  %v3851_v7 = vld [vmem:[%s6022_s1 + $0x214] sm:$0xf] }
 0x14a   :  { %v4782_v29 = vadd.f32 %v545_v31, %v327_v30  ;;  %v3852_v30 = vld [vmem:[%s6022_s1 + $0x214] sm:$0xf0]  ;;  %v3141_v31 = vld [vmem:[%s6022_s1 + $0x218] sm:$0xf0] }
 0x14b   :  { %6048 = vst [vmem:[#allocation11_spill] sm:$0xff] %v4780_v46  ;;  %v3140_v52 = vor.u32 %v3852_v30, %v3139_v35 }
 0x14c   :  { %6049 = vst [vmem:[#allocation12_spill] sm:$0xff] %v4782_v29 }
 0x14d   :  { %1227 = vmatpush.bf16.msra.mxu0 %v3140_v52 }
 0x150   :  { %v478_v22 = vpop.f32.mrf.mxu2  ;;  %v263_v11 = vpop.f32.mrf.mxu0 }
 0x151   :  { %v4784_v41 = vadd.f32 %v478_v22, %v260_v53  ;;  %v547_v51 = vpop.f32.mrf.mxu3  ;;  %v332_v15 = vpop.f32.mrf.mxu1 }
 0x152   :  { %v4786_v24 = vadd.f32 %v547_v51, %v329_v55  ;;  %v3144_v55 = vor.u32 %v3851_v7, %v3141_v31 }
 0x153   :  { %6050 = vst [vmem:[#allocation13_spill] sm:$0xff] %v4784_v41  ;;  %696 = vmatmul.bf16.gmra.mxu0 %v4437_v47 }
 0x154   :  { %6051 = vst [vmem:[#allocation14_spill] sm:$0xff] %v4786_v24  ;;  %765 = vmatmul.bf16.gmra.mxu1 %v4437_v47 }
 0x155   :  { %980 = vmatmul.bf16.gmra.mxu2 %v4435_v45  ;;  %1296 = vmatpush.bf16.msra.mxu1 %v3144_v55 }
 0x156   :  { %1049 = vmatmul.bf16.gmra.mxu3 %v4435_v45 }
 0x158   :  { %v481_v53 = vpop.f32.mrf.mxu2  ;;  %v265_v51 = vpop.f32.mrf.mxu0 }
 0x159   :  { %v4804_v45 = vadd.f32 %v481_v53, %v263_v11  ;;  %v550_v22 = vpop.f32.mrf.mxu3  ;;  %v334_v41 = vpop.f32.mrf.mxu1 }
 0x15a   :  { %v4806_v24 = vadd.f32 %v550_v22, %v332_v15 }
 0x160   :  { %v483_v47 = vpop.f32.mrf.mxu2  ;;  %v662_v35 = vpop.f32.mrf.mxu0 }
 0x161   :  { %v4808_v29 = vadd.f32 %v483_v47, %v265_v51  ;;  %v552_v46 = vpop.f32.mrf.mxu3  ;;  %v791_v36 = vadd.f32 %v662_v35, %v4464_v63  ;;  %v731_v19 = vpop.f32.mrf.mxu1 }
 0x162   :  { %v4810_v30 = vadd.f32 %v552_v46, %v334_v41  ;;  %v792_v11 = vadd.f32 %v731_v19, %v4469_v4  ;;  %v3131_v19 = vld [vmem:[%s6022_s1 + $0x200] sm:$0xf] }
 0x163   :  { %701 = vmatmul.bf16.gmra.mxu0 %v4517_v39 }
 0x164   :  { %770 = vmatmul.bf16.gmra.mxu1 %v4517_v39 }
 0x165   :  { %985 = vmatmul.bf16.gmra.mxu2 %v4504_v28 }
 0x166   :  { %1054 = vmatmul.bf16.gmra.mxu3 %v4504_v28  ;;  %v3849_v28 = vld [vmem:[%s6022_s1 + $0x204] sm:$0xf] }
 0x168   :  { %v946_v15 = vpop.f32.mrf.mxu2  ;;  %v664_v52 = vpop.f32.mrf.mxu0 }
 0x169   :  { %v4818_v47 = vadd.f32 %v946_v15, %v791_v36  ;;  %v1015_v7 = vpop.f32.mrf.mxu3  ;;  %v4823_v63 = vadd.f32 %v664_v52, %v4515_v34  ;;  %v733_v41 = vpop.f32.mrf.mxu1  ;;  %v3850_v36 = vld [vmem:[%s6022_s1 + $0x204] sm:$0xf0]  ;;  %v3133_v34 = vld [vmem:[%s6022_s1 + $0x208] sm:$0xf0] }
 0x16a   :  { %v4820_v46 = vadd.f32 %v1015_v7, %v792_v11  ;;  %v4826_v4 = vadd.f32 %v733_v41, %v4522_v42  ;;  %v3132_v31 = vor.u32 %v3850_v36, %v3131_v19  ;;  %v3136_v53 = vor.u32 %v3849_v28, %v3133_v34 }
 0x16c   :  { %1228 = vmatpush.bf16.msra.mxu0 %v3132_v31  ;;  %1297 = vmatpush.bf16.msra.mxu1 %v3136_v53 }
 0x170   :  { %v4840_v42 = vpop.f32.mrf.mxu2  ;;  %v667_v22 = vpop.f32.mrf.mxu0 }
 0x171   :  { %v4842_v55 = vpop.f32.mrf.mxu3  ;;  %v4845_v51 = vadd.f32 %v667_v22, %v4549_v59  ;;  %v736_v35 = vpop.f32.mrf.mxu1 }
 0x172   :  { %v4848_v11 = vadd.f32 %v736_v35, %v4554_v3  ;;  %v59_v35 = vld [vmem:[%s6023_s0 + $0xc8] sm:$0xff] }
 0x173   :  { %706 = vmatmul.bf16.gmra.mxu0 %v4588_v33 }
 0x174   :  { %775 = vmatmul.bf16.gmra.mxu1 %v4588_v33 }
 0x175   :  { %990 = vmatmul.bf16.gmra.mxu2 %v4574_v20 }
 0x176   :  { %1059 = vmatmul.bf16.gmra.mxu3 %v4574_v20 }
 0x178   :  { %v4854_v15 = vpop.f32.mrf.mxu2  ;;  %v669_v52 = vpop.f32.mrf.mxu0 }
 0x179   :  { %v4856_v7 = vpop.f32.mrf.mxu3  ;;  %v4859_v59 = vadd.f32 %v669_v52, %v4585_v27  ;;  %v738_v41 = vpop.f32.mrf.mxu1 }
 0x17a   :  { %v4862_v3 = vadd.f32 %v738_v41, %v4593_v40  ;;  %v4899_v41 = vpack.c.bf16 %v59_v35, %v4621_v0 }
 0x180   :  { %v4864_v19 = vpop.f32.mrf.mxu2  ;;  %v672_v28 = vpop.f32.mrf.mxu0 }
 0x181   :  { %v4866_v36 = vpop.f32.mrf.mxu3  ;;  %v4869_v31 = vadd.f32 %v672_v28, %v4611_v54  ;;  %v741_v20 = vpop.f32.mrf.mxu1 }
 0x182   :  { %v4872_v34 = vadd.f32 %v741_v20, %v4613_v57 }
 0x183   :  { %711 = vmatmul.bf16.gmra.mxu0 %v4628_v10 }
 0x184   :  { %780 = vmatmul.bf16.gmra.mxu1 %v4628_v10 }
 0x185   :  { %995 = vmatmul.bf16.gmra.mxu2 %v4624_v2 }
 0x186   :  { %1064 = vmatmul.bf16.gmra.mxu3 %v4624_v2  ;;  %v4894_v2 = vld [vmem:[%s6023_s0 + $0xd0] sm:$0xff] }
 0x188   :  { %v4878_v27 = vpop.f32.mrf.mxu2  ;;  %v674_v53 = vpop.f32.mrf.mxu0 }
 0x189   :  { %v4880_v40 = vpop.f32.mrf.mxu3  ;;  %v4883_v54 = vadd.f32 %v674_v53, %v4626_v5  ;;  %v743_v22 = vpop.f32.mrf.mxu1 }
 0x18a   :  { %v4886_v57 = vadd.f32 %v743_v22, %v4630_v13  ;;  %v839_v13 = vpack.c.bf16 %v4894_v2, %v59_v35 }
 0x18c   :  { %6052 = vst [vmem:[#allocation15_spill] sm:$0xff] %v4886_v57 }
 0x190   :  { %v4896_v52 = vpop.f32.mrf.mxu2  ;;  %v677_v28 = vpop.f32.mrf.mxu0 }
 0x191   :  { %v4901_v5 = vpop.f32.mrf.mxu3  ;;  %v4905_v20 = vadd.f32 %v677_v28, %v4636_v16  ;;  %v746_v53 = vpop.f32.mrf.mxu1 }
 0x192   :  { %6053 = vst [vmem:[#allocation16_spill] sm:$0xff] %v4901_v5  ;;  %v4908_v22 = vadd.f32 %v746_v53, %v4638_v23 }
 0x193   :  { %6054 = vst [vmem:[#allocation17_spill] sm:$0xff] %v4905_v20  ;;  %716 = vmatmul.bf16.gmra.mxu0 %v4899_v41 }
 0x194   :  { %6055 = vst [vmem:[#allocation18_spill] sm:$0xff] %v4908_v22  ;;  %785 = vmatmul.bf16.gmra.mxu1 %v4899_v41 }
 0x195   :  { %1000 = vmatmul.bf16.gmra.mxu2 %v839_v13 }
 0x196   :  { %1069 = vmatmul.bf16.gmra.mxu3 %v839_v13 }
 0x198   :  { %v4912_v0 = vpop.f32.mrf.mxu2  ;;  %v679_v5 = vpop.f32.mrf.mxu0 }
 0x199   :  { %6056 = vst [vmem:[#allocation19_spill] sm:$0xff] %v4912_v0  ;;  %v4914_v57 = vpop.f32.mrf.mxu3  ;;  %v4917_v35 = vadd.f32 %v679_v5, %v4652_v43  ;;  %v748_v16 = vpop.f32.mrf.mxu1  ;;  %v3267_v43 = vld [vmem:[%s6024_s3 + $0xf0] sm:$0xf] }
 0x19a   :  { %v4920_v28 = vadd.f32 %v748_v16, %v4654_v48  ;;  %v3896_v48 = vld [vmem:[%s6024_s3 + $0xf4] sm:$0xf0] }
 0x19b   :  { %v3268_v5 = vor.u32 %v3896_v48, %v3267_v43 }
 0x19c   :  { %6057 = vst [vmem:[#allocation20_spill] sm:$0xff] %v4920_v28 }
 0x19d   :  { %1630 = vmatpush.bf16.msra.mxu2 %v3268_v5 }
 0x1a0   :  { %v4922_v23 = vpop.f32.mrf.mxu2  ;;  %v682_v22 = vpop.f32.mrf.mxu0 }
 0x1a1   :  { %v4924_v53 = vpop.f32.mrf.mxu3  ;;  %v4927_v20 = vadd.f32 %v682_v22, %v4660_v50  ;;  %v751_v13 = vpop.f32.mrf.mxu1  ;;  %v3895_v50 = vld [vmem:[%s6024_s3 + $0xf4] sm:$0xf] }
 0x1a2   :  { %6058 = vst [vmem:[#allocation21_spill] sm:$0xff] %v4924_v53  ;;  %v4930_v0 = vadd.f32 %v751_v13, %v4662_v56  ;;  %v3269_v56 = vld [vmem:[%s6024_s3 + $0xf8] sm:$0xf0] }
 0x1a3   :  { %6059 = vst [vmem:[#allocation22_spill] sm:$0xff] %v4927_v20  ;;  %1229 = vmatmul.bf16.vlgmr.msra.gmra.mxu0 %v4305_v62  ;;  %v3272_v22 = vor.u32 %v3895_v50, %v3269_v56 }
 0x1a4   :  { %6060 = vst [vmem:[#allocation23_spill] sm:$0xff] %v4930_v0  ;;  %1298 = vmatmul.bf16.vlgmr.msra.gmra.mxu1 %v4305_v62 }
 0x1a5   :  { %1659 = vmatpush.bf16.msra.mxu3 %v3272_v22 }
 0x1a8   :  { %v4946_v16 = vpop.f32.mrf.mxu2  ;;  %v684_v13 = vpop.f32.mrf.mxu0 }
 0x1a9   :  { %v4948_v62 = vpop.f32.mrf.mxu3  ;;  %v4951_v0 = vadd.f32 %v684_v13, %v4664_v1  ;;  %v753_v20 = vpop.f32.mrf.mxu1 }
 0x1aa   :  { %v4954_v53 = vadd.f32 %v753_v20, %v4666_v14 }
 0x1b0   :  { %v4956_v43 = vpop.f32.mrf.mxu2  ;;  %v687_v28 = vpop.f32.mrf.mxu0 }
 0x1b1   :  { %v4958_v48 = vpop.f32.mrf.mxu3  ;;  %v4961_v50 = vadd.f32 %v687_v28, %v4684_v61  ;;  %v756_v5 = vpop.f32.mrf.mxu1  ;;  %v3893_v28 = vld [vmem:[%s6024_s3 + $0xe4] sm:$0xf] }
 0x1b2   :  { %v4964_v56 = vadd.f32 %v756_v5, %v4686_v37  ;;  %v3259_v37 = vld [vmem:[%s6024_s3 + $0xe0] sm:$0xf] }
 0x1b3   :  { %1234 = vmatmul.bf16.gmra.mxu0 %v4331_v8 }
 0x1b4   :  { %6061 = vst [vmem:[#allocation24_spill] sm:$0xff] %v4964_v56  ;;  %1303 = vmatmul.bf16.gmra.mxu1 %v4331_v8  ;;  %v3894_v8 = vld [vmem:[%s6024_s3 + $0xe4] sm:$0xf0] }
 0x1b5   :  { %v3260_v5 = vor.u32 %v3894_v8, %v3259_v37 }
 0x1b7   :  { %1631 = vmatpush.bf16.msra.mxu2 %v3260_v5 }
 0x1b8   :  { %v4968_v1 = vpop.f32.mrf.mxu2  ;;  %v689_v20 = vpop.f32.mrf.mxu0 }
 0x1b9   :  { %v4970_v14 = vpop.f32.mrf.mxu3  ;;  %v4973_v22 = vadd.f32 %v689_v20, %v4688_v25  ;;  %v758_v13 = vpop.f32.mrf.mxu1  ;;  %v3261_v25 = vld [vmem:[%s6024_s3 + $0xe8] sm:$0xf0] }
 0x1ba   :  { %6062 = vst [vmem:[#allocation25_spill] sm:$0xff] %v4970_v14  ;;  %v4976_v61 = vadd.f32 %v758_v13, %v4690_v49  ;;  %v3264_v20 = vor.u32 %v3893_v28, %v3261_v25 }
 0x1bb   :  { %6063 = vst [vmem:[#allocation26_spill] sm:$0xff] %v4973_v22 }
 0x1bc   :  { %6064 = vst [vmem:[#allocation27_spill] sm:$0xff] %v4976_v61  ;;  %1660 = vmatpush.bf16.msra.mxu3 %v3264_v20 }
 0x1c0   :  { %v4990_v49 = vpop.f32.mrf.mxu2  ;;  %v692_v61 = vpop.f32.mrf.mxu0 }
 0x1c1   :  { %v4992_v13 = vpop.f32.mrf.mxu3  ;;  %v4995_v22 = vadd.f32 %v692_v61, %v4696_v58  ;;  %v761_v14 = vpop.f32.mrf.mxu1 }
 0x1c2   :  { %v4998_v56 = vadd.f32 %v761_v14, %v4698_v9 }
 0x1c3   :  { %1239 = vmatmul.bf16.gmra.mxu0 %v4345_v12 }
 0x1c4   :  { %6065 = vst [vmem:[#allocation28_spill] sm:$0xff] %v4998_v56  ;;  %1308 = vmatmul.bf16.gmra.mxu1 %v4345_v12 }
 0x1c8   :  { %v5002_v37 = vpop.f32.mrf.mxu2  ;;  %v694_v28 = vpop.f32.mrf.mxu0 }
 0x1c9   :  { %v5004_v8 = vpop.f32.mrf.mxu3  ;;  %v5007_v5 = vadd.f32 %v694_v28, %v4712_v26  ;;  %v763_v25 = vpop.f32.mrf.mxu1  ;;  %v3251_v26 = vld [vmem:[%s6024_s3 + $0xd0] sm:$0xf] }
 0x1ca   :  { %6066 = vst [vmem:[#allocation29_spill] sm:$0xff] %v5004_v8  ;;  %v5010_v58 = vadd.f32 %v763_v25, %v4714_v38  ;;  %v6073_v8 = vld [vmem:[#allocation2_spill] sm:$0xff]  ;;  %v3892_v38 = vld [vmem:[%s6024_s3 + $0xd4] sm:$0xf0] }
 0x1cb   :  { %6067 = vst [vmem:[#allocation30_spill] sm:$0xff] %v5007_v5  ;;  %v3252_v28 = vor.u32 %v3892_v38, %v3251_v26 }
 0x1cc   :  { %6068 = vst [vmem:[#allocation31_spill] sm:$0xff] %v5010_v58  ;;  %v6075_v58 = vld [vmem:[#allocation6_spill] sm:$0xff] }
 0x1cd   :  { %1632 = vmatpush.bf16.msra.mxu2 %v3252_v28 }
 0x1d0   :  { %v5012_v61 = vpop.f32.mrf.mxu2  ;;  %v697_v14 = vpop.f32.mrf.mxu0 }
 0x1d1   :  { %6069 = vst [vmem:[#allocation32_spill] sm:$0xff] %v5012_v61  ;;  %v5014_v9 = vpop.f32.mrf.mxu3  ;;  %v5017_v20 = vadd.f32 %v697_v14, %v4720_v44  ;;  %v766_v12 = vpop.f32.mrf.mxu1  ;;  %v3891_v44 = vld [vmem:[%s6024_s3 + $0xd4] sm:$0xf] }
 0x1d2   :  { %6070 = vst [vmem:[#allocation33_spill] sm:$0xff] %v5014_v9  ;;  %v5020_v56 = vadd.f32 %v766_v12, %v4722_v60  ;;  %v3253_v60 = vld [vmem:[%s6024_s3 + $0xd8] sm:$0xf0] }
 0x1d3   :  { %6071 = vst [vmem:[#allocation34_spill] sm:$0xff] %v5017_v20  ;;  %1244 = vmatmul.bf16.gmra.mxu0 %v6073_v8  ;;  %v3256_v25 = vor.u32 %v3891_v44, %v3253_v60 }
 0x1d4   :  { %6072 = vst [vmem:[#allocation35_spill] sm:$0xff] %v5020_v56  ;;  %1313 = vmatmul.bf16.gmra.mxu1 %v6073_v8  ;;  %v6074_v56 = vld [vmem:[#allocation5_spill] sm:$0xff] }
 0x1d5   :  { %1661 = vmatpush.bf16.msra.mxu3 %v3256_v25 }
 0x1d8   :  { %v5036_v14 = vpop.f32.mrf.mxu2  ;;  %v699_v12 = vpop.f32.mrf.mxu0 }
 0x1d9   :  { %v5038_v8 = vpop.f32.mrf.mxu3  ;;  %v5041_v20 = vadd.f32 %v699_v12, %v6074_v56  ;;  %v768_v9 = vpop.f32.mrf.mxu1 }
 0x1da   :  { %v5044_v61 = vadd.f32 %v768_v9, %v6075_v58 }
 0x1e0   :  { %v5046_v26 = vpop.f32.mrf.mxu2  ;;  %v702_v5 = vpop.f32.mrf.mxu0 }
 0x1e1   :  { %v5048_v38 = vpop.f32.mrf.mxu3  ;;  %v5051_v44 = vadd.f32 %v702_v5, %v4744_v21  ;;  %v771_v28 = vpop.f32.mrf.mxu1  ;;  %v3889_v5 = vld [vmem:[%s6024_s3 + $0xc4] sm:$0xf] }
 0x1e2   :  { %6076 = vst [vmem:[#allocation2_spill] sm:$0xff] %v5048_v38  ;;  %v5054_v60 = vadd.f32 %v771_v28, %v4746_v6  ;;  %v3243_v6 = vld [vmem:[%s6024_s3 + $0xc0] sm:$0xf] }
 0x1e3   :  { %6077 = vst [vmem:[#allocation5_spill] sm:$0xff] %v5051_v44  ;;  %1249 = vmatmul.bf16.gmra.mxu0 %v4397_v32 }
 0x1e4   :  { %6078 = vst [vmem:[#allocation6_spill] sm:$0xff] %v5054_v60  ;;  %1318 = vmatmul.bf16.gmra.mxu1 %v4397_v32  ;;  %v3890_v32 = vld [vmem:[%s6024_s3 + $0xc4] sm:$0xf0] }
 0x1e5   :  { %v3244_v28 = vor.u32 %v3890_v32, %v3243_v6  ;;  %v6089_v6 = vld [vmem:[#allocation3_spill] sm:$0xff] }
 0x1e7   :  { %1633 = vmatpush.bf16.msra.mxu2 %v3244_v28 }
 0x1e8   :  { %v5058_v56 = vpop.f32.mrf.mxu2  ;;  %v704_v9 = vpop.f32.mrf.mxu0 }
 0x1e9   :  { %6079 = vst [vmem:[#allocation36_spill] sm:$0xff] %v5058_v56  ;;  %v5060_v58 = vpop.f32.mrf.mxu3  ;;  %v5063_v25 = vadd.f32 %v704_v9, %v4748_v17  ;;  %v773_v12 = vpop.f32.mrf.mxu1  ;;  %v3245_v17 = vld [vmem:[%s6024_s3 + $0xc8] sm:$0xf0]  ;;  %v6087_v56 = vld [vmem:[#allocation8_spill] sm:$0xff] }
 0x1ea   :  { %6080 = vst [vmem:[#allocation37_spill] sm:$0xff] %v5060_v58  ;;  %v5066_v21 = vadd.f32 %v773_v12, %v4750_v18  ;;  %v3248_v9 = vor.u32 %v3889_v5, %v3245_v17  ;;  %v6092_v17 = vld [vmem:[#allocation9_spill] sm:$0xff] }
 0x1eb   :  { %6081 = vst [vmem:[#allocation38_spill] sm:$0xff] %v5063_v25  ;;  %v6085_v25 = vld [vmem:[#allocation7_spill] sm:$0xff] }
 0x1ec   :  { %6082 = vst [vmem:[#allocation39_spill] sm:$0xff] %v5066_v21  ;;  %1662 = vmatpush.bf16.msra.mxu3 %v3248_v9 }
 0x1f0   :  { %v5080_v18 = vpop.f32.mrf.mxu2  ;;  %v707_v21 = vpop.f32.mrf.mxu0 }
 0x1f1   :  { %6083 = vst [vmem:[#allocation40_spill] sm:$0xff] %v5080_v18  ;;  %v5082_v12 = vpop.f32.mrf.mxu3  ;;  %v5085_v58 = vadd.f32 %v707_v21, %v6085_v25  ;;  %v776_v60 = vpop.f32.mrf.mxu1  ;;  %v6094_v18 = vld [vmem:[#allocation10_spill] sm:$0xff] }
 0x1f2   :  { %6084 = vst [vmem:[#allocation41_spill] sm:$0xff] %v5082_v12  ;;  %v5088_v44 = vadd.f32 %v776_v60, %v6087_v56 }
 0x1f3   :  { %6086 = vst [vmem:[#allocation7_spill] sm:$0xff] %v5085_v58  ;;  %1254 = vmatmul.bf16.gmra.mxu0 %v6089_v6 }
 0x1f4   :  { %6088 = vst [vmem:[#allocation8_spill] sm:$0xff] %v5088_v44  ;;  %1323 = vmatmul.bf16.gmra.mxu1 %v6089_v6  ;;  %v6098_v44 = vld [vmem:[#allocation11_spill] sm:$0xff] }
 0x1f8   :  { %v5092_v32 = vpop.f32.mrf.mxu2  ;;  %v709_v28 = vpop.f32.mrf.mxu0 }
 0x1f9   :  { %6090 = vst [vmem:[#allocation3_spill] sm:$0xff] %v5092_v32  ;;  %v5094_v5 = vpop.f32.mrf.mxu3  ;;  %v5097_v9 = vadd.f32 %v709_v28, %v6092_v17  ;;  %v778_v12 = vpop.f32.mrf.mxu1  ;;  %v6100_v32 = vld [vmem:[#allocation12_spill] sm:$0xff] }
 0x1fa   :  { %6091 = vst [vmem:[#allocation42_spill] sm:$0xff] %v5094_v5  ;;  %v5100_v25 = vadd.f32 %v778_v12, %v6094_v18  ;;  %v6102_v5 = vld [vmem:[#allocation4_spill] sm:$0xff]  ;;  %v3888_v12 = vld [vmem:[%s6024_s3 + $0xb4] sm:$0xf0] }
 0x1fb   :  { %6093 = vst [vmem:[#allocation9_spill] sm:$0xff] %v5097_v9  ;;  %v3235_v18 = vld [vmem:[%s6024_s3 + $0xb0] sm:$0xf] }
 0x1fc   :  { %6095 = vst [vmem:[#allocation10_spill] sm:$0xff] %v5100_v25  ;;  %v3236_v28 = vor.u32 %v3888_v12, %v3235_v18  ;;  %v6104_v25 = vld [vmem:[#allocation14_spill] sm:$0xff] }
 0x1fe   :  { %1634 = vmatpush.bf16.msra.mxu2 %v3236_v28 }
 0x200   :  { %v5102_v21 = vpop.f32.mrf.mxu2  ;;  %v712_v56 = vpop.f32.mrf.mxu0 }
 0x201   :  { %6096 = vst [vmem:[#allocation43_spill] sm:$0xff] %v5102_v21  ;;  %v5104_v60 = vpop.f32.mrf.mxu3  ;;  %v5107_v58 = vadd.f32 %v712_v56, %v6098_v44  ;;  %v781_v6 = vpop.f32.mrf.mxu1  ;;  %v3887_v44 = vld [vmem:[%s6024_s3 + $0xb4] sm:$0xf] }
 0x202   :  { %6097 = vst [vmem:[#allocation44_spill] sm:$0xff] %v5104_v60  ;;  %v5110_v38 = vadd.f32 %v781_v6, %v6100_v32  ;;  %v3237_v32 = vld [vmem:[%s6024_s3 + $0xb8] sm:$0xf0] }
 0x203   :  { %6099 = vst [vmem:[#allocation11_spill] sm:$0xff] %v5107_v58  ;;  %1259 = vmatmul.bf16.gmra.mxu0 %v6102_v5  ;;  %v3240_v17 = vor.u32 %v3887_v44, %v3237_v32 }
 0x204   :  { %6101 = vst [vmem:[#allocation12_spill] sm:$0xff] %v5110_v38  ;;  %1328 = vmatmul.bf16.gmra.mxu1 %v6102_v5  ;;  %v6103_v38 = vld [vmem:[#allocation13_spill] sm:$0xff] }
 0x205   :  { %1663 = vmatpush.bf16.msra.mxu3 %v3240_v17 }
 0x208   :  { %v5126_v56 = vpop.f32.mrf.mxu2  ;;  %v714_v6 = vpop.f32.mrf.mxu0 }
 0x209   :  { %v5128_v5 = vpop.f32.mrf.mxu3  ;;  %v5131_v58 = vadd.f32 %v714_v6, %v6103_v38  ;;  %v783_v60 = vpop.f32.mrf.mxu1 }
 0x20a   :  { %v5134_v21 = vadd.f32 %v783_v60, %v6104_v25 }
 0x20c   :  { %6105 = vst [vmem:[#allocation4_spill] sm:$0xff] %v5134_v21 }
 0x210   :  { %v5136_v18 = vpop.f32.mrf.mxu2  ;;  %v717_v9 = vpop.f32.mrf.mxu0 }
 0x211   :  { %v5138_v12 = vpop.f32.mrf.mxu3  ;;  %v835_v44 = vadd.f32 %v717_v9, %v4804_v45  ;;  %v786_v32 = vpop.f32.mrf.mxu1 }
 0x212   :  { %6106 = vst [vmem:[#allocation13_spill] sm:$0xff] %v5138_v12  ;;  %v836_v28 = vadd.f32 %v786_v32, %v4806_v24 }
 0x213   :  { %1264 = vmatmul.bf16.gmra.mxu0 %v4517_v39 }
 0x214   :  { %1333 = vmatmul.bf16.gmra.mxu1 %v4517_v39 }
 0x218   :  { %v1001_v38 = vpop.f32.mrf.mxu2  ;;  %v719_v25 = vpop.f32.mrf.mxu0 }
 0x219   :  { %v5144_v17 = vadd.f32 %v1001_v38, %v835_v44  ;;  %v1070_v6 = vpop.f32.mrf.mxu3  ;;  %v5149_v21 = vadd.f32 %v719_v25, %v4808_v29  ;;  %v788_v12 = vpop.f32.mrf.mxu1  ;;  %v1407_v44 = vld [vmem:[%s6025_s2] sm:$0x3] }
 0x21a   :  { %v5146_v60 = vadd.f32 %v1070_v6, %v836_v28  ;;  %v5152_v45 = vadd.f32 %v788_v12, %v4810_v30  ;;  %v3227_v29 = vld [vmem:[%s6024_s3 + $0xa0] sm:$0xf]  ;;  %v3886_v30 = vld [vmem:[%s6024_s3 + $0xa4] sm:$0xf0]  ;;  %v3229_v12 = vld [vmem:[%s6024_s3 + $0xa8] sm:$0xf0]  ;;  %v1078_v6 = vadd.f32 %v4842_v55, %v4826_v4 }
 0x21b   :  { %v5175_v38 = vperm.slane %v1407_v44, 0  ;;  %v5179_v25 = vperm.slane %v1407_v44, 1  ;;  %v3219_v4 = vld [vmem:[%s6024_s3 + $0x90] sm:$0xf]  ;;  %v3884_v55 = vld [vmem:[%s6024_s3 + $0x94] sm:$0xf0] }
 0x21c   :  { %6107 = vst [vmem:[#allocation14_spill] sm:$0xff] %v5146_v60  ;;  %v3883_v44 = vld [vmem:[%s6024_s3 + $0x94] sm:$0xf] }
 0x220   :  { %v1230_v9 = vpop.f32.mrf.mxu0 }
 0x221   :  { %v1359_v24 = vadd.f32 %v1230_v9, %v4818_v47  ;;  %v1299_v32 = vpop.f32.mrf.mxu1  ;;  %v3885_v47 = vld [vmem:[%s6024_s3 + $0xa4] sm:$0xf] }
 0x222   :  { %v1360_v39 = vadd.f32 %v1299_v32, %v4820_v46  ;;  %v3228_v46 = vor.u32 %v3886_v30, %v3227_v29  ;;  %v3232_v28 = vor.u32 %v3885_v47, %v3229_v12 }
 0x223   :  { %1269 = vmatmul.bf16.gmra.mxu0 %v4588_v33  ;;  %v1413_v60 = vadd.f32 %v5175_v38, %v1359_v24 }
 0x224   :  { %1338 = vmatmul.bf16.gmra.mxu1 %v4588_v33  ;;  %v1077_v33 = vadd.f32 %v4840_v42, %v4823_v63  ;;  %1635 = vmatpush.bf16.msra.mxu2 %v3228_v46  ;;  %v1414_v12 = vadd.f32 %v5179_v25, %v1360_v39  ;;  %v3220_v46 = vor.u32 %v3884_v55, %v3219_v4  ;;  %v3221_v39 = vld [vmem:[%s6024_s3 + $0x98] sm:$0xf0]  ;;  %v3928_v4 = vld [vmem:[%s6024_s3 + $0x1f4] sm:$0xf0]  ;;  %v3927_v55 = vld [vmem:[%s6024_s3 + $0x1f4] sm:$0xf] }
 0x225   :  { %1664 = vmatpush.bf16.msra.mxu3 %v3232_v28  ;;  %v3224_v28 = vor.u32 %v3883_v44, %v3221_v39  ;;  %v1082_v39 = vadd.f32 %v4866_v36, %v4862_v3  ;;  %v3485_v36 = vld [vmem:[%s6024_s3 + $0x1e8] sm:$0xf0] }
 0x228   :  { %v1232_v9 = vpop.f32.mrf.mxu0  ;;  %1636 = vmatpush.bf16.msra.mxu2 %v3220_v46 }
 0x229   :  { %v1361_v32 = vadd.f32 %v1232_v9, %v1077_v33  ;;  %v1301_v29 = vpop.f32.mrf.mxu1  ;;  %1665 = vmatpush.bf16.msra.mxu3 %v3224_v28  ;;  %v3211_v9 = vld [vmem:[%s6024_s3 + $0x80] sm:$0xf] }
 0x22a   :  { %v1362_v30 = vadd.f32 %v1301_v29, %v1078_v6  ;;  %v3881_v29 = vld [vmem:[%s6024_s3 + $0x84] sm:$0xf] }
 0x22b   :  { %v1415_v47 = vadd.f32 %v5175_v38, %v1361_v32  ;;  %v3882_v32 = vld [vmem:[%s6024_s3 + $0x84] sm:$0xf0] }
 0x22c   :  { %v1416_v63 = vadd.f32 %v5179_v25, %v1362_v30  ;;  %v3212_v30 = vor.u32 %v3882_v32, %v3211_v9 }
 0x22d   :  { %v1461_v42 = vmax.f32 %v1413_v60, %v1415_v47  ;;  %v3213_v47 = vld [vmem:[%s6024_s3 + $0x88] sm:$0xf0] }
 0x22e   :  { %v1462_v24 = vmax.f32 %v1414_v12, %v1416_v63  ;;  %v3216_v12 = vor.u32 %v3881_v29, %v3213_v47  ;;  %1637 = vmatpush.bf16.msra.mxu2 %v3212_v30  ;;  %v1079_v63 = vadd.f32 %v4854_v15, %v4845_v51  ;;  %v3493_v51 = vld [vmem:[%s6024_s3 + $0x1f8] sm:$0xf0]  ;;  %v1081_v15 = vadd.f32 %v4864_v19, %v4859_v59  ;;  %v3925_v59 = vld [vmem:[%s6024_s3 + $0x1e4] sm:$0xf] }
 0x22f   :  { %v3496_v46 = vor.u32 %v3927_v55, %v3493_v51  ;;  %v3488_v30 = vor.u32 %v3925_v59, %v3485_v36  ;;  %v3923_v55 = vld [vmem:[%s6024_s3 + $0x1d4] sm:$0xf]  ;;  %v3477_v51 = vld [vmem:[%s6024_s3 + $0x1d8] sm:$0xf0]  ;;  %v3469_v59 = vld [vmem:[%s6024_s3 + $0x1c8] sm:$0xf0] }
 0x230   :  { %v5197_v60 = vmax.f32 %v1461_v42, %v1462_v24  ;;  %v1235_v33 = vpop.f32.mrf.mxu0  ;;  %1666 = vmatpush.bf16.msra.mxu3 %v3216_v12  ;;  %v3491_v42 = vld [vmem:[%s6024_s3 + $0x1f0] sm:$0xf] }
 0x231   :  { %v1304_v6 = vpop.f32.mrf.mxu1  ;;  %v3492_v44 = vor.u32 %v3928_v4, %v3491_v42  ;;  %v1363_v24 = vadd.f32 %v1235_v33, %v1079_v63  ;;  %2125 = vmatpush.bf16.msrb.mxu1 %v3496_v46  ;;  %v3475_v42 = vld [vmem:[%s6024_s3 + $0x1d0] sm:$0xf]  ;;  %v3924_v4 = vld [vmem:[%s6024_s3 + $0x1d4] sm:$0xf0] }
 0x232   :  { %v3459_v36 = vld [vmem:[%s6024_s3 + $0x1b0] sm:$0xf] }
 0x233   :  { %1274 = vmatmul.bf16.gmra.mxu0 %v4628_v10  ;;  %v1417_v33 = vadd.f32 %v5175_v38, %v1363_v24 }
 0x234   :  { %1343 = vmatmul.bf16.gmra.mxu1 %v4628_v10  ;;  %v1080_v10 = vadd.f32 %v4856_v7, %v4848_v11  ;;  %2096 = vmatpush.bf16.msrb.mxu0 %v3492_v44  ;;  %v3483_v11 = vld [vmem:[%s6024_s3 + $0x1e0] sm:$0xf]  ;;  %v3926_v7 = vld [vmem:[%s6024_s3 + $0x1e4] sm:$0xf0]  ;;  %v3476_v44 = vor.u32 %v3924_v4, %v3475_v42 }
 0x235   :  { %v3484_v3 = vor.u32 %v3926_v7, %v3483_v11  ;;  %2126 = vmatpush.bf16.msrb.mxu1 %v3488_v30  ;;  %v6108_v4 = vld [vmem:[#allocation15_spill] sm:$0xff] }
 0x236   :  { %v1364_v28 = vadd.f32 %v1304_v6, %v1080_v10 }
 0x238   :  { %v1237_v9 = vpop.f32.mrf.mxu0  ;;  %v1418_v47 = vadd.f32 %v5179_v25, %v1364_v28  ;;  %2097 = vmatpush.bf16.msrb.mxu0 %v3484_v3  ;;  %v3467_v28 = vld [vmem:[%s6024_s3 + $0x1c0] sm:$0xf] }
 0x239   :  { %v1365_v32 = vadd.f32 %v1237_v9, %v1081_v15  ;;  %v1306_v29 = vpop.f32.mrf.mxu1  ;;  %v3480_v15 = vor.u32 %v3923_v55, %v3477_v51  ;;  %v3922_v9 = vld [vmem:[%s6024_s3 + $0x1c4] sm:$0xf0]  ;;  %v6109_v55 = vld [vmem:[#allocation16_spill] sm:$0xff] }
 0x23a   :  { %v1366_v19 = vadd.f32 %v1306_v29, %v1082_v39  ;;  %v1497_v29 = vmax.f32 %v5197_v60, 0.0  ;;  %v3468_v7 = vor.u32 %v3922_v9, %v3467_v28  ;;  %v3920_v60 = vld [vmem:[%s6024_s3 + $0x1b4] sm:$0xf0] }
 0x23b   :  { %v1419_v6 = vadd.f32 %v5175_v38, %v1365_v32  ;;  %2127 = vmatpush.bf16.msrb.mxu1 %v3480_v15  ;;  %v3921_v32 = vld [vmem:[%s6024_s3 + $0x1c4] sm:$0xf]  ;;  %v3460_v30 = vor.u32 %v3920_v60, %v3459_v36  ;;  %v3451_v15 = vld [vmem:[%s6024_s3 + $0x1a0] sm:$0xf]  ;;  %v3915_v36 = vld [vmem:[%s6024_s3 + $0x194] sm:$0xf] }
 0x23c   :  { %v1420_v12 = vadd.f32 %v5179_v25, %v1366_v19  ;;  %2098 = vmatpush.bf16.msrb.mxu0 %v3476_v44  ;;  %v3472_v19 = vor.u32 %v3921_v32, %v3469_v59  ;;  %v3443_v59 = vld [vmem:[%s6024_s3 + $0x190] sm:$0xf] }
 0x23d   :  { %v1463_v63 = vmax.f32 %v1417_v33, %v1419_v6  ;;  %v3919_v33 = vld [vmem:[%s6024_s3 + $0x1b4] sm:$0xf]  ;;  %v1083_v6 = vadd.f32 %v4878_v27, %v4869_v31 }
 0x23e   :  { %v1464_v10 = vmax.f32 %v1418_v47, %v1420_v12  ;;  %v1084_v47 = vadd.f32 %v4880_v40, %v4872_v34  ;;  %v3918_v34 = vld [vmem:[%s6024_s3 + $0x1a4] sm:$0xf0]  ;;  %v3917_v40 = vld [vmem:[%s6024_s3 + $0x1a4] sm:$0xf] }
 0x23f   :  { %2128 = vmatpush.bf16.msrb.mxu1 %v3472_v19  ;;  %v3916_v19 = vld [vmem:[%s6024_s3 + $0x194] sm:$0xf0] }
 0x240   :  { %v5261_v24 = vmax.f32 %v1463_v63, %v1464_v10  ;;  %v1240_v46 = vpop.f32.mrf.mxu0  ;;  %2099 = vmatpush.bf16.msrb.mxu0 %v3468_v7  ;;  %v1085_v63 = vadd.f32 %v4896_v52, %v4883_v54  ;;  %v1086_v10 = vadd.f32 %v6109_v55, %v6108_v4  ;;  %v3452_v52 = vor.u32 %v3918_v34, %v3451_v15  ;;  %v3914_v4 = vld [vmem:[%s6024_s3 + $0x184] sm:$0xf0]  ;;  %v3913_v55 = vld [vmem:[%s6024_s3 + $0x184] sm:$0xf] }
 0x241   :  { %v1309_v39 = vpop.f32.mrf.mxu1  ;;  %v1367_v42 = vadd.f32 %v1240_v46, %v1083_v6  ;;  %v3445_v6 = vld [vmem:[%s6024_s3 + $0x198] sm:$0xf0]  ;;  %v6111_v15 = vld [vmem:[#allocation19_spill] sm:$0xff] }
 0x242   :  { %v1498_v11 = vmax.f32 %v5261_v24, 0.0  ;;  %v1368_v44 = vadd.f32 %v1309_v39, %v1084_v47  ;;  %v3453_v24 = vld [vmem:[%s6024_s3 + $0x1a8] sm:$0xf0] }
 0x243   :  { %1279 = vmatmul.bf16.gmra.mxu0 %v4899_v41  ;;  %v1421_v46 = vadd.f32 %v5175_v38, %v1367_v42  ;;  %v3456_v28 = vor.u32 %v3917_v40, %v3453_v24  ;;  %v3435_v42 = vld [vmem:[%s6024_s3 + $0x180] sm:$0xf] }
 0x244   :  { %v5278_v3 = vpack.c.bf16 %v1498_v11, %v1497_v29  ;;  %1348 = vmatmul.bf16.gmra.mxu1 %v4899_v41  ;;  %v3461_v41 = vld [vmem:[%s6024_s3 + $0x1b8] sm:$0xf0]  ;;  %2100 = vmatpush.bf16.msrb.mxu0 %v3460_v30  ;;  %v1422_v9 = vadd.f32 %v5179_v25, %v1368_v44  ;;  %v3437_v44 = vld [vmem:[%s6024_s3 + $0x188] sm:$0xf0]  ;;  %v6112_v40 = vld [vmem:[#allocation18_spill] sm:$0xff] }
 0x245   :  { %v3464_v12 = vor.u32 %v3919_v33, %v3461_v41  ;;  %v61_v29 = vld [vmem:[%s6023_s0 + $0xd8] sm:$0xff]  ;;  %v3444_v33 = vor.u32 %v3916_v19, %v3443_v59  ;;  %v3448_v41 = vor.u32 %v3915_v36, %v3445_v6 }
 0x246   :  { %v1123_v30 = vpack.c.bf16 %v61_v29, %v4894_v2  ;;  %v3436_v2 = vor.u32 %v3914_v4, %v3435_v42  ;;  %v6115_v42 = vld [vmem:[#allocation22_spill] sm:$0xff] }
 0x247   :  { %2129 = vmatpush.bf16.msrb.mxu1 %v3464_v12  ;;  %v1091_v4 = vadd.f32 %v4946_v16, %v6115_v42  ;;  %v6120_v42 = vld [vmem:[#allocation27_spill] sm:$0xff] }
 0x248   :  { %v1242_v51 = vpop.f32.mrf.mxu0  ;;  %2101 = vmatpush.bf16.msrb.mxu0 %v3452_v52  ;;  %v1089_v52 = vadd.f32 %v4922_v23, %v4917_v35 }
 0x249   :  { %v1369_v31 = vadd.f32 %v1242_v51, %v1085_v63  ;;  %v1311_v27 = vpop.f32.mrf.mxu1  ;;  %v3440_v51 = vor.u32 %v3913_v55, %v3437_v44  ;;  %v6116_v44 = vld [vmem:[#allocation23_spill] sm:$0xff] }
 0x24a   :  { %v1370_v54 = vadd.f32 %v1311_v27, %v1086_v10  ;;  %v6110_v27 = vld [vmem:[#allocation17_spill] sm:$0xff] }
 0x24b   :  { %v1423_v39 = vadd.f32 %v5175_v38, %v1369_v31  ;;  %2130 = vmatpush.bf16.msrb.mxu1 %v3456_v28  ;;  %v1087_v34 = vadd.f32 %v6111_v15, %v6110_v27  ;;  %v1093_v27 = vadd.f32 %v4956_v43, %v4951_v0 }
 0x24c   :  { %v1424_v32 = vadd.f32 %v5179_v25, %v1370_v54  ;;  %2102 = vmatpush.bf16.msrb.mxu0 %v3444_v33  ;;  %v1088_v54 = vadd.f32 %v4914_v57, %v6112_v40 }
 0x24d   :  { %v1465_v7 = vmax.f32 %v1421_v46, %v1423_v39  ;;  %v6113_v46 = vld [vmem:[#allocation20_spill] sm:$0xff]  ;;  %v6114_v39 = vld [vmem:[#allocation21_spill] sm:$0xff] }
 0x24e   :  { %v1466_v60 = vmax.f32 %v1422_v9, %v1424_v32  ;;  %v1090_v28 = vadd.f32 %v6114_v39, %v6113_v46 }
 0x24f   :  { %2131 = vmatpush.bf16.msrb.mxu1 %v3448_v41  ;;  %v3331_v41 = vld [vmem:[%s6024_s3 + $0x70] sm:$0xf] }
 0x250   :  { %v1487_v47 = vmax.f32 %v1465_v7, %v1466_v60  ;;  %v1245_v12 = vpop.f32.mrf.mxu0  ;;  %2103 = vmatpush.bf16.msrb.mxu0 %v3436_v2  ;;  %v3333_v2 = vld [vmem:[%s6024_s3 + $0x78] sm:$0xf0] }
 0x251   :  { %v1314_v63 = vpop.f32.mrf.mxu1  ;;  %v1371_v24 = vadd.f32 %v1245_v12, %v1087_v34  ;;  %v3879_v12 = vld [vmem:[%s6024_s3 + $0x74] sm:$0xf] }
 0x252   :  { %v1499_v10 = vmax.f32 %v1487_v47, 0.0  ;;  %v1372_v9 = vadd.f32 %v1314_v63, %v1088_v54  ;;  %v3880_v47 = vld [vmem:[%s6024_s3 + $0x74] sm:$0xf0] }
 0x253   :  { %1284 = vmatmul.bf16.gmra.mxu0 %v1123_v30  ;;  %2132 = vmatpush.bf16.msrb.mxu1 %v3440_v51  ;;  %v1425_v59 = vadd.f32 %v5175_v38, %v1371_v24  ;;  %v3332_v55 = vor.u32 %v3880_v47, %v3331_v41  ;;  %v1092_v51 = vadd.f32 %v4948_v62, %v6116_v44  ;;  %v6119_v41 = vld [vmem:[#allocation26_spill] sm:$0xff] }
 0x254   :  { %v1529_v31 = vpack.c.bf16 %v1499_v10, %v1498_v11  ;;  %1353 = vmatmul.bf16.gmra.mxu1 %v1123_v30  ;;  %v1426_v57 = vadd.f32 %v5179_v25, %v1372_v9 }
 0x255   :  { %1768 = vmatpush.bf16.msrb.mxu2 %v3332_v55 }
 0x256   :  { %1638 = vmatmul.bf16.vlgmr.msra.gmra.mxu2 %v1529_v31  ;;  %1667 = vmatmul.bf16.vlgmr.msra.gmra.mxu3 %v1529_v31  ;;  %v3336_v31 = vor.u32 %v3879_v12, %v3333_v2  ;;  %v3317_v12 = vld [vmem:[%s6024_s3 + $0x58] sm:$0xf0] }
 0x258   :  { %v1247_v11 = vpop.f32.mrf.mxu0  ;;  %1797 = vmatpush.bf16.msrb.mxu3 %v3336_v31 }
 0x259   :  { %v1373_v32 = vadd.f32 %v1247_v11, %v1089_v52  ;;  %v1316_v29 = vpop.f32.mrf.mxu1 }
 0x25a   :  { %v1374_v7 = vadd.f32 %v1316_v29, %v1090_v28 }
 0x25b   :  { %v1427_v19 = vadd.f32 %v5175_v38, %v1373_v32  ;;  %v3878_v32 = vld [vmem:[%s6024_s3 + $0x64] sm:$0xf0] }
 0x25c   :  { %v1428_v36 = vadd.f32 %v5179_v25, %v1374_v7  ;;  %v3877_v7 = vld [vmem:[%s6024_s3 + $0x64] sm:$0xf] }
 0x25d   :  { %v1467_v60 = vmax.f32 %v1425_v59, %v1427_v19  ;;  %v3325_v59 = vld [vmem:[%s6024_s3 + $0x68] sm:$0xf0] }
 0x25e   :  { %v1468_v33 = vmax.f32 %v1426_v57, %v1428_v36  ;;  %v3328_v57 = vor.u32 %v3877_v7, %v3325_v59  ;;  %v1095_v36 = vadd.f32 %v4968_v1, %v4961_v50  ;;  %v1097_v50 = vadd.f32 %v4990_v49, %v6119_v41  ;;  %v6123_v59 = vld [vmem:[#allocation30_spill] sm:$0xff] }
 0x260   :  { %v1488_v35 = vmax.f32 %v1467_v60, %v1468_v33  ;;  %v1250_v23 = vpop.f32.mrf.mxu0  ;;  %v6117_v60 = vld [vmem:[#allocation24_spill] sm:$0xff]  ;;  %v6118_v33 = vld [vmem:[#allocation25_spill] sm:$0xff]  ;;  %1798 = vmatpush.bf16.msrb.mxu3 %v3328_v57 }
 0x261   :  { %v1319_v6 = vpop.f32.mrf.mxu1  ;;  %v1375_v15 = vadd.f32 %v1250_v23, %v1091_v4  ;;  %v3315_v23 = vld [vmem:[%s6024_s3 + $0x50] sm:$0xf]  ;;  %v1098_v4 = vadd.f32 %v4992_v13, %v6120_v42 }
 0x262   :  { %v1500_v30 = vmax.f32 %v1488_v35, 0.0  ;;  %v1376_v34 = vadd.f32 %v1319_v6, %v1092_v51  ;;  %v1096_v35 = vadd.f32 %v6118_v33, %v6117_v60  ;;  %v3876_v6 = vld [vmem:[%s6024_s3 + $0x54] sm:$0xf0]  ;;  %v6125_v33 = vld [vmem:[#allocation31_spill] sm:$0xff] }
 0x263   :  { %v1429_v24 = vadd.f32 %v5175_v38, %v1375_v15  ;;  %v3316_v47 = vor.u32 %v3876_v6, %v3315_v23 }
 0x264   :  { %v5366_v63 = vpack.c.bf16 %v1500_v30, %v1499_v10  ;;  %v1094_v10 = vadd.f32 %v4958_v48, %v4954_v53  ;;  %v1430_v62 = vadd.f32 %v5179_v25, %v1376_v34  ;;  %v3323_v48 = vld [vmem:[%s6024_s3 + $0x60] sm:$0xf] }
 0x265   :  { %v3324_v29 = vor.u32 %v3878_v32, %v3323_v48  ;;  %v6121_v48 = vld [vmem:[#allocation28_spill] sm:$0xff]  ;;  %v6122_v32 = vld [vmem:[#allocation29_spill] sm:$0xff] }
 0x267   :  { %1769 = vmatpush.bf16.msrb.mxu2 %v3324_v29  ;;  %v1100_v29 = vadd.f32 %v6122_v32, %v6121_v48 }
 0x268   :  { %v1252_v40 = vpop.f32.mrf.mxu0 }
 0x269   :  { %v1377_v16 = vadd.f32 %v1252_v40, %v1093_v27  ;;  %v1321_v54 = vpop.f32.mrf.mxu1 }
 0x26a   :  { %v1378_v52 = vadd.f32 %v1321_v54, %v1094_v10 }
 0x26b   :  { %v1431_v46 = vadd.f32 %v5175_v38, %v1377_v16  ;;  %1770 = vmatpush.bf16.msrb.mxu2 %v3316_v47 }
 0x26c   :  { %v1432_v39 = vadd.f32 %v5179_v25, %v1378_v52 }
 0x26d   :  { %v1469_v0 = vmax.f32 %v1429_v24, %v1431_v46 }
 0x26e   :  { %v1470_v43 = vmax.f32 %v1430_v62, %v1432_v39  ;;  %v3307_v62 = vld [vmem:[%s6024_s3 + $0x40] sm:$0xf]  ;;  %v3874_v39 = vld [vmem:[%s6024_s3 + $0x44] sm:$0xf0] }
 0x270   :  { %v1489_v28 = vmax.f32 %v1469_v0, %v1470_v43  ;;  %v1255_v9 = vpop.f32.mrf.mxu0  ;;  %v3873_v0 = vld [vmem:[%s6024_s3 + $0x44] sm:$0xf]  ;;  %v1099_v43 = vadd.f32 %v5002_v37, %v4995_v22  ;;  %v3871_v22 = vld [vmem:[%s6024_s3 + $0x34] sm:$0xf]  ;;  %v3301_v37 = vld [vmem:[%s6024_s3 + $0x38] sm:$0xf0] }
 0x271   :  { %v1324_v11 = vpop.f32.mrf.mxu1  ;;  %v1379_v1 = vadd.f32 %v1255_v9, %v1095_v36  ;;  %v3309_v9 = vld [vmem:[%s6024_s3 + $0x48] sm:$0xf0]  ;;  %v3304_v41 = vor.u32 %v3871_v22, %v3301_v37 }
 0x272   :  { %v1501_v53 = vmax.f32 %v1489_v28, 0.0  ;;  %v1380_v55 = vadd.f32 %v1324_v11, %v1096_v35  ;;  %v3308_v28 = vor.u32 %v3874_v39, %v3307_v62  ;;  %v3299_v11 = vld [vmem:[%s6024_s3 + $0x30] sm:$0xf]  ;;  %v3312_v7 = vor.u32 %v3873_v0, %v3309_v9  ;;  %v6126_v35 = vld [vmem:[#allocation33_spill] sm:$0xff]  ;;  %v6128_v39 = vld [vmem:[#allocation35_spill] sm:$0xff] }
 0x273   :  { %v1433_v49 = vadd.f32 %v5175_v38, %v1379_v1  ;;  %v1102_v23 = vadd.f32 %v6126_v35, %v6125_v33  ;;  %v1104_v0 = vadd.f32 %v5038_v8, %v6128_v39  ;;  %v3866_v33 = vld [vmem:[%s6024_s3 + $0x4] sm:$0xf0]  ;;  %v3865_v35 = vld [vmem:[%s6024_s3 + $0x4] sm:$0xf] }
 0x274   :  { %v1530_v19 = vpack.c.bf16 %v1501_v53, %v1500_v30  ;;  %v3875_v30 = vld [vmem:[%s6024_s3 + $0x54] sm:$0xf]  ;;  %v1434_v10 = vadd.f32 %v5179_v25, %v1380_v55  ;;  %1771 = vmatpush.bf16.msrb.mxu2 %v3308_v28  ;;  %v3868_v28 = vld [vmem:[%s6024_s3 + $0x14] sm:$0xf0] }
 0x275   :  { %v3320_v44 = vor.u32 %v3875_v30, %v3317_v12 }
 0x276   :  { %1643 = vmatmul.bf16.gmra.mxu2 %v1530_v19  ;;  %1672 = vmatmul.bf16.gmra.mxu3 %v1530_v19 }
 0x277   :  { %2104 = vmatmul.bf16.vlgmr.msrb.gmra.mxu0 %v1530_v19  ;;  %2133 = vmatmul.bf16.vlgmr.msrb.gmra.mxu1 %v1530_v19  ;;  %v6124_v19 = vld [vmem:[#allocation32_spill] sm:$0xff] }
 0x278   :  { %v1257_v2 = vpop.f32.mrf.mxu0  ;;  %1799 = vmatpush.bf16.msrb.mxu3 %v3320_v44  ;;  %v1101_v57 = vadd.f32 %v6124_v19, %v6123_v59 }
 0x279   :  { %v1381_v51 = vadd.f32 %v1257_v2, %v1097_v50  ;;  %v1326_v31 = vpop.f32.mrf.mxu1 }
 0x27a   :  { %v1382_v27 = vadd.f32 %v1326_v31, %v1098_v4 }
 0x27b   :  { %v1435_v15 = vadd.f32 %v5175_v38, %v1381_v51 }
 0x27c   :  { %v1436_v34 = vadd.f32 %v5179_v25, %v1382_v27  ;;  %1800 = vmatpush.bf16.msrb.mxu3 %v3312_v7 }
 0x27d   :  { %v1471_v40 = vmax.f32 %v1433_v49, %v1435_v15  ;;  %v3291_v15 = vld [vmem:[%s6024_s3 + $0x20] sm:$0xf] }
 0x27e   :  { %v1472_v16 = vmax.f32 %v1434_v10, %v1436_v34  ;;  %v3870_v10 = vld [vmem:[%s6024_s3 + $0x24] sm:$0xf0] }
 0x27f   :  { %v3292_v34 = vor.u32 %v3870_v10, %v3291_v15  ;;  %v3911_v15 = vld [vmem:[%s6024_s3 + $0x174] sm:$0xf] }
 0x280   :  { %v1490_v13 = vmax.f32 %v1471_v40, %v1472_v16  ;;  %v1260_v54 = vpop.f32.mrf.mxu0  ;;  %1801 = vmatpush.bf16.msrb.mxu3 %v3304_v41  ;;  %v3869_v40 = vld [vmem:[%s6024_s3 + $0x24] sm:$0xf]  ;;  %v3293_v16 = vld [vmem:[%s6024_s3 + $0x28] sm:$0xf0]  ;;  %v6135_v10 = vld [vmem:[#allocation40_spill] sm:$0xff] }
 0x281   :  { %v1329_v52 = vpop.f32.mrf.mxu1  ;;  %v1383_v36 = vadd.f32 %v1260_v54, %v1099_v43  ;;  %v3296_v54 = vor.u32 %v3869_v40, %v3293_v16  ;;  %v3283_v43 = vld [vmem:[%s6024_s3 + $0x10] sm:$0xf] }
 0x282   :  { %v1502_v24 = vmax.f32 %v1490_v13, 0.0  ;;  %v1384_v6 = vadd.f32 %v1329_v52, %v1100_v29  ;;  %v6127_v52 = vld [vmem:[#allocation34_spill] sm:$0xff]  ;;  %v3284_v8 = vor.u32 %v3868_v28, %v3283_v43 }
 0x283   :  { %v1437_v12 = vadd.f32 %v5175_v38, %v1383_v36  ;;  %v1103_v62 = vadd.f32 %v5036_v14, %v6127_v52  ;;  %v1105_v14 = vadd.f32 %v5046_v26, %v5041_v20  ;;  %v6137_v52 = vld [vmem:[#allocation41_spill] sm:$0xff] }
 0x284   :  { %v5419_v46 = vpack.c.bf16 %v1502_v24, %v1501_v53  ;;  %v3872_v53 = vld [vmem:[%s6024_s3 + $0x34] sm:$0xf0]  ;;  %v1438_v4 = vadd.f32 %v5179_v25, %v1384_v6  ;;  %1802 = vmatpush.bf16.msrb.mxu3 %v3296_v54  ;;  %v3277_v6 = vld [vmem:[%s6024_s3 + $0x8] sm:$0xf0] }
 0x285   :  { %v3300_v60 = vor.u32 %v3872_v53, %v3299_v11  ;;  %v3285_v11 = vld [vmem:[%s6024_s3 + $0x18] sm:$0xf0]  ;;  %v6129_v53 = vld [vmem:[#allocation2_spill] sm:$0xff]  ;;  %v6136_v54 = vld [vmem:[#allocation39_spill] sm:$0xff] }
 0x286   :  { %v1106_v48 = vadd.f32 %v6129_v53, %v5044_v61  ;;  %v3275_v61 = vld [vmem:[%s6024_s3] sm:$0xf] }
 0x287   :  { %1772 = vmatpush.bf16.msrb.mxu2 %v3300_v60 }
 0x288   :  { %v1262_v30 = vpop.f32.mrf.mxu0 }
 0x289   :  { %v1385_v50 = vadd.f32 %v1262_v30, %v1101_v57  ;;  %v1331_v1 = vpop.f32.mrf.mxu1 }
 0x28a   :  { %v1386_v47 = vadd.f32 %v1331_v1, %v1102_v23  ;;  %v3276_v23 = vor.u32 %v3866_v33, %v3275_v61  ;;  %v6138_v61 = vld [vmem:[#allocation7_spill] sm:$0xff] }
 0x28b   :  { %v1439_v42 = vadd.f32 %v5175_v38, %v1385_v50  ;;  %1773 = vmatpush.bf16.msrb.mxu2 %v3292_v34  ;;  %v3280_v50 = vor.u32 %v3865_v35, %v3277_v6  ;;  %v6139_v33 = vld [vmem:[#allocation3_spill] sm:$0xff]  ;;  %v6141_v6 = vld [vmem:[#allocation42_spill] sm:$0xff] }
 0x28c   :  { %v1440_v55 = vadd.f32 %v5179_v25, %v1386_v47  ;;  %v1111_v35 = vadd.f32 %v6139_v33, %v6138_v61  ;;  %v6148_v61 = vld [vmem:[#allocation4_spill] sm:$0xff]  ;;  %v6149_v33 = vld [vmem:[#allocation13_spill] sm:$0xff] }
 0x28d   :  { %v1473_v2 = vmax.f32 %v1437_v12, %v1439_v42  ;;  %v6130_v42 = vld [vmem:[#allocation5_spill] sm:$0xff] }
 0x28e   :  { %v1474_v44 = vmax.f32 %v1438_v4, %v1440_v55  ;;  %v6131_v4 = vld [vmem:[#allocation36_spill] sm:$0xff] }
 0x28f   :  { %1774 = vmatpush.bf16.msrb.mxu2 %v3284_v8  ;;  %v1107_v55 = vadd.f32 %v6131_v4, %v6130_v42  ;;  %v6143_v42 = vld [vmem:[#allocation43_spill] sm:$0xff] }
 0x290   :  { %v1491_v51 = vmax.f32 %v1473_v2, %v1474_v44  ;;  %v1265_v31 = vpop.f32.mrf.mxu0  ;;  %v6132_v2 = vld [vmem:[#allocation6_spill] sm:$0xff]  ;;  %v6133_v44 = vld [vmem:[#allocation37_spill] sm:$0xff] }
 0x291   :  { %v1334_v27 = vpop.f32.mrf.mxu1  ;;  %v1387_v9 = vadd.f32 %v1265_v31, %v1103_v62  ;;  %v3411_v31 = vld [vmem:[%s6024_s3 + $0x170] sm:$0xf]  ;;  %v1110_v62 = vadd.f32 %v6137_v52, %v6136_v54 }
 0x292   :  { %v1503_v49 = vmax.f32 %v1491_v51, 0.0  ;;  %v1388_v32 = vadd.f32 %v1334_v27, %v1104_v0  ;;  %v1108_v51 = vadd.f32 %v6133_v44, %v6132_v2  ;;  %v3912_v27 = vld [vmem:[%s6024_s3 + $0x174] sm:$0xf0]  ;;  %v3397_v44 = vld [vmem:[%s6024_s3 + $0x158] sm:$0xf0] }
 0x293   :  { %v1441_v20 = vadd.f32 %v5175_v38, %v1387_v9  ;;  %1775 = vmatpush.bf16.msrb.mxu2 %v3276_v23  ;;  %v3412_v16 = vor.u32 %v3912_v27, %v3411_v31  ;;  %v6140_v23 = vld [vmem:[#allocation8_spill] sm:$0xff] }
 0x294   :  { %v1531_v13 = vpack.c.bf16 %v1503_v49, %v1502_v24  ;;  %v3867_v24 = vld [vmem:[%s6024_s3 + $0x14] sm:$0xf]  ;;  %v1442_v19 = vadd.f32 %v5179_v25, %v1388_v32 }
 0x295   :  { %v3288_v7 = vor.u32 %v3867_v24, %v3285_v11  ;;  %v6145_v31 = vld [vmem:[#allocation44_spill] sm:$0xff] }
 0x296   :  { %1648 = vmatmul.bf16.gmra.mxu2 %v1531_v13  ;;  %1677 = vmatmul.bf16.gmra.mxu3 %v1531_v13 }
 0x297   :  { %2109 = vmatmul.bf16.gmra.mxu0 %v1531_v13  ;;  %2138 = vmatmul.bf16.gmra.mxu1 %v1531_v13  ;;  %v3413_v13 = vld [vmem:[%s6024_s3 + $0x178] sm:$0xf0] }
 0x298   :  { %v1267_v29 = vpop.f32.mrf.mxu0  ;;  %1803 = vmatpush.bf16.msrb.mxu3 %v3288_v7  ;;  %v3416_v43 = vor.u32 %v3911_v15, %v3413_v13  ;;  %1924 = vmatpush.bf16.msra.mxu2 %v3412_v16  ;;  %v3910_v7 = vld [vmem:[%s6024_s3 + $0x164] sm:$0xf0] }
 0x299   :  { %v1389_v22 = vadd.f32 %v1267_v29, %v1105_v14  ;;  %v1336_v37 = vpop.f32.mrf.mxu1  ;;  %v3403_v29 = vld [vmem:[%s6024_s3 + $0x160] sm:$0xf] }
 0x29a   :  { %v1390_v59 = vadd.f32 %v1336_v37, %v1106_v48  ;;  %v3404_v37 = vor.u32 %v3910_v7, %v3403_v29  ;;  %v6146_v7 = vld [vmem:[#allocation11_spill] sm:$0xff] }
 0x29b   :  { %v1443_v26 = vadd.f32 %v5175_v38, %v1389_v22  ;;  %v3909_v22 = vld [vmem:[%s6024_s3 + $0x164] sm:$0xf] }
 0x29c   :  { %v1444_v57 = vadd.f32 %v5179_v25, %v1390_v59  ;;  %1804 = vmatpush.bf16.msrb.mxu3 %v3280_v50  ;;  %v3405_v59 = vld [vmem:[%s6024_s3 + $0x168] sm:$0xf0]  ;;  %1925 = vmatpush.bf16.msra.mxu2 %v3404_v37  ;;  %v3908_v50 = vld [vmem:[%s6024_s3 + $0x154] sm:$0xf0]  ;;  %v6147_v37 = vld [vmem:[#allocation12_spill] sm:$0xff] }
 0x29d   :  { %v1475_v36 = vmax.f32 %v1441_v20, %v1443_v26 }
 0x29e   :  { %v1476_v60 = vmax.f32 %v1442_v19, %v1444_v57  ;;  %v3408_v19 = vor.u32 %v3909_v22, %v3405_v59  ;;  %v1115_v22 = vadd.f32 %v5126_v56, %v6146_v7  ;;  %v1116_v59 = vadd.f32 %v5128_v5, %v6147_v37  ;;  %v3897_v37 = vld [vmem:[%s6024_s3 + $0x104] sm:$0xf] }
 0x29f   :  { %v1117_v56 = vadd.f32 %v5136_v18, %v5131_v58  ;;  %v3901_v18 = vld [vmem:[%s6024_s3 + $0x124] sm:$0xf] }
 0x2a0   :  { %v1492_v30 = vmax.f32 %v1475_v36, %v1476_v60  ;;  %v1270_v41 = vpop.f32.mrf.mxu0  ;;  %1953 = vmatpush.bf16.msra.mxu3 %v3416_v43  ;;  %v3387_v43 = vld [vmem:[%s6024_s3 + $0x140] sm:$0xf] }
 0x2a1   :  { %v1339_v1 = vpop.f32.mrf.mxu1  ;;  %v1391_v40 = vadd.f32 %v1270_v41, %v1107_v55  ;;  %v3395_v41 = vld [vmem:[%s6024_s3 + $0x150] sm:$0xf] }
 0x2a2   :  { %v1504_v47 = vmax.f32 %v1492_v30, 0.0  ;;  %v1392_v39 = vadd.f32 %v1339_v1, %v1108_v51  ;;  %v1112_v30 = vadd.f32 %v6141_v6, %v6140_v23  ;;  %v3907_v1 = vld [vmem:[%s6024_s3 + $0x154] sm:$0xf]  ;;  %v3396_v2 = vor.u32 %v3908_v50, %v3395_v41  ;;  %v6144_v51 = vld [vmem:[#allocation10_spill] sm:$0xff] }
 0x2a3   :  { %v1445_v9 = vadd.f32 %v5175_v38, %v1391_v40  ;;  %v1114_v27 = vadd.f32 %v6145_v31, %v6144_v51 }
 0x2a4   :  { %v5505_v12 = vpack.c.bf16 %v1504_v47, %v1503_v49  ;;  %v6134_v49 = vld [vmem:[#allocation38_spill] sm:$0xff]  ;;  %v1446_v11 = vadd.f32 %v5179_v25, %v1392_v39  ;;  %1954 = vmatpush.bf16.msra.mxu3 %v3408_v19  ;;  %1926 = vmatpush.bf16.msra.mxu2 %v3396_v2  ;;  %v3903_v19 = vld [vmem:[%s6024_s3 + $0x134] sm:$0xf] }
 0x2a5   :  { %v1109_v34 = vadd.f32 %v6135_v10, %v6134_v49  ;;  %v3400_v10 = vor.u32 %v3907_v1, %v3397_v44 }
 0x2a8   :  { %v1272_v0 = vpop.f32.mrf.mxu0  ;;  %1955 = vmatpush.bf16.msra.mxu3 %v3400_v10 }
 0x2a9   :  { %v1393_v28 = vadd.f32 %v1272_v0, %v1109_v34  ;;  %v1341_v24 = vpop.f32.mrf.mxu1 }
 0x2aa   :  { %v1394_v14 = vadd.f32 %v1341_v24, %v1110_v62  ;;  %v3905_v24 = vld [vmem:[%s6024_s3 + $0x144] sm:$0xf] }
 0x2ab   :  { %v1447_v8 = vadd.f32 %v5175_v38, %v1393_v28  ;;  %v3906_v28 = vld [vmem:[%s6024_s3 + $0x144] sm:$0xf0] }
 0x2ac   :  { %v1448_v53 = vadd.f32 %v5179_v25, %v1394_v14  ;;  %v3388_v14 = vor.u32 %v3906_v28, %v3387_v43  ;;  %v3365_v43 = vld [vmem:[%s6024_s3 + $0x118] sm:$0xf0] }
 0x2ad   :  { %v1477_v48 = vmax.f32 %v1445_v9, %v1447_v8  ;;  %v3389_v9 = vld [vmem:[%s6024_s3 + $0x148] sm:$0xf0] }
 0x2ae   :  { %v1478_v32 = vmax.f32 %v1446_v11, %v1448_v53  ;;  %v3392_v53 = vor.u32 %v3905_v24, %v3389_v9  ;;  %1927 = vmatpush.bf16.msra.mxu2 %v3388_v14  ;;  %v6150_v24 = vld [vmem:[#allocation14_spill] sm:$0xff] }
 0x2b0   :  { %v1493_v20 = vmax.f32 %v1477_v48, %v1478_v32  ;;  %v1275_v26 = vpop.f32.mrf.mxu0  ;;  %1956 = vmatpush.bf16.msra.mxu3 %v3392_v53 }
 0x2b1   :  { %v1344_v57 = vpop.f32.mrf.mxu1  ;;  %v1395_v55 = vadd.f32 %v1275_v26, %v1111_v35  ;;  %v3904_v26 = vld [vmem:[%s6024_s3 + $0x134] sm:$0xf0]  ;;  %v1118_v35 = vadd.f32 %v6149_v33, %v6148_v61  ;;  %v3573_v61 = vld [vmem:[%s6024_s3 + $0x278] sm:$0xf0]  ;;  %v3563_v33 = vld [vmem:[%s6024_s3 + $0x260] sm:$0xf] }
 0x2b2   :  { %v1505_v36 = vmax.f32 %v1493_v20, 0.0  ;;  %v1396_v15 = vadd.f32 %v1344_v57, %v1112_v30  ;;  %v3379_v20 = vld [vmem:[%s6024_s3 + $0x130] sm:$0xf]  ;;  %v3373_v30 = vld [vmem:[%s6024_s3 + $0x128] sm:$0xf0] }
 0x2b3   :  { %v1449_v13 = vadd.f32 %v5175_v38, %v1395_v55  ;;  %v3380_v57 = vor.u32 %v3904_v26, %v3379_v20 }
 0x2b4   :  { %v1532_v60 = vpack.c.bf16 %v1505_v36, %v1504_v47  ;;  %v6142_v47 = vld [vmem:[#allocation9_spill] sm:$0xff]  ;;  %v1450_v52 = vadd.f32 %v5179_v25, %v1396_v15 }
 0x2b5   :  { %v1113_v4 = vadd.f32 %v6143_v42, %v6142_v47  ;;  %1928 = vmatpush.bf16.msra.mxu2 %v3380_v57  ;;  %v3376_v42 = vor.u32 %v3901_v18, %v3373_v30  ;;  %v3571_v57 = vld [vmem:[%s6024_s3 + $0x270] sm:$0xf] }
 0x2b6   :  { %1653 = vmatmul.bf16.gmra.mxu2 %v1532_v60  ;;  %1682 = vmatmul.bf16.gmra.mxu3 %v1532_v60 }
 0x2b7   :  { %2114 = vmatmul.bf16.gmra.mxu0 %v1532_v60  ;;  %2143 = vmatmul.bf16.gmra.mxu1 %v1532_v60  ;;  %v3902_v60 = vld [vmem:[%s6024_s3 + $0x124] sm:$0xf0] }
 0x2b8   :  { %v1277_v49 = vpop.f32.mrf.mxu0 }
 0x2b9   :  { %v1397_v34 = vadd.f32 %v1277_v49, %v1113_v4  ;;  %v1346_v40 = vpop.f32.mrf.mxu1 }
 0x2ba   :  { %v1398_v16 = vadd.f32 %v1346_v40, %v1114_v27 }
 0x2bb   :  { %v1451_v54 = vadd.f32 %v5175_v38, %v1397_v34  ;;  %v1003_v34 = vpop.f32.mrf.mxu2 }
 0x2bc   :  { %v1452_v62 = vadd.f32 %v5179_v25, %v1398_v16  ;;  %v1072_v16 = vpop.f32.mrf.mxu3 }
 0x2bd   :  { %v1479_v39 = vmax.f32 %v1449_v13, %v1451_v54  ;;  %v3363_v13 = vld [vmem:[%s6024_s3 + $0x110] sm:$0xf]  ;;  %v3900_v54 = vld [vmem:[%s6024_s3 + $0x114] sm:$0xf0]  ;;  %v1122_v28 = vadd.f32 %v1072_v16, %v5152_v45  ;;  %v3355_v45 = vld [vmem:[%s6024_s3 + $0x100] sm:$0xf] }
 0x2be   :  { %v1480_v0 = vmax.f32 %v1450_v52, %v1452_v62  ;;  %v3899_v52 = vld [vmem:[%s6024_s3 + $0x114] sm:$0xf]  ;;  %v1121_v62 = vadd.f32 %v1003_v34, %v5149_v21  ;;  %v3936_v34 = vld [vmem:[%s6024_s3 + $0x234] sm:$0xf0] }
 0x2c0   :  { %v1280_v8 = vpop.f32.mrf.mxu0  ;;  %v1494_v11 = vmax.f32 %v1479_v39, %v1480_v0  ;;  %v3364_v0 = vor.u32 %v3900_v54, %v3363_v13  ;;  %v3541_v13 = vld [vmem:[%s6024_s3 + $0x238] sm:$0xf0]  ;;  %v3934_v54 = vld [vmem:[%s6024_s3 + $0x224] sm:$0xf0] }
 0x2c1   :  { %v1349_v48 = vpop.f32.mrf.mxu1  ;;  %v1399_v5 = vadd.f32 %v1280_v8, %v1115_v22  ;;  %v3368_v8 = vor.u32 %v3899_v52, %v3365_v43  ;;  %v3898_v22 = vld [vmem:[%s6024_s3 + $0x104] sm:$0xf0] }
 0x2c2   :  { %v1506_v32 = vmax.f32 %v1494_v11, 0.0  ;;  %v1400_v23 = vadd.f32 %v1349_v48, %v1116_v59  ;;  %v3356_v20 = vor.u32 %v3898_v22, %v3355_v45  ;;  %v3929_v45 = vld [vmem:[%s6024_s3 + $0x204] sm:$0xf] }
 0x2c3   :  { %v1453_v4 = vadd.f32 %v5175_v38, %v1399_v5 }
 0x2c4   :  { %v5579_v29 = vpack.c.bf16 %v1506_v32, %v1505_v36  ;;  %v3371_v36 = vld [vmem:[%s6024_s3 + $0x120] sm:$0xf]  ;;  %v1454_v2 = vadd.f32 %v5179_v25, %v1400_v23 }
 0x2c5   :  { %v3372_v1 = vor.u32 %v3902_v60, %v3371_v36  ;;  %v3943_v36 = vld [vmem:[%s6024_s3 + $0x274] sm:$0xf] }
 0x2c6   :  { %1776 = vmatmul.bf16.vlgmr.msrb.gmra.mxu2 %v5278_v3  ;;  %1805 = vmatmul.bf16.vlgmr.msrb.gmra.mxu3 %v5278_v3  ;;  %v3381_v3 = vld [vmem:[%s6024_s3 + $0x138] sm:$0xf0]  ;;  %v3576_v23 = vor.u32 %v3943_v36, %v3573_v61 }
 0x2c7   :  { %v3384_v58 = vor.u32 %v3903_v19, %v3381_v3  ;;  %1929 = vmatpush.bf16.msra.mxu2 %v3372_v1  ;;  %v3944_v3 = vld [vmem:[%s6024_s3 + $0x274] sm:$0xf0]  ;;  %v3939_v1 = vld [vmem:[%s6024_s3 + $0x254] sm:$0xf] }
 0x2c8   :  { %v1282_v6 = vpop.f32.mrf.mxu0  ;;  %v3572_v60 = vor.u32 %v3944_v3, %v3571_v57 }
 0x2c9   :  { %v1401_v41 = vadd.f32 %v1282_v6, %v1117_v56  ;;  %v1351_v50 = vpop.f32.mrf.mxu1  ;;  %1957 = vmatpush.bf16.msra.mxu3 %v3384_v58  ;;  %v3941_v6 = vld [vmem:[%s6024_s3 + $0x264] sm:$0xf]  ;;  %v3565_v58 = vld [vmem:[%s6024_s3 + $0x268] sm:$0xf0] }
 0x2ca   :  { %v1402_v47 = vadd.f32 %v1351_v50, %v1118_v35  ;;  %v3942_v35 = vld [vmem:[%s6024_s3 + $0x264] sm:$0xf0]  ;;  %v3568_v30 = vor.u32 %v3941_v6, %v3565_v58  ;;  %v3940_v50 = vld [vmem:[%s6024_s3 + $0x254] sm:$0xf0] }
 0x2cb   :  { %v1455_v55 = vadd.f32 %v5175_v38, %v1401_v41  ;;  %1930 = vmatpush.bf16.msra.mxu2 %v3364_v0  ;;  %v3564_v18 = vor.u32 %v3942_v35, %v3563_v33  ;;  %v3555_v41 = vld [vmem:[%s6024_s3 + $0x250] sm:$0xf] }
 0x2cc   :  { %v1456_v44 = vadd.f32 %v5179_v25, %v1402_v47  ;;  %v3556_v47 = vor.u32 %v3940_v50, %v3555_v41 }
 0x2cd   :  { %v1481_v51 = vmax.f32 %v1453_v4, %v1455_v55  ;;  %1958 = vmatpush.bf16.msra.mxu3 %v3376_v42  ;;  %v3557_v42 = vld [vmem:[%s6024_s3 + $0x258] sm:$0xf0]  ;;  %v3547_v55 = vld [vmem:[%s6024_s3 + $0x240] sm:$0xf] }
 0x2ce   :  { %v1482_v31 = vmax.f32 %v1454_v2, %v1456_v44  ;;  %v3560_v4 = vor.u32 %v3939_v1, %v3557_v42  ;;  %v3938_v2 = vld [vmem:[%s6024_s3 + $0x244] sm:$0xf0]  ;;  %v3937_v44 = vld [vmem:[%s6024_s3 + $0x244] sm:$0xf] }
 0x2cf   :  { %1931 = vmatpush.bf16.msra.mxu2 %v3356_v20 }
 0x2d0   :  { %v1285_v27 = vpop.f32.mrf.mxu0  ;;  %v1495_v15 = vmax.f32 %v1481_v51, %v1482_v31  ;;  %v3548_v51 = vor.u32 %v3938_v2, %v3547_v55  ;;  %v3549_v31 = vld [vmem:[%s6024_s3 + $0x248] sm:$0xf0] }
 0x2d1   :  { %v1354_v49 = vpop.f32.mrf.mxu1  ;;  %v1403_v39 = vadd.f32 %v1285_v27, %v5144_v17  ;;  %1959 = vmatpush.bf16.msra.mxu3 %v3368_v8  ;;  %v3552_v27 = vor.u32 %v3937_v44, %v3549_v31  ;;  %v3523_v8 = vld [vmem:[%s6024_s3 + $0x210] sm:$0xf] }
 0x2d2   :  { %v1507_v10 = vmax.f32 %v1495_v15, 0.0  ;;  %v1404_v14 = vadd.f32 %v1354_v49, %v6150_v24 }
 0x2d3   :  { %v1457_v21 = vadd.f32 %v5175_v38, %v1403_v39  ;;  %2268 = vmatpush.bf16.msrb.mxu2 %v3572_v60  ;;  %v3533_v39 = vld [vmem:[%s6024_s3 + $0x228] sm:$0xf0] }
 0x2d4   :  { %v1998_v40 = vpack.c.bf16 %v1507_v10, %v1506_v32  ;;  %v1458_v32 = vadd.f32 %v5179_v25, %v1404_v14 }
 0x2d6   :  { %1781 = vmatmul.bf16.gmra.mxu2 %v5366_v63  ;;  %1810 = vmatmul.bf16.gmra.mxu3 %v5366_v63 }
 0x2d7   :  { %2119 = vmatmul.bf16.gmra.mxu0 %v1998_v40  ;;  %2148 = vmatmul.bf16.gmra.mxu1 %v1998_v40  ;;  %v3935_v40 = vld [vmem:[%s6024_s3 + $0x234] sm:$0xf] }
 0x2d8   :  { %v1287_v9 = vpop.f32.mrf.mxu0  ;;  %2269 = vmatpush.bf16.msrb.mxu2 %v3564_v18  ;;  %v3544_v52 = vor.u32 %v3935_v40, %v3541_v13 }
 0x2d9   :  { %v1405_v11 = vadd.f32 %v1287_v9, %v1121_v62  ;;  %v1356_v53 = vpop.f32.mrf.mxu1  ;;  %v5707_v15 = vpop.f32.mrf.mxu2  ;;  %v3933_v62 = vld [vmem:[%s6024_s3 + $0x224] sm:$0xf] }
 0x2da   :  { %v1406_v48 = vadd.f32 %v1356_v53, %v1122_v28  ;;  %v5709_v49 = vpop.f32.mrf.mxu3  ;;  %v3536_v43 = vor.u32 %v3933_v62, %v3533_v39  ;;  %v3931_v53 = vld [vmem:[%s6024_s3 + $0x214] sm:$0xf] }
 0x2db   :  { %v1459_v17 = vadd.f32 %v5175_v38, %v1405_v11  ;;  %v3357_v38 = vld [vmem:[%s6024_s3 + $0x108] sm:$0xf0]  ;;  %v3932_v11 = vld [vmem:[%s6024_s3 + $0x214] sm:$0xf0] }
 0x2dc   :  { %v1460_v7 = vadd.f32 %v5179_v25, %v1406_v48  ;;  %v3360_v25 = vor.u32 %v3897_v37, %v3357_v38  ;;  %2270 = vmatpush.bf16.msrb.mxu2 %v3556_v47  ;;  %v3524_v48 = vor.u32 %v3932_v11, %v3523_v8  ;;  %v3517_v37 = vld [vmem:[%s6024_s3 + $0x208] sm:$0xf0] }
 0x2dd   :  { %v1483_v59 = vmax.f32 %v1457_v21, %v1459_v17  ;;  %v3525_v21 = vld [vmem:[%s6024_s3 + $0x218] sm:$0xf0] }
 0x2de   :  { %v1484_v26 = vmax.f32 %v1458_v32, %v1460_v7  ;;  %1960 = vmatpush.bf16.msra.mxu3 %v3360_v25  ;;  %v3528_v17 = vor.u32 %v3931_v53, %v3525_v21  ;;  %v3515_v32 = vld [vmem:[%s6024_s3 + $0x200] sm:$0xf]  ;;  %v3930_v7 = vld [vmem:[%s6024_s3 + $0x204] sm:$0xf0] }
 0x2df   :  { %v3516_v22 = vor.u32 %v3930_v7, %v3515_v32  ;;  %v3949_v7 = vld [vmem:[%s6026_s5 + $0x20] sm:$0xff] }
 0x2e0   :  { %v1496_v19 = vmax.f32 %v1483_v59, %v1484_v26  ;;  %2271 = vmatpush.bf16.msrb.mxu2 %v3548_v51  ;;  %v3520_v59 = vor.u32 %v3929_v45, %v3517_v37  ;;  %v3968_v45 = vld [vmem:[%s6026_s5 + $0xb8] sm:$0xff] }
 0x2e1   :  { %v5737_v28 = vpop.f32.mrf.mxu2  ;;  %v3960_v37 = vld [vmem:[%s6026_s5 + $0x78] sm:$0xff] }
 0x2e2   :  { %v1508_v56 = vmax.f32 %v1496_v19, 0.0  ;;  %2297 = vmatpush.bf16.msrb.mxu3 %v3576_v23  ;;  %v5739_v24 = vpop.f32.mrf.mxu3  ;;  %2463 = vmatpush.bf16.msra.mxu0 %v3960_v37 }
 0x2e4   :  { %v5653_v5 = vpack.c.bf16 %v1508_v56, %v1507_v10  ;;  %v3539_v10 = vld [vmem:[%s6024_s3 + $0x230] sm:$0xf] }
 0x2e5   :  { %v3540_v16 = vor.u32 %v3936_v34, %v3539_v10 }
 0x2e6   :  { %1786 = vmatmul.bf16.gmra.mxu2 %v5419_v46  ;;  %1815 = vmatmul.bf16.gmra.mxu3 %v5419_v46 }
 0x2e7   :  { %2298 = vmatpush.bf16.msrb.mxu3 %v3568_v30  ;;  %2272 = vmatpush.bf16.msrb.mxu2 %v3540_v16 }
 0x2eb   :  { %2299 = vmatpush.bf16.msrb.mxu3 %v3560_v4 }
 0x2ef   :  { %2300 = vmatpush.bf16.msrb.mxu3 %v3552_v27 }
 0x2f3   :  { %2301 = vmatpush.bf16.msrb.mxu3 %v3544_v52 }
 0x2f6   :  { %1791 = vmatmul.bf16.gmra.mxu2 %v5505_v12  ;;  %1820 = vmatmul.bf16.gmra.mxu3 %v5505_v12 }
 0x2f7   :  { %2302 = vmatpush.bf16.msrb.mxu3 %v3536_v43 }
 0x2f9   :  { %v5741_v14 = vpop.f32.mrf.mxu2  ;;  %v5743_v9 = vpop.f32.mrf.mxu3 }
 0x2fb   :  { %2303 = vmatpush.bf16.msrb.mxu3 %v3528_v17 }
 0x2ff   :  { %2304 = vmatpush.bf16.msrb.mxu3 %v3520_v59  ;;  %v3948_v59 = vld [vmem:[%s6026_s5 + $0x18] sm:$0xff] }
 0x301   :  { %v5771_v20 = vpop.f32.mrf.mxu2  ;;  %v5773_v38 = vpop.f32.mrf.mxu3 }
 0x306   :  { %1932 = vmatmul.bf16.vlgmr.msra.gmra.mxu2 %v5366_v63  ;;  %1961 = vmatmul.bf16.vlgmr.msra.gmra.mxu3 %v5366_v63  ;;  %v3531_v63 = vld [vmem:[%s6024_s3 + $0x220] sm:$0xf] }
 0x307   :  { %v3532_v0 = vor.u32 %v3934_v54, %v3531_v63 }
 0x309   :  { %2273 = vmatpush.bf16.msrb.mxu2 %v3532_v0 }
 0x30d   :  { %2274 = vmatpush.bf16.msrb.mxu2 %v3524_v48 }
 0x311   :  { %2275 = vmatpush.bf16.msrb.mxu2 %v3516_v22  ;;  %v3976_v22 = vld [vmem:[%s6026_s5 + $0xf8] sm:$0xff] }
 0x312   :  { %2683 = vmatpush.bf16.msra.mxu3 %v3976_v22 }
 0x315   :  { %2603 = vmatpush.bf16.msra.mxu2 %v3968_v45 }
 0x316   :  { %1937 = vmatmul.bf16.gmra.mxu2 %v5419_v46  ;;  %1966 = vmatmul.bf16.gmra.mxu3 %v5419_v46 }
 0x319   :  { %v1649_v26 = vpop.f32.mrf.mxu2  ;;  %v1678_v25 = vpop.f32.mrf.mxu3 }
 0x321   :  { %v1651_v19 = vpop.f32.mrf.mxu2  ;;  %v1680_v56 = vpop.f32.mrf.mxu3 }
 0x326   :  { %1942 = vmatmul.bf16.gmra.mxu2 %v5505_v12  ;;  %1971 = vmatmul.bf16.gmra.mxu3 %v5505_v12 }
 0x336   :  { %1947 = vmatmul.bf16.gmra.mxu2 %v5579_v29  ;;  %1976 = vmatmul.bf16.gmra.mxu3 %v5579_v29 }
 0x339   :  { %v1654_v57 = vpop.f32.mrf.mxu2  ;;  %v1683_v3 = vpop.f32.mrf.mxu3 }
 0x341   :  { %v1656_v36 = vpop.f32.mrf.mxu2  ;;  %v1685_v60 = vpop.f32.mrf.mxu3 }
 0x346   :  { %2276 = vmatmul.bf16.vlgmr.msrb.gmra.mxu2 %v5419_v46  ;;  %2305 = vmatmul.bf16.vlgmr.msrb.gmra.mxu3 %v5419_v46 }
 0x349   :  { %v1777_v61 = vpop.f32.mrf.mxu2  ;;  %v1806_v33 = vpop.f32.mrf.mxu3 }
 0x34a   :  { %v1778_v27 = vadd.f32 %v1777_v61, %v5707_v15  ;;  %v1807_v10 = vadd.f32 %v1806_v33, %v5709_v49  ;;  %v3952_v49 = vld [vmem:[%s6026_s5 + $0x38] sm:$0xff] }
 0x34b   :  { %2524 = vmatpush.bf16.msra.mxu1 %v3952_v49  ;;  %v3953_v49 = vld [vmem:[%s6026_s5 + $0x40] sm:$0xff] }
 0x351   :  { %v5781_v35 = vpop.f32.mrf.mxu2  ;;  %v5783_v23 = vpop.f32.mrf.mxu3 }
 0x356   :  { %2281 = vmatmul.bf16.gmra.mxu2 %v5505_v12  ;;  %2310 = vmatmul.bf16.gmra.mxu3 %v5505_v12 }
 0x359   :  { %v1782_v6 = vpop.f32.mrf.mxu2  ;;  %v1811_v58 = vpop.f32.mrf.mxu3 }
 0x35a   :  { %v1783_v54 = vadd.f32 %v1782_v6, %v5741_v14  ;;  %v1812_v52 = vadd.f32 %v1811_v58, %v5743_v9  ;;  %v3951_v14 = vld [vmem:[%s6026_s5 + $0x30] sm:$0xff]  ;;  %v3950_v9 = vld [vmem:[%s6026_s5 + $0x28] sm:$0xff]  ;;  %v3957_v6 = vld [vmem:[%s6026_s5 + $0x60] sm:$0xff] }
 0x35b   :  { %2525 = vmatpush.bf16.msra.mxu1 %v3951_v14  ;;  %v3945_v58 = vld [vmem:[%s6026_s5] sm:$0xff] }
 0x35f   :  { %2526 = vmatpush.bf16.msra.mxu1 %v3950_v9 }
 0x361   :  { %v5787_v18 = vpop.f32.mrf.mxu2  ;;  %v5789_v30 = vpop.f32.mrf.mxu3 }
 0x363   :  { %2527 = vmatpush.bf16.msra.mxu1 %v3949_v7 }
 0x366   :  { %2286 = vmatmul.bf16.gmra.mxu2 %v5579_v29  ;;  %2315 = vmatmul.bf16.gmra.mxu3 %v5579_v29 }
 0x367   :  { %2528 = vmatpush.bf16.msra.mxu1 %v3948_v59 }
 0x369   :  { %v1787_v46 = vpop.f32.mrf.mxu2  ;;  %v1816_v41 = vpop.f32.mrf.mxu3 }
 0x36a   :  { %v1788_v11 = vadd.f32 %v1787_v46, %v1649_v26  ;;  %v1817_v53 = vadd.f32 %v1816_v41, %v1678_v25  ;;  %v3967_v46 = vld [vmem:[%s6026_s5 + $0xb0] sm:$0xff] }
 0x36b   :  { %v3975_v41 = vld [vmem:[%s6026_s5 + $0xf0] sm:$0xff]  ;;  %2604 = vmatpush.bf16.msra.mxu2 %v3967_v46  ;;  %v3962_v46 = vld [vmem:[%s6026_s5 + $0x88] sm:$0xff] }
 0x36c   :  { %2684 = vmatpush.bf16.msra.mxu3 %v3975_v41 }
 0x371   :  { %v1789_v50 = vpop.f32.mrf.mxu2  ;;  %v1818_v1 = vpop.f32.mrf.mxu3 }
 0x372   :  { %v5793_v47 = vadd.f32 %v1789_v50, %v1651_v19  ;;  %v5795_v42 = vadd.f32 %v1818_v1, %v1680_v56  ;;  %v3959_v19 = vld [vmem:[%s6026_s5 + $0x70] sm:$0xff]  ;;  %v2105_v50 = vpop.f32.mrf.mxu0  ;;  %v2134_v1 = vpop.f32.mrf.mxu1 }
 0x373   :  { %v3947_v56 = vld [vmem:[%s6026_s5 + $0x10] sm:$0xff]  ;;  %2464 = vmatpush.bf16.msra.mxu0 %v3959_v19 }
 0x374   :  { %2529 = vmatpush.bf16.msra.mxu1 %v3947_v56  ;;  %v3963_v56 = vld [vmem:[%s6026_s5 + $0x90] sm:$0xff] }
 0x376   :  { %2291 = vmatmul.bf16.gmra.mxu2 %v5653_v5  ;;  %2320 = vmatmul.bf16.gmra.mxu3 %v5653_v5 }
 0x379   :  { %v1792_v12 = vpop.f32.mrf.mxu2  ;;  %v1821_v4 = vpop.f32.mrf.mxu3 }
 0x37a   :  { %v1793_v55 = vadd.f32 %v1792_v12, %v1654_v57  ;;  %v1822_v2 = vadd.f32 %v1821_v4, %v1683_v3  ;;  %v3958_v57 = vld [vmem:[%s6026_s5 + $0x68] sm:$0xff] }
 0x37b   :  { %v3946_v3 = vld [vmem:[%s6026_s5 + $0x8] sm:$0xff]  ;;  %2465 = vmatpush.bf16.msra.mxu0 %v3958_v57 }
 0x37c   :  { %2530 = vmatpush.bf16.msra.mxu1 %v3946_v3  ;;  %v3966_v12 = vld [vmem:[%s6026_s5 + $0xa8] sm:$0xff] }
 0x37d   :  { %v3974_v4 = vld [vmem:[%s6026_s5 + $0xe8] sm:$0xff]  ;;  %2605 = vmatpush.bf16.msra.mxu2 %v3966_v12  ;;  %v1785_v12 = vadd.f32 %v5787_v18, %v5771_v20 }
 0x37e   :  { %2685 = vmatpush.bf16.msra.mxu3 %v3974_v4  ;;  %v1814_v4 = vadd.f32 %v5789_v30, %v5773_v38  ;;  %v3970_v18 = vld [vmem:[%s6026_s5 + $0xc8] sm:$0xff] }
 0x37f   :  { %2466 = vmatpush.bf16.msra.mxu0 %v3957_v6 }
 0x380   :  { %2531 = vmatpush.bf16.msra.mxu1 %v3945_v58 }
 0x381   :  { %v1794_v44 = vpop.f32.mrf.mxu2  ;;  %v1823_v51 = vpop.f32.mrf.mxu3 }
 0x382   :  { %v5799_v31 = vadd.f32 %v1794_v44, %v1656_v36  ;;  %v5801_v29 = vadd.f32 %v1823_v51, %v1685_v60  ;;  %v3955_v51 = vld [vmem:[%s6026_s5 + $0x50] sm:$0xff] }
 0x389   :  { %v1933_v34 = vpop.f32.mrf.mxu2  ;;  %v1962_v40 = vpop.f32.mrf.mxu3 }
 0x38a   :  { %v5805_v16 = vadd.f32 %v1933_v34, %v1778_v27  ;;  %v5807_v13 = vadd.f32 %v1962_v40, %v1807_v10  ;;  %v3954_v27 = vld [vmem:[%s6026_s5 + $0x48] sm:$0xff]  ;;  %v2107_v10 = vpop.f32.mrf.mxu0  ;;  %v2136_v34 = vpop.f32.mrf.mxu1  ;;  %v1780_v40 = vadd.f32 %v5781_v35, %v5737_v28  ;;  %v3973_v28 = vld [vmem:[%s6026_s5 + $0xe0] sm:$0xff] }
 0x38b   :  { %v2342_v35 = vld [vmem:[%s6027_s4] sm:$0x3]  ;;  %2686 = vmatpush.bf16.msra.mxu3 %v3973_v28 }
 0x38c   :  { %v5928_v45 = vperm.slane %v2342_v35, 0  ;;  %v5930_v37 = vperm.slane %v2342_v35, 1 }
 0x391   :  { %v5809_v5 = vpop.f32.mrf.mxu2  ;;  %v5811_v63 = vpop.f32.mrf.mxu3 }
 0x392   :  { %v1984_v14 = vadd.f32 %v5809_v5, %v1780_v40  ;;  %v2155_v5 = vadd.f32 %v2134_v1, %v5807_v13 }
 0x399   :  { %v1938_v62 = vpop.f32.mrf.mxu2  ;;  %v1967_v39 = vpop.f32.mrf.mxu3 }
 0x39a   :  { %v5815_v0 = vadd.f32 %v1938_v62, %v1783_v54  ;;  %v5817_v15 = vadd.f32 %v1967_v39, %v1812_v52  ;;  %v1809_v54 = vadd.f32 %v5783_v23, %v5739_v24  ;;  %v3965_v39 = vld [vmem:[%s6026_s5 + $0xa0] sm:$0xff]  ;;  %v3964_v24 = vld [vmem:[%s6026_s5 + $0x98] sm:$0xff]  ;;  %v2154_v23 = vadd.f32 %v2105_v50, %v5805_v16 }
 0x39b   :  { %2606 = vmatpush.bf16.msra.mxu2 %v3965_v39 }
 0x39c   :  { %v1985_v9 = vadd.f32 %v5811_v63, %v1809_v54  ;;  %v3972_v63 = vld [vmem:[%s6026_s5 + $0xd8] sm:$0xff] }
 0x39d   :  { %2687 = vmatpush.bf16.msra.mxu3 %v3972_v63 }
 0x39f   :  { %2607 = vmatpush.bf16.msra.mxu2 %v3964_v24 }
 0x3a1   :  { %v5822_v43 = vpop.f32.mrf.mxu2  ;;  %v5824_v8 = vpop.f32.mrf.mxu3 }
 0x3a2   :  { %v1989_v40 = vadd.f32 %v5824_v8, %v1814_v4 }
 0x3a3   :  { %2608 = vmatpush.bf16.msra.mxu2 %v3963_v56 }
 0x3a7   :  { %2609 = vmatpush.bf16.msra.mxu2 %v3962_v46 }
 0x3a9   :  { %v1943_v48 = vpop.f32.mrf.mxu2  ;;  %v1972_v21 = vpop.f32.mrf.mxu3 }
 0x3aa   :  { %v5832_v17 = vadd.f32 %v1943_v48, %v1788_v11  ;;  %v5834_v32 = vadd.f32 %v1972_v21, %v1817_v53  ;;  %v2156_v11 = vadd.f32 %v2107_v10, %v1984_v14  ;;  %v2157_v53 = vadd.f32 %v2136_v34, %v1985_v9  ;;  %v2110_v48 = vpop.f32.mrf.mxu0  ;;  %v2139_v21 = vpop.f32.mrf.mxu1 }
 0x3ab   :  { %v1988_v34 = vadd.f32 %v5822_v43, %v1785_v12  ;;  %v2158_v20 = vadd.f32 %v2110_v48, %v5815_v0  ;;  %v2159_v38 = vadd.f32 %v2139_v21, %v5817_v15 }
 0x3b1   :  { %v5851_v26 = vpop.f32.mrf.mxu2  ;;  %v5853_v25 = vpop.f32.mrf.mxu3 }
 0x3b2   :  { %v2141_v10 = vpop.f32.mrf.mxu1 }
 0x3b3   :  { %v2161_v8 = vadd.f32 %v2141_v10, %v1989_v40 }
 0x3b9   :  { %v1948_v36 = vpop.f32.mrf.mxu2  ;;  %v1977_v60 = vpop.f32.mrf.mxu3 }
 0x3ba   :  { %v5867_v61 = vadd.f32 %v1948_v36, %v1793_v55  ;;  %v5869_v33 = vadd.f32 %v1977_v60, %v1822_v2  ;;  %v3956_v55 = vld [vmem:[%s6026_s5 + $0x58] sm:$0xff]  ;;  %v2144_v24 = vpop.f32.mrf.mxu1 }
 0x3bb   :  { %2467 = vmatpush.bf16.msra.mxu0 %v3956_v55 }
 0x3bf   :  { %2468 = vmatpush.bf16.msra.mxu0 %v3955_v51  ;;  %v3961_v51 = vld [vmem:[%s6026_s5 + $0x80] sm:$0xff] }
 0x3c0   :  { %2610 = vmatpush.bf16.msra.mxu2 %v3961_v51 }
 0x3c1   :  { %v5892_v2 = vpop.f32.mrf.mxu2  ;;  %v5894_v44 = vpop.f32.mrf.mxu3 }
 0x3c2   :  { %v1996_v10 = vadd.f32 %v5892_v2, %v5799_v31 }
 0x3c3   :  { %2469 = vmatpush.bf16.msra.mxu0 %v3954_v27  ;;  %v2112_v27 = vpop.f32.mrf.mxu0 }
 0x3c7   :  { %2470 = vmatpush.bf16.msra.mxu0 %v3953_v49 }
 0x3c9   :  { %v2277_v52 = vpop.f32.mrf.mxu2  ;;  %v2306_v62 = vpop.f32.mrf.mxu3 }
 0x3ca   :  { %v2326_v7 = vadd.f32 %v2277_v52, %v2154_v23  ;;  %v2327_v22 = vadd.f32 %v2306_v62, %v2155_v5  ;;  %v3971_v52 = vld [vmem:[%s6026_s5 + $0xd0] sm:$0xff]  ;;  %v2160_v62 = vadd.f32 %v2112_v27, %v1988_v34  ;;  %v1997_v34 = vadd.f32 %v5894_v44, %v5801_v29 }
 0x3cb   :  { %2688 = vmatpush.bf16.msra.mxu3 %v3971_v52  ;;  %v2115_v28 = vpop.f32.mrf.mxu0 }
 0x3cc   :  { %v2348_v57 = vadd.f32 %v5928_v45, %v2326_v7  ;;  %v2349_v3 = vadd.f32 %v5930_v37, %v2327_v22  ;;  %v3969_v7 = vld [vmem:[%s6026_s5 + $0xc0] sm:$0xff]  ;;  %v1992_v22 = vadd.f32 %v5851_v26, %v5793_v47  ;;  %v2162_v56 = vadd.f32 %v2115_v28, %v5832_v17 }
 0x3cf   :  { %2689 = vmatpush.bf16.msra.mxu3 %v3970_v18 }
 0x3d1   :  { %v2279_v59 = vpop.f32.mrf.mxu2  ;;  %v2308_v16 = vpop.f32.mrf.mxu3 }
 0x3d2   :  { %v2328_v19 = vadd.f32 %v2279_v59, %v2156_v11  ;;  %v2329_v13 = vadd.f32 %v2308_v16, %v2157_v53  ;;  %v1993_v59 = vadd.f32 %v5853_v25, %v5795_v42 }
 0x3d3   :  { %2690 = vmatpush.bf16.msra.mxu3 %v3969_v7 }
 0x3d4   :  { %v2350_v36 = vadd.f32 %v5928_v45, %v2328_v19  ;;  %v2351_v60 = vadd.f32 %v5930_v37, %v2329_v13  ;;  %v2117_v19 = vpop.f32.mrf.mxu0  ;;  %v2146_v13 = vpop.f32.mrf.mxu1 }
 0x3d6   :  { %v2364_v6 = vmax.f32 %v2348_v57, %v2350_v36  ;;  %v2365_v58 = vmax.f32 %v2349_v3, %v2351_v60  ;;  %v2163_v57 = vadd.f32 %v2144_v24, %v5834_v32  ;;  %v2164_v60 = vadd.f32 %v2117_v19, %v1992_v22  ;;  %v3985_v19 = vld [vmem:[%s6028_s6] ss:$0 sm:$0xff] }
 0x3d8   :  { %v2372_v41 = vmax.f32 %v2364_v6, %v2365_v58  ;;  %v2165_v6 = vadd.f32 %v2146_v13, %v1993_v59 }
 0x3d9   :  { %v2282_v50 = vpop.f32.mrf.mxu2  ;;  %v2311_v1 = vpop.f32.mrf.mxu3 }
 0x3da   :  { %v2376_v55 = vmax.f32 %v2372_v41, 0.0  ;;  %v2330_v30 = vadd.f32 %v2282_v50, %v2158_v20  ;;  %v2331_v43 = vadd.f32 %v2311_v1, %v2159_v38 }
 0x3dc   :  { %v2380_v54 = vpack.c.bf16 %v2376_v55, %v2376_v55  ;;  %v2352_v0 = vadd.f32 %v5928_v45, %v2330_v30  ;;  %v2353_v15 = vadd.f32 %v5930_v37, %v2331_v43  ;;  %v2120_v17 = vpop.f32.mrf.mxu0  ;;  %v2149_v1 = vpop.f32.mrf.mxu1 }
 0x3dd   :  { %v2167_v52 = vadd.f32 %v2149_v1, %v5869_v33 }
 0x3de   :  { %2532 = vmatmul.bf16.vlgmr.msra.gmra.mxu1 %v2380_v54  ;;  %v2166_v54 = vadd.f32 %v2120_v17, %v5867_v61 }
 0x3e1   :  { %v2284_v39 = vpop.f32.mrf.mxu2  ;;  %v2313_v49 = vpop.f32.mrf.mxu3 }
 0x3e2   :  { %v2332_v14 = vadd.f32 %v2284_v39, %v2160_v62  ;;  %v2333_v9 = vadd.f32 %v2313_v49, %v2161_v8 }
 0x3e4   :  { %v2354_v35 = vadd.f32 %v5928_v45, %v2332_v14  ;;  %v2355_v23 = vadd.f32 %v5930_v37, %v2333_v9  ;;  %v2122_v20 = vpop.f32.mrf.mxu0  ;;  %v2151_v38 = vpop.f32.mrf.mxu1 }
 0x3e5   :  { %v2168_v43 = vadd.f32 %v2122_v20, %v1996_v10  ;;  %v2169_v62 = vadd.f32 %v2151_v38, %v1997_v34 }
 0x3e6   :  { %v2366_v5 = vmax.f32 %v2352_v0, %v2354_v35  ;;  %v2367_v63 = vmax.f32 %v2353_v15, %v2355_v23  ;;  %v3984_v0 = vld [vmem:[%s6030_s7 + $0x38] sm:$0xff]  ;;  %v3983_v15 = vld [vmem:[%s6030_s7 + $0x30] sm:$0xff]  ;;  %v3981_v23 = vld [vmem:[%s6030_s7 + $0x20] sm:$0xff] }
 0x3e7   :  { %2773 = vmatpush.bf16.msrb.mxu0 %v3984_v0 }
 0x3e8   :  { %v2373_v11 = vmax.f32 %v2366_v5, %v2367_v63  ;;  %v3980_v5 = vld [vmem:[%s6030_s7 + $0x18] sm:$0xff] }
 0x3e9   :  { %v2287_v53 = vpop.f32.mrf.mxu2  ;;  %v2316_v48 = vpop.f32.mrf.mxu3 }
 0x3ea   :  { %v2377_v21 = vmax.f32 %v2373_v11, 0.0  ;;  %v2334_v3 = vadd.f32 %v2287_v53, %v2162_v56  ;;  %v2335_v36 = vadd.f32 %v2316_v48, %v2163_v57  ;;  %v3979_v11 = vld [vmem:[%s6030_s7 + $0x10] sm:$0xff]  ;;  %v3978_v53 = vld [vmem:[%s6030_s7 + $0x8] sm:$0xff] }
 0x3eb   :  { %2774 = vmatpush.bf16.msrb.mxu0 %v3983_v15 }
 0x3ec   :  { %v2397_v16 = vpack.c.bf16 %v2377_v21, %v2377_v21  ;;  %v2356_v26 = vadd.f32 %v5928_v45, %v2334_v3  ;;  %v2357_v42 = vadd.f32 %v5930_v37, %v2335_v36  ;;  %v3977_v21 = vld [vmem:[%s6030_s7] sm:$0xff] }
 0x3ee   :  { %2471 = vmatmul.bf16.vlgmr.msra.gmra.mxu0 %v2397_v16 }
 0x3f1   :  { %v2289_v58 = vpop.f32.mrf.mxu2  ;;  %v2318_v46 = vpop.f32.mrf.mxu3 }
 0x3f2   :  { %v2336_v41 = vadd.f32 %v2289_v58, %v2164_v60  ;;  %v2337_v47 = vadd.f32 %v2318_v46, %v2165_v6  ;;  %v2786_v6 = vlaneseq  ;;  %v3986_v46 = vld [vmem:[%s6029_s8] ss:$0 sm:$0xff] }
 0x3f4   :  { %v2358_v25 = vadd.f32 %v5928_v45, %v2336_v41  ;;  %v2359_v50 = vadd.f32 %v5930_v37, %v2337_v47  ;;  %v2787_v58 = vand.u32 127, %v2786_v6 }
 0x3f6   :  { %v2368_v32 = vmax.f32 %v2356_v26, %v2358_v25  ;;  %v2369_v12 = vmax.f32 %v2357_v42, %v2359_v50  ;;  %vm2788_vm0 = vcmp.lt.s32.totalorder %v2787_v58, 10 }
 0x3f8   :  { %v2374_v4 = vmax.f32 %v2368_v32, %v2369_v12 }
 0x3f9   :  { %v2292_v55 = vpop.f32.mrf.mxu2  ;;  %v2321_v51 = vpop.f32.mrf.mxu3 }
 0x3fa   :  { %v2378_v27 = vmax.f32 %v2374_v4, 0.0  ;;  %v2338_v18 = vadd.f32 %v2292_v55, %v2166_v54  ;;  %v2339_v30 = vadd.f32 %v2321_v51, %v2167_v52 }
 0x3fc   :  { %v2537_v40 = vpack.c.bf16 %v2378_v27, %v2378_v27  ;;  %v2360_v31 = vadd.f32 %v5928_v45, %v2338_v18  ;;  %v2361_v29 = vadd.f32 %v5930_v37, %v2339_v30 }
 0x3fe   :  { %2611 = vmatmul.bf16.vlgmr.msra.gmra.mxu2 %v2537_v40 }
 0x401   :  { %v2294_v8 = vpop.f32.mrf.mxu2  ;;  %v2323_v39 = vpop.f32.mrf.mxu3 }
 0x402   :  { %v2340_v49 = vadd.f32 %v2294_v8, %v2168_v43  ;;  %v2341_v14 = vadd.f32 %v2323_v39, %v2169_v62 }
 0x404   :  { %v2362_v2 = vadd.f32 %v5928_v45, %v2340_v49  ;;  %v2363_v61 = vadd.f32 %v5930_v37, %v2341_v14  ;;  %v3982_v45 = vld [vmem:[%s6030_s7 + $0x28] sm:$0xff] }
 0x405   :  { %2775 = vmatpush.bf16.msrb.mxu0 %v3982_v45 }
 0x406   :  { %v2370_v33 = vmax.f32 %v2360_v31, %v2362_v2  ;;  %v2371_v44 = vmax.f32 %v2361_v29, %v2363_v61 }
 0x408   :  { %v2375_v9 = vmax.f32 %v2370_v33, %v2371_v44 }
 0x409   :  { %2776 = vmatpush.bf16.msrb.mxu0 %v3981_v23 }
 0x40a   :  { %v2379_v28 = vmax.f32 %v2375_v9, 0.0 }
 0x40c   :  { %v2617_v24 = vpack.c.bf16 %v2379_v28, %v2379_v28 }
 0x40d   :  { %2777 = vmatpush.bf16.msrb.mxu0 %v3980_v5 }
 0x40e   :  { %2691 = vmatmul.bf16.vlgmr.msra.gmra.mxu3 %v2617_v24 }
 0x411   :  { %2778 = vmatpush.bf16.msrb.mxu0 %v3979_v11 }
 0x415   :  { %2779 = vmatpush.bf16.msrb.mxu0 %v3978_v53 }
 0x419   :  { %2780 = vmatpush.bf16.msrb.mxu0 %v3977_v21 }
 0x45b   :  { %v2533_v35 = vpop.f32.mrf.mxu1 }
 0x463   :  { %v2535_v37 = vpop.f32.mrf.mxu1 }
 0x46b   :  { %v2472_v63 = vpop.f32.mrf.mxu0 }
 0x46c   :  { %v2534_v59 = vadd.f32 %v2533_v35, %v2472_v63 }
 0x473   :  { %v2474_v48 = vpop.f32.mrf.mxu0 }
 0x481   :  { %v2612_v7 = vpop.f32.mrf.mxu2 }
 0x482   :  { %v2616_v16 = vadd.f32 %v2612_v7, %v2534_v59 }
 0x489   :  { %v2614_v22 = vpop.f32.mrf.mxu2 }
 0x491   :  { %v2692_v13 = vpop.f32.mrf.mxu3 }
 0x492   :  { %v2696_v56 = vadd.f32 %v2692_v13, %v2616_v16 }
 0x494   :  { %v2701_v57 = vadd.f32 %v3985_v19, %v2696_v56 }
 0x496   :  { %v2702_v3 = vmax.f32 %v2701_v57, 0.0 }
 0x498   :  { %2703 = vst [vmem:[%s6031_s9] sm:$0xff] %v2702_v3  ;;  %v2704_v36 = vpack.c.bf16 %v2702_v3, %v2702_v3 }
 0x499   :  { %v2694_v60 = vpop.f32.mrf.mxu3 }
 0x49a   :  { %2781 = vmatmul.bf16.vlgmr.msrb.gmra.mxu0 %v2704_v36 }
 0x517   :  { %v2782_v41 = vpop.f32.mrf.mxu0 }
 0x518   :  { %v2783_v47 = vadd.f32 %v3986_v46, %v2782_v41 }
 0x51a   :  { %v2789_v26 = vsel %vm2788_vm0, %v2783_v47, -1e+30 }
 0x51b   :  { %2790 = vmax.xlane.f32.xlu0 %v2789_v26 }
 0x51f   :  { %v2784_v42 = vpop.f32.mrf.mxu0 }
 0x58e   :  { %v2791_v25 = vpop.xlane.xlu0 %2790 }
 0x58f   :  { %v2792_v50 = vsub.f32 %v2789_v26, %v2791_v25 }
 0x591   :  { %v2793_v17 = vmul.f32 1.442695, %v2792_v50 }
 0x593   :  { %3987 = vpow2.f32 %v2793_v17 }
 0x599   :  { %v3988_v1 = vpop.eup %3987 }
 0x59a   :  { %2795 = vadd.xlane.f32.xlu0 %v3988_v1 }
 0x60d   :  { %v2796_v32 = vpop.xlane.xlu0 %2795 }
 0x60e   :  { %3989 = vlog2.f32 %v2796_v32 }
 0x614   :  { %v3990_v12 = vpop.eup %3989 }
 0x615   :  { %v2798_v4 = vmul.f32 0.6931472, %v3990_v12 }
 0x617   :  { %v2799_v55 = vsub.f32 %v2792_v50, %v2798_v4 }
 0x619   :  { %2800 = vst [vmem:[%s6032_s10] sm:$0xff] %v2799_v55 }

</bundles_post_ra>
